<compile_context>
chip_gen: v6e
topology: v6e:2x2x1
jax: 0.10.0
libtpu: 0.0.40
codegen_flags: <defaults>
</compile_context>

<pallas_src>
import functools

import jax
import jax.numpy as jnp
from jax import lax
from jax.experimental import pallas as pl
from jax.experimental.pallas import tpu as pltpu

BN_EPS = 1e-5
_VMEM_LIMIT = 48 * 1024 * 1024          # > v5e's 16 MiB scoped default, < v7x's 64 MiB


# --------------------------- matmul precision helpers -----------------------

def _split_hi_lo(x):
    """Split f32 -> (hi, lo) bf16 pair with x ~= hi + lo."""
    hi = x.astype(jnp.bfloat16)
    lo = (x - hi.astype(jnp.float32)).astype(jnp.bfloat16)
    return hi, lo


def _dot3(a_hi, a_lo, b_hi, b_lo):
    """~f32-accurate matmul as three native bf16 MXU passes (== Precision.HIGH)."""
    mm = lambda u, v: jnp.dot(u, v, preferred_element_type=jnp.float32)
    return mm(a_hi, b_hi) + mm(a_lo, b_hi) + mm(a_hi, b_lo)


def _round_up(x, m):
    return ((x + m - 1) // m) * m


# ----------------------------- Pallas kernels ------------------------------

def _conv_block_fused_kernel(p_ref, wh_ref, wl_ref, b_ref, g_ref, bt_ref, o_ref):
    # Single-pass: Conv (im2col matmul) -> bias -> ReLU -> training-mode BN.
    # Used only when all rows fit one block (tiny tail layers / tiny tests).
    a_hi, a_lo = _split_hi_lo(p_ref[...])
    y = _dot3(a_hi, a_lo, wh_ref[...], wl_ref[...])
    y = jnp.maximum(y + b_ref[...], 0.0)
    n = y.shape[0]
    mean = jnp.sum(y, axis=0, keepdims=True) * (1.0 / n)
    d = y - mean
    var = jnp.sum(d * d, axis=0, keepdims=True) * (1.0 / n)
    o_ref[...] = d * lax.rsqrt(var + BN_EPS) * g_ref[...] + bt_ref[...]


def _conv_relu_stats_kernel(p_ref, wh_ref, wl_ref, b_ref, y_ref, st_ref,
                            *, m_total, tm):
    # Two-pass BN, pass A (row-tiled, "parallel"): conv+bias+ReLU, store the y
    # tile, emit masked per-tile (sum, sum-of-squares) partials.
    a_hi, a_lo = _split_hi_lo(p_ref[...])
    y = _dot3(a_hi, a_lo, wh_ref[...], wl_ref[...])
    y = jnp.maximum(y + b_ref[...], 0.0)
    y_ref[...] = y
    row = pl.program_id(0) * tm + lax.broadcasted_iota(jnp.int32, (tm, 1), 0)
    ym = jnp.where(row < m_total, y, 0.0)          # padded rows excluded from stats
    s1 = jnp.sum(ym, axis=0, keepdims=True)
    s2 = jnp.sum(ym * ym, axis=0, keepdims=True)
    st_ref[0] = jnp.concatenate([s1, s2], axis=0)


def _bn_affine_kernel(y_ref, sc_ref, sh_ref, o_ref):
    # Two-pass BN, pass B (row-tiled, "parallel"): z = y * scale + shift.
    o_ref[...] = y_ref[...] * sc_ref[...] + sh_ref[...]


def _final_block_kernel(p_ref, wh_ref, wl_ref, b_ref, g_ref, bt_ref, t_ref, o_ref,
                        *, s5, ct):
    # Fused: last conv block (batch-vectorized over all B*S5 rows) -> BN ->
    # AdaptiveAvgPool2d(1) -> FiLM modulation of the NCHW-rows target, with
    # lane-dense (Ct, H*W) stores.  Channels were pre-permuted so
    # fv[:ct] = betas, fv[ct:] = gammas.
    n = p_ref.shape[0]
    bsz = n // s5
    chf = wh_ref.shape[1]

    a_hi, a_lo = _split_hi_lo(p_ref[...])
    y = _dot3(a_hi, a_lo, wh_ref[...], wl_ref[...])
    y = jnp.maximum(y + b_ref[...], 0.0)
    mean = jnp.sum(y, axis=0, keepdims=True) * (1.0 / n)
    d = y - mean
    var = jnp.sum(d * d, axis=0, keepdims=True) * (1.0 / n)
    z = d * lax.rsqrt(var + BN_EPS) * g_ref[...] + bt_ref[...]       # (n, chf)

    # Identity mask used to turn a (1, chf) row into a (chf, 1) column with
    # plain VPU ops + a lane reduce (avoids relying on sub-tile transposes).
    ii = lax.broadcasted_iota(jnp.int32, (chf, chf), 0)
    jj = lax.broadcasted_iota(jnp.int32, (chf, chf), 1)
    eye = (ii == jj).astype(jnp.float32)

    inv_s5 = 1.0 / s5
    for bi in range(bsz):                                            # tiny static loop
        fv_row = jnp.sum(z[bi * s5:(bi + 1) * s5, :], axis=0,
                         keepdims=True) * inv_s5                     # (1, chf) GAP
        fv_col = jnp.sum(jnp.broadcast_to(fv_row, (chf, chf)) * eye,
                         axis=1, keepdims=True)                      # (chf, 1)
        o_ref[bi] = t_ref[bi] * fv_col[ct:, :] + fv_col[:ct, :]      # (Ct, H*W)


# --------------------------- pallas_call wrappers ---------------------------

def _full_spec(shape):
    rank = len(shape)
    return pl.BlockSpec(shape, lambda i, _r=rank: (0,) * _r)


def _cparams(semantics):
    return pltpu.CompilerParams(dimension_semantics=semantics,
                                vmem_limit_bytes=_VMEM_LIMIT)


def _run_conv_block_fused(rows, lp):
    m, _ = rows.shape
    cout = lp['w_hi'].shape[1]
    return pl.pallas_call(
        _conv_block_fused_kernel,
        out_shape=jax.ShapeDtypeStruct((m, cout), jnp.float32),
        grid=(1,),
        in_specs=[_full_spec(rows.shape), _full_spec(lp['w_hi'].shape),
                  _full_spec(lp['w_lo'].shape), _full_spec(lp['b'].shape),
                  _full_spec(lp['g'].shape), _full_spec(lp['bt'].shape)],
        out_specs=_full_spec((m, cout)),
        compiler_params=_cparams(("arbitrary",)),
    )(rows, lp['w_hi'], lp['w_lo'], lp['b'], lp['g'], lp['bt'])


def _run_conv_relu_stats(rows, lp, tm, num_tiles, m_total):
    m_pad, kdim = rows.shape
    cout = lp['w_hi'].shape[1]
    kern = functools.partial(_conv_relu_stats_kernel, m_total=m_total, tm=tm)
    return pl.pallas_call(
        kern,
        out_shape=(jax.ShapeDtypeStruct((m_pad, cout), jnp.float32),
                   jax.ShapeDtypeStruct((num_tiles, 2, cout), jnp.float32)),
        grid=(num_tiles,),
        in_specs=[pl.BlockSpec((tm, kdim), lambda i: (i, 0)),
                  pl.BlockSpec(lp['w_hi'].shape, lambda i: (0, 0)),   # resident
                  pl.BlockSpec(lp['w_lo'].shape, lambda i: (0, 0)),   # resident
                  pl.BlockSpec(lp['b'].shape, lambda i: (0, 0))],
        out_specs=(pl.BlockSpec((tm, cout), lambda i: (i, 0)),
                   pl.BlockSpec((1, 2, cout), lambda i: (i, 0, 0))),
        compiler_params=_cparams(("parallel",)),
    )(rows, lp['w_hi'], lp['w_lo'], lp['b'])


def _run_bn_affine(y, scale, shift, tm, num_tiles):
    m_pad, cout = y.shape
    return pl.pallas_call(
        _bn_affine_kernel,
        out_shape=jax.ShapeDtypeStruct((m_pad, cout), jnp.float32),
        grid=(num_tiles,),
        in_specs=[pl.BlockSpec((tm, cout), lambda i: (i, 0)),
                  pl.BlockSpec((1, cout), lambda i: (0, 0)),
                  pl.BlockSpec((1, cout), lambda i: (0, 0))],
        out_specs=pl.BlockSpec((tm, cout), lambda i: (i, 0)),
        compiler_params=_cparams(("parallel",)),
    )(y, scale, shift)


def _run_final_block(p5, lp, target_rows, *, s5, ct):
    b, _, hw = target_rows.shape
    kern = functools.partial(_final_block_kernel, s5=s5, ct=ct)
    return pl.pallas_call(
        kern,
        out_shape=jax.ShapeDtypeStruct((b, ct, hw), jnp.float32),
        grid=(1,),
        in_specs=[_full_spec(p5.shape), _full_spec(lp['w_hi'].shape),
                  _full_spec(lp['w_lo'].shape), _full_spec(lp['b'].shape),
                  _full_spec(lp['g'].shape), _full_spec(lp['bt'].shape),
                  _full_spec(target_rows.shape)],
        out_specs=_full_spec((b, ct, hw)),
        compiler_params=_cparams(("arbitrary",)),
    )(p5, lp['w_hi'], lp['w_lo'], lp['b'], lp['g'], lp['bt'], target_rows)


def _conv_block(rows, lp, row_tile):
    """One conv(k,s,p)+ReLU+BN block on im2col rows; returns (M, Cout) rows."""
    m, _ = rows.shape
    if m <= row_tile:
        return _run_conv_block_fused(rows, lp)

    # Row-tiled two-pass BatchNorm.
    m_pad = _round_up(m, row_tile)
    if m_pad != m:
        rows = jnp.pad(rows, ((0, m_pad - m), (0, 0)))
    num_tiles = m_pad // row_tile
    y, stats = _run_conv_relu_stats(rows, lp, row_tile, num_tiles, m)
    s = jnp.sum(stats, axis=0)                               # (2, Cout) tiny reduce
    mean = s[0] * (1.0 / m)
    var = jnp.maximum(s[1] * (1.0 / m) - mean * mean, 0.0)
    scale = lp['g'][0] * lax.rsqrt(var + BN_EPS)
    shift = lp['bt'][0] - mean * scale
    z = _run_bn_affine(y, scale[None, :], shift[None, :], row_tile, num_tiles)
    return z[:m] if m_pad != m else z


# ------------------------------- JAX glue ----------------------------------

def _im2col_nhwc(x, k, s, p):
    """NHWC -> (B, Ho, Wo, k*k*C) patches (feature order kh, kw, c); K padded to 128."""
    b, h, w, c = x.shape
    ho = (h + 2 * p - k) // s + 1
    wo = (w + 2 * p - k) // s + 1
    xp = jnp.pad(x, ((0, 0), (p, p), (p, p), (0, 0)))
    cols = []
    for kh in range(k):
        for kw in range(k):
            cols.append(lax.slice(
                xp, (0, kh, kw, 0),
                (b, kh + s * (ho - 1) + 1, kw + s * (wo - 1) + 1, c),
                (1, s, s, 1)))
    patches = jnp.concatenate(cols, axis=-1)
    pad = (-patches.shape[-1]) % 128
    if pad:                                                  # lane-align K (layer 1)
        patches = jnp.pad(patches, ((0, 0), (0, 0), (0, 0), (0, pad)))
    return patches, ho, wo


def _layer_cfgs(ch_in, concat):
    ch_fin = ch_in * 2 * 2 if concat else ch_in * 2
    return ((ch_in, 128, 5, 2, 2),
            (128, 128, 3, 2, 1),
            (128, 128, 3, 2, 1),
            (128, 128, 3, 2, 1),
            (128, ch_fin, 3, 1, 1))


def init_params(key, ch_in, concat=False):
    params = []
    for (cin, cout, k, s, p) in _layer_cfgs(ch_in, concat):
        key, k1, k2, k3, k4 = jax.random.split(key, 5)
        fan_in = cin * k * k
        params.append(dict(
            w=jax.random.normal(k1, (cout, cin, k, k), jnp.float32)
              / jnp.sqrt(float(fan_in)),
            b=0.1 * jax.random.normal(k2, (cout,), jnp.float32),
            gamma=1.0 + 0.1 * jax.random.normal(k3, (cout,), jnp.float32),
            beta=0.1 * jax.random.normal(k4, (cout,), jnp.float32),
            k=k, s=s, p=p))
    return params


def prepare_params(params):
    """One-time conversion of PyTorch-layout weights into (K, Cout) matmul layout
    (K zero-padded to a multiple of 128), pre-split into bf16 (hi, lo), with the
    last layer's output channels de-interleaved (betas first, gammas second)."""
    prep = []
    n_layers = len(params)
    for li, lp in enumerate(params):
        w = lp['w']                                          # (Cout, Cin, k, k)
        cout, cin, k, _ = w.shape
        w_mat = jnp.transpose(w, (2, 3, 1, 0)).reshape(k * k * cin, cout)
        pad = (-w_mat.shape[0]) % 128
        if pad:
            w_mat = jnp.pad(w_mat, ((0, pad), (0, 0)))
        b, g, bt = lp['b'], lp['gamma'], lp['beta']
        if li == n_layers - 1:
            # film_vector.view(B, Ct, 2): even channels -> beta, odd -> gamma.
            perm = jnp.concatenate([jnp.arange(0, cout, 2), jnp.arange(1, cout, 2)])
            w_mat = w_mat[:, perm]
            b, g, bt = b[perm], g[perm], bt[perm]
        w_hi = w_mat.astype(jnp.bfloat16)
        w_lo = (w_mat - w_hi.astype(jnp.float32)).astype(jnp.bfloat16)
        prep.append(dict(w_hi=w_hi, w_lo=w_lo,
                         b=b[None, :], g=g[None, :], bt=bt[None, :]))
    return prep


@functools.partial(jax.jit, static_argnames=("cfgs", "concat", "row_tile"))
def film_layer_forward(prep, x, skip_x, *, cfgs, concat=False, row_tile=512):
    b, c, h, w = x.shape
    x_nhwc = jnp.transpose(x, (0, 2, 3, 1))      # single boundary transpose

    # ---- FeatureExtractor blocks 1-4 (row-tiled / fused Pallas conv blocks) ----
    act = x_nhwc
    for li in range(4):
        _, cout, k, s, p = cfgs[li]
        patches, ho, wo = _im2col_nhwc(act, k, s, p)
        rows = patches.reshape(b * ho * wo, patches.shape[-1])
        rows_out = _conv_block(rows, prep[li], row_tile)
        act = rows_out.reshape(b, ho, wo, cout)  # metadata-only reshape

    # ---- block 5 + AdaptiveAvgPool2d(1) + FiLM: one fused Pallas kernel ----
    _, ch_fin, k, s, p = cfgs[4]
    patches, ho, wo = _im2col_nhwc(act, k, s, p)
    s5 = ho * wo
    p5 = patches.reshape(b * s5, patches.shape[-1])

    # FiLM target stays in NCHW-rows layout: (B, Ct, H*W), lane dim = H*W.
    target = jnp.concatenate([x, skip_x], axis=1) if concat else x
    ct = target.shape[1]                                     # ch_fin == 2 * ct
    target_rows = target.reshape(b, ct, h * w)

    out_rows = _run_final_block(p5, prep[4], target_rows, s5=s5, ct=ct)
    return out_rows.reshape(b, ct, h, w)                     # pure reshape out


# --------------------------- pure-JAX reference -----------------------------

def _reference_forward(params, x, skip_x, concat=False):
    act = x
    for lp in params:
        y = lax.conv_general_dilated(
            act, lp['w'], (lp['s'], lp['s']), [(lp['p'], lp['p'])] * 2,
            dimension_numbers=('NCHW', 'OIHW', 'NCHW'),
            precision=jax.lax.Precision.HIGHEST)
        y = y + lp['b'][None, :, None, None]
        y = jnp.maximum(y, 0.0)
        mean = jnp.mean(y, axis=(0, 2, 3), keepdims=True)
        var = jnp.mean((y - mean) ** 2, axis=(0, 2, 3), keepdims=True)
        act = ((y - mean) / jnp.sqrt(var + BN_EPS)
               * lp['gamma'][None, :, None, None]
               + lp['beta'][None, :, None, None])
    film = jnp.mean(act, axis=(2, 3))
    target = jnp.concatenate([x, skip_x], axis=1) if concat else x
    b, ct, _, _ = target.shape
    fv = film.reshape(b, ct, 2)
    return target * fv[:, :, 1][:, :, None, None] + fv[:, :, 0][:, :, None, None]


# ---------------------------------- main ------------------------------------

if __name__ == "__main__":
    key = jax.random.PRNGKey(0)
    kx, ks, kp = jax.random.split(key, 3)
    B, C, H, W = 2, 4, 16, 16
    x = jax.random.normal(kx, (B, C, H, W), jnp.float32)
    skip_x = jax.random.normal(ks, (B, C, H, W), jnp.float32)

    ok = True
    for concat in (False, True):
        params = init_params(kp, C, concat=concat)
        prep = prepare_params(params)
        cfgs = _layer_cfgs(C, concat)
        ref = _reference_forward(params, x, skip_x, concat=concat)
        expected_c = 2 * C if concat else C
        # row_tile=512: fused single-pass path everywhere (production default);
        # row_tile=24: forces the row-tiled two-pass-BN path (with row masking)
        # on layers 1-2 so that path is exercised on-device too.
        for row_tile in (512, 24):
            out = film_layer_forward(prep, x, skip_x, cfgs=cfgs,
                                     concat=concat, row_tile=row_tile)
            out = jax.block_until_ready(out)
            ok = ok and bool(jnp.allclose(out, ref, rtol=2e-3, atol=2e-3))
            ok = ok and (out.shape == (B, expected_c, H, W))

    if not ok:
        raise SystemExit("mismatch vs pure-JAX reference")
    print("KERNEL_OK")
</pallas_src>

<mosaic_0001>
module attributes {stable_mosaic.version = 11 : i64} {
  func.func @_conv_block_fused_kernel(%arg0: i32, %arg1: memref<128x128xf32, #tpu.memory_space<vmem>>, %arg2: memref<128x128xbf16, #tpu.memory_space<vmem>>, %arg3: memref<128x128xbf16, #tpu.memory_space<vmem>>, %arg4: memref<1x128xf32, #tpu.memory_space<vmem>>, %arg5: memref<1x128xf32, #tpu.memory_space<vmem>>, %arg6: memref<1x128xf32, #tpu.memory_space<vmem>>, %arg7: memref<128x128xf32, #tpu.memory_space<vmem>>) attributes {dimension_semantics = [#tpu.dimension_semantics<arbitrary>], iteration_bounds = array<i64: 1>, scalar_prefetch = 0 : i64, scratch_operands = 0 : i64, tpu.core_type = #tpu.core_type<tc>, window_params = [{pipeline_mode = #tpu.pipeline_mode<synchronous>, transform_indices = @transform_0, window_bounds = array<i64: 128, 128>}, {pipeline_mode = #tpu.pipeline_mode<synchronous>, transform_indices = @transform_1, window_bounds = array<i64: 128, 128>}, {pipeline_mode = #tpu.pipeline_mode<synchronous>, transform_indices = @transform_2, window_bounds = array<i64: 128, 128>}, {pipeline_mode = #tpu.pipeline_mode<synchronous>, transform_indices = @transform_3, window_bounds = array<i64: 1, 128>}, {pipeline_mode = #tpu.pipeline_mode<synchronous>, transform_indices = @transform_4, window_bounds = array<i64: 1, 128>}, {pipeline_mode = #tpu.pipeline_mode<synchronous>, transform_indices = @transform_5, window_bounds = array<i64: 1, 128>}, {pipeline_mode = #tpu.pipeline_mode<synchronous>, transform_indices = @transform_6, window_bounds = array<i64: 128, 128>}]} {
    %c0 = arith.constant 0 : index
    %c0_0 = arith.constant 0 : index
    %0 = vector.load %arg1[%c0, %c0_0] : memref<128x128xf32, #tpu.memory_space<vmem>>, vector<128x128xf32>
    %1 = arith.truncf %0 : vector<128x128xf32> to vector<128x128xbf16>
    %2 = arith.extf %1 : vector<128x128xbf16> to vector<128x128xf32>
    %3 = arith.subf %0, %2 : vector<128x128xf32>
    %4 = arith.truncf %3 : vector<128x128xf32> to vector<128x128xbf16>
    %c0_1 = arith.constant 0 : index
    %c0_2 = arith.constant 0 : index
    %5 = vector.load %arg2[%c0_1, %c0_2] : memref<128x128xbf16, #tpu.memory_space<vmem>>, vector<128x128xbf16>
    %c0_3 = arith.constant 0 : index
    %c0_4 = arith.constant 0 : index
    %6 = vector.load %arg3[%c0_3, %c0_4] : memref<128x128xbf16, #tpu.memory_space<vmem>>, vector<128x128xbf16>
    %cst = arith.constant dense<0.000000e+00> : vector<128x128xf32>
    %7 = tpu.matmul %1, %5, %cst {dimension_numbers = #tpu.dot_dimension_numbers<[1], [0], [0], [1], [0, 0, 1, 1], [], []>} : vector<128x128xbf16>, vector<128x128xbf16>, vector<128x128xf32> -> vector<128x128xf32>
    %cst_5 = arith.constant dense<0.000000e+00> : vector<128x128xf32>
    %8 = tpu.matmul %4, %5, %cst_5 {dimension_numbers = #tpu.dot_dimension_numbers<[1], [0], [0], [1], [0, 0, 1, 1], [], []>} : vector<128x128xbf16>, vector<128x128xbf16>, vector<128x128xf32> -> vector<128x128xf32>
    %9 = arith.addf %7, %8 : vector<128x128xf32>
    %cst_6 = arith.constant dense<0.000000e+00> : vector<128x128xf32>
    %10 = tpu.matmul %1, %6, %cst_6 {dimension_numbers = #tpu.dot_dimension_numbers<[1], [0], [0], [1], [0, 0, 1, 1], [], []>} : vector<128x128xbf16>, vector<128x128xbf16>, vector<128x128xf32> -> vector<128x128xf32>
    %11 = arith.addf %9, %10 : vector<128x128xf32>
    %c0_7 = arith.constant 0 : index
    %c0_8 = arith.constant 0 : index
    %12 = vector.load %arg4[%c0_7, %c0_8] : memref<1x128xf32, #tpu.memory_space<vmem>>, vector<1x128xf32>
    %13 = vector.broadcast %12 : vector<1x128xf32> to vector<128x128xf32>
    %14 = arith.addf %11, %13 : vector<128x128xf32>
    %cst_9 = arith.constant 0.000000e+00 : f32
    %15 = vector.broadcast %cst_9 : f32 to vector<128x128xf32>
    %16 = arith.maximumf %14, %15 : vector<128x128xf32>
    %cst_10 = arith.constant dense<0.000000e+00> : vector<128xf32>
    %17 = vector.multi_reduction <add>, %16, %cst_10 [0] : vector<128x128xf32> to vector<128xf32>
    %18 = vector.shape_cast %17 : vector<128xf32> to vector<1x128xf32>
    %cst_11 = arith.constant 7.812500e-03 : f32
    %19 = vector.broadcast %cst_11 : f32 to vector<1x128xf32>
    %20 = arith.mulf %18, %19 : vector<1x128xf32>
    %21 = vector.broadcast %20 : vector<1x128xf32> to vector<128x128xf32>
    %22 = arith.subf %16, %21 : vector<128x128xf32>
    %23 = arith.mulf %22, %22 : vector<128x128xf32>
    %cst_12 = arith.constant dense<0.000000e+00> : vector<128xf32>
    %24 = vector.multi_reduction <add>, %23, %cst_12 [0] : vector<128x128xf32> to vector<128xf32>
    %25 = vector.shape_cast %24 : vector<128xf32> to vector<1x128xf32>
    %cst_13 = arith.constant 7.812500e-03 : f32
    %26 = vector.broadcast %cst_13 : f32 to vector<1x128xf32>
    %27 = arith.mulf %25, %26 : vector<1x128xf32>
    %cst_14 = arith.constant 9.99999974E-6 : f32
    %28 = vector.broadcast %cst_14 : f32 to vector<1x128xf32>
    %29 = arith.addf %27, %28 : vector<1x128xf32>
    %30 = math.rsqrt %29 : vector<1x128xf32>
    %31 = vector.broadcast %30 : vector<1x128xf32> to vector<128x128xf32>
    %32 = arith.mulf %22, %31 : vector<128x128xf32>
    %c0_15 = arith.constant 0 : index
    %c0_16 = arith.constant 0 : index
    %33 = vector.load %arg5[%c0_15, %c0_16] : memref<1x128xf32, #tpu.memory_space<vmem>>, vector<1x128xf32>
    %34 = vector.broadcast %33 : vector<1x128xf32> to vector<128x128xf32>
    %35 = arith.mulf %32, %34 : vector<128x128xf32>
    %c0_17 = arith.constant 0 : index
    %c0_18 = arith.constant 0 : index
    %36 = vector.load %arg6[%c0_17, %c0_18] : memref<1x128xf32, #tpu.memory_space<vmem>>, vector<1x128xf32>
    %37 = vector.broadcast %36 : vector<1x128xf32> to vector<128x128xf32>
    %38 = arith.addf %35, %37 : vector<128x128xf32>
    %c0_19 = arith.constant 0 : index
    %c0_20 = arith.constant 0 : index
    %39 = vector.load %arg7[%c0_19, %c0_20] : memref<128x128xf32, #tpu.memory_space<vmem>>, vector<128x128xf32>
    tpu.vector_store %arg7[%c0_19, %c0_20], %38 {strides = array<i32>} : memref<128x128xf32, #tpu.memory_space<vmem>>, vector<128x128xf32>,
    return
  }
  func.func @transform_0(%arg0: i32) -> (i32, i32) {
    %c0_i32 = arith.constant 0 : i32
    %c0_i32_0 = arith.constant 0 : i32
    %c0_i32_1 = arith.constant 0 : i32
    return %c0_i32, %c0_i32_0 : i32, i32
  }
  func.func @transform_1(%arg0: i32) -> (i32, i32) {
    %c0_i32 = arith.constant 0 : i32
    %c0_i32_0 = arith.constant 0 : i32
    %c0_i32_1 = arith.constant 0 : i32
    return %c0_i32, %c0_i32_0 : i32, i32
  }
  func.func @transform_2(%arg0: i32) -> (i32, i32) {
    %c0_i32 = arith.constant 0 : i32
    %c0_i32_0 = arith.constant 0 : i32
    %c0_i32_1 = arith.constant 0 : i32
    return %c0_i32, %c0_i32_0 : i32, i32
  }
  func.func @transform_3(%arg0: i32) -> (i32, i32) {
    %c0_i32 = arith.constant 0 : i32
    %c0_i32_0 = arith.constant 0 : i32
    %c0_i32_1 = arith.constant 0 : i32
    return %c0_i32, %c0_i32_0 : i32, i32
  }
  func.func @transform_4(%arg0: i32) -> (i32, i32) {
    %c0_i32 = arith.constant 0 : i32
    %c0_i32_0 = arith.constant 0 : i32
    %c0_i32_1 = arith.constant 0 : i32
    return %c0_i32, %c0_i32_0 : i32, i32
  }
  func.func @transform_5(%arg0: i32) -> (i32, i32) {
    %c0_i32 = arith.constant 0 : i32
    %c0_i32_0 = arith.constant 0 : i32
    %c0_i32_1 = arith.constant 0 : i32
    return %c0_i32, %c0_i32_0 : i32, i32
  }
  func.func @transform_6(%arg0: i32) -> (i32, i32) {
    %c0_i32 = arith.constant 0 : i32
    %c0_i32_0 = arith.constant 0 : i32
    %c0_i32_1 = arith.constant 0 : i32
    return %c0_i32, %c0_i32_0 : i32, i32
  }
}

module attributes {stable_mosaic.version = 11 : i64} {
  func.func @_conv_block_fused_kernel(%arg0: i32, %arg1: memref<32x1152xf32, #tpu.memory_space<vmem>>, %arg2: memref<1152x128xbf16, #tpu.memory_space<vmem>>, %arg3: memref<1152x128xbf16, #tpu.memory_space<vmem>>, %arg4: memref<1x128xf32, #tpu.memory_space<vmem>>, %arg5: memref<1x128xf32, #tpu.memory_space<vmem>>, %arg6: memref<1x128xf32, #tpu.memory_space<vmem>>, %arg7: memref<32x128xf32, #tpu.memory_space<vmem>>) attributes {dimension_semantics = [#tpu.dimension_semantics<arbitrary>], iteration_bounds = array<i64: 1>, scalar_prefetch = 0 : i64, scratch_operands = 0 : i64, tpu.core_type = #tpu.core_type<tc>, window_params = [{pipeline_mode = #tpu.pipeline_mode<synchronous>, transform_indices = @transform_0, window_bounds = array<i64: 32, 1152>}, {pipeline_mode = #tpu.pipeline_mode<synchronous>, transform_indices = @transform_1, window_bounds = array<i64: 1152, 128>}, {pipeline_mode = #tpu.pipeline_mode<synchronous>, transform_indices = @transform_2, window_bounds = array<i64: 1152, 128>}, {pipeline_mode = #tpu.pipeline_mode<synchronous>, transform_indices = @transform_3, window_bounds = array<i64: 1, 128>}, {pipeline_mode = #tpu.pipeline_mode<synchronous>, transform_indices = @transform_4, window_bounds = array<i64: 1, 128>}, {pipeline_mode = #tpu.pipeline_mode<synchronous>, transform_indices = @transform_5, window_bounds = array<i64: 1, 128>}, {pipeline_mode = #tpu.pipeline_mode<synchronous>, transform_indices = @transform_6, window_bounds = array<i64: 32, 128>}]} {
    %c0 = arith.constant 0 : index
    %c0_0 = arith.constant 0 : index
    %0 = vector.load %arg1[%c0, %c0_0] : memref<32x1152xf32, #tpu.memory_space<vmem>>, vector<32x1152xf32>
    %1 = arith.truncf %0 : vector<32x1152xf32> to vector<32x1152xbf16>
    %2 = arith.extf %1 : vector<32x1152xbf16> to vector<32x1152xf32>
    %3 = arith.subf %0, %2 : vector<32x1152xf32>
    %4 = arith.truncf %3 : vector<32x1152xf32> to vector<32x1152xbf16>
    %c0_1 = arith.constant 0 : index
    %c0_2 = arith.constant 0 : index
    %5 = vector.load %arg2[%c0_1, %c0_2] : memref<1152x128xbf16, #tpu.memory_space<vmem>>, vector<1152x128xbf16>
    %c0_3 = arith.constant 0 : index
    %c0_4 = arith.constant 0 : index
    %6 = vector.load %arg3[%c0_3, %c0_4] : memref<1152x128xbf16, #tpu.memory_space<vmem>>, vector<1152x128xbf16>
    %cst = arith.constant dense<0.000000e+00> : vector<32x128xf32>
    %7 = tpu.matmul %1, %5, %cst {dimension_numbers = #tpu.dot_dimension_numbers<[1], [0], [0], [1], [0, 0, 1, 1], [], []>} : vector<32x1152xbf16>, vector<1152x128xbf16>, vector<32x128xf32> -> vector<32x128xf32>
    %cst_5 = arith.constant dense<0.000000e+00> : vector<32x128xf32>
    %8 = tpu.matmul %4, %5, %cst_5 {dimension_numbers = #tpu.dot_dimension_numbers<[1], [0], [0], [1], [0, 0, 1, 1], [], []>} : vector<32x1152xbf16>, vector<1152x128xbf16>, vector<32x128xf32> -> vector<32x128xf32>
    %9 = arith.addf %7, %8 : vector<32x128xf32>
    %cst_6 = arith.constant dense<0.000000e+00> : vector<32x128xf32>
    %10 = tpu.matmul %1, %6, %cst_6 {dimension_numbers = #tpu.dot_dimension_numbers<[1], [0], [0], [1], [0, 0, 1, 1], [], []>} : vector<32x1152xbf16>, vector<1152x128xbf16>, vector<32x128xf32> -> vector<32x128xf32>
    %11 = arith.addf %9, %10 : vector<32x128xf32>
    %c0_7 = arith.constant 0 : index
    %c0_8 = arith.constant 0 : index
    %12 = vector.load %arg4[%c0_7, %c0_8] : memref<1x128xf32, #tpu.memory_space<vmem>>, vector<1x128xf32>
    %13 = vector.broadcast %12 : vector<1x128xf32> to vector<32x128xf32>
    %14 = arith.addf %11, %13 : vector<32x128xf32>
    %cst_9 = arith.constant 0.000000e+00 : f32
    %15 = vector.broadcast %cst_9 : f32 to vector<32x128xf32>
    %16 = arith.maximumf %14, %15 : vector<32x128xf32>
    %cst_10 = arith.constant dense<0.000000e+00> : vector<128xf32>
    %17 = vector.multi_reduction <add>, %16, %cst_10 [0] : vector<32x128xf32> to vector<128xf32>
    %18 = vector.shape_cast %17 : vector<128xf32> to vector<1x128xf32>
    %cst_11 = arith.constant 3.125000e-02 : f32
    %19 = vector.broadcast %cst_11 : f32 to vector<1x128xf32>
    %20 = arith.mulf %18, %19 : vector<1x128xf32>
    %21 = vector.broadcast %20 : vector<1x128xf32> to vector<32x128xf32>
    %22 = arith.subf %16, %21 : vector<32x128xf32>
    %23 = arith.mulf %22, %22 : vector<32x128xf32>
    %cst_12 = arith.constant dense<0.000000e+00> : vector<128xf32>
    %24 = vector.multi_reduction <add>, %23, %cst_12 [0] : vector<32x128xf32> to vector<128xf32>
    %25 = vector.shape_cast %24 : vector<128xf32> to vector<1x128xf32>
    %cst_13 = arith.constant 3.125000e-02 : f32
    %26 = vector.broadcast %cst_13 : f32 to vector<1x128xf32>
    %27 = arith.mulf %25, %26 : vector<1x128xf32>
    %cst_14 = arith.constant 9.99999974E-6 : f32
    %28 = vector.broadcast %cst_14 : f32 to vector<1x128xf32>
    %29 = arith.addf %27, %28 : vector<1x128xf32>
    %30 = math.rsqrt %29 : vector<1x128xf32>
    %31 = vector.broadcast %30 : vector<1x128xf32> to vector<32x128xf32>
    %32 = arith.mulf %22, %31 : vector<32x128xf32>
    %c0_15 = arith.constant 0 : index
    %c0_16 = arith.constant 0 : index
    %33 = vector.load %arg5[%c0_15, %c0_16] : memref<1x128xf32, #tpu.memory_space<vmem>>, vector<1x128xf32>
    %34 = vector.broadcast %33 : vector<1x128xf32> to vector<32x128xf32>
    %35 = arith.mulf %32, %34 : vector<32x128xf32>
    %c0_17 = arith.constant 0 : index
    %c0_18 = arith.constant 0 : index
    %36 = vector.load %arg6[%c0_17, %c0_18] : memref<1x128xf32, #tpu.memory_space<vmem>>, vector<1x128xf32>
    %37 = vector.broadcast %36 : vector<1x128xf32> to vector<32x128xf32>
    %38 = arith.addf %35, %37 : vector<32x128xf32>
    %c0_19 = arith.constant 0 : index
    %c0_20 = arith.constant 0 : index
    %39 = vector.load %arg7[%c0_19, %c0_20] : memref<32x128xf32, #tpu.memory_space<vmem>>, vector<32x128xf32>
    tpu.vector_store %arg7[%c0_19, %c0_20], %38 {strides = array<i32>} : memref<32x128xf32, #tpu.memory_space<vmem>>, vector<32x128xf32>,
    return
  }
  func.func @transform_0(%arg0: i32) -> (i32, i32) {
    %c0_i32 = arith.constant 0 : i32
    %c0_i32_0 = arith.constant 0 : i32
    %c0_i32_1 = arith.constant 0 : i32
    return %c0_i32, %c0_i32_0 : i32, i32
  }
  func.func @transform_1(%arg0: i32) -> (i32, i32) {
    %c0_i32 = arith.constant 0 : i32
    %c0_i32_0 = arith.constant 0 : i32
    %c0_i32_1 = arith.constant 0 : i32
    return %c0_i32, %c0_i32_0 : i32, i32
  }
  func.func @transform_2(%arg0: i32) -> (i32, i32) {
    %c0_i32 = arith.constant 0 : i32
    %c0_i32_0 = arith.constant 0 : i32
    %c0_i32_1 = arith.constant 0 : i32
    return %c0_i32, %c0_i32_0 : i32, i32
  }
  func.func @transform_3(%arg0: i32) -> (i32, i32) {
    %c0_i32 = arith.constant 0 : i32
    %c0_i32_0 = arith.constant 0 : i32
    %c0_i32_1 = arith.constant 0 : i32
    return %c0_i32, %c0_i32_0 : i32, i32
  }
  func.func @transform_4(%arg0: i32) -> (i32, i32) {
    %c0_i32 = arith.constant 0 : i32
    %c0_i32_0 = arith.constant 0 : i32
    %c0_i32_1 = arith.constant 0 : i32
    return %c0_i32, %c0_i32_0 : i32, i32
  }
  func.func @transform_5(%arg0: i32) -> (i32, i32) {
    %c0_i32 = arith.constant 0 : i32
    %c0_i32_0 = arith.constant 0 : i32
    %c0_i32_1 = arith.constant 0 : i32
    return %c0_i32, %c0_i32_0 : i32, i32
  }
  func.func @transform_6(%arg0: i32) -> (i32, i32) {
    %c0_i32 = arith.constant 0 : i32
    %c0_i32_0 = arith.constant 0 : i32
    %c0_i32_1 = arith.constant 0 : i32
    return %c0_i32, %c0_i32_0 : i32, i32
  }
}

module attributes {stable_mosaic.version = 11 : i64} {
  func.func @_conv_block_fused_kernel(%arg0: i32, %arg1: memref<8x1152xf32, #tpu.memory_space<vmem>>, %arg2: memref<1152x128xbf16, #tpu.memory_space<vmem>>, %arg3: memref<1152x128xbf16, #tpu.memory_space<vmem>>, %arg4: memref<1x128xf32, #tpu.memory_space<vmem>>, %arg5: memref<1x128xf32, #tpu.memory_space<vmem>>, %arg6: memref<1x128xf32, #tpu.memory_space<vmem>>, %arg7: memref<8x128xf32, #tpu.memory_space<vmem>>) attributes {dimension_semantics = [#tpu.dimension_semantics<arbitrary>], iteration_bounds = array<i64: 1>, scalar_prefetch = 0 : i64, scratch_operands = 0 : i64, tpu.core_type = #tpu.core_type<tc>, window_params = [{pipeline_mode = #tpu.pipeline_mode<synchronous>, transform_indices = @transform_0, window_bounds = array<i64: 8, 1152>}, {pipeline_mode = #tpu.pipeline_mode<synchronous>, transform_indices = @transform_1, window_bounds = array<i64: 1152, 128>}, {pipeline_mode = #tpu.pipeline_mode<synchronous>, transform_indices = @transform_2, window_bounds = array<i64: 1152, 128>}, {pipeline_mode = #tpu.pipeline_mode<synchronous>, transform_indices = @transform_3, window_bounds = array<i64: 1, 128>}, {pipeline_mode = #tpu.pipeline_mode<synchronous>, transform_indices = @transform_4, window_bounds = array<i64: 1, 128>}, {pipeline_mode = #tpu.pipeline_mode<synchronous>, transform_indices = @transform_5, window_bounds = array<i64: 1, 128>}, {pipeline_mode = #tpu.pipeline_mode<synchronous>, transform_indices = @transform_6, window_bounds = array<i64: 8, 128>}]} {
    %c0 = arith.constant 0 : index
    %c0_0 = arith.constant 0 : index
    %0 = vector.load %arg1[%c0, %c0_0] : memref<8x1152xf32, #tpu.memory_space<vmem>>, vector<8x1152xf32>
    %1 = arith.truncf %0 : vector<8x1152xf32> to vector<8x1152xbf16>
    %2 = arith.extf %1 : vector<8x1152xbf16> to vector<8x1152xf32>
    %3 = arith.subf %0, %2 : vector<8x1152xf32>
    %4 = arith.truncf %3 : vector<8x1152xf32> to vector<8x1152xbf16>
    %c0_1 = arith.constant 0 : index
    %c0_2 = arith.constant 0 : index
    %5 = vector.load %arg2[%c0_1, %c0_2] : memref<1152x128xbf16, #tpu.memory_space<vmem>>, vector<1152x128xbf16>
    %c0_3 = arith.constant 0 : index
    %c0_4 = arith.constant 0 : index
    %6 = vector.load %arg3[%c0_3, %c0_4] : memref<1152x128xbf16, #tpu.memory_space<vmem>>, vector<1152x128xbf16>
    %cst = arith.constant dense<0.000000e+00> : vector<8x128xf32>
    %7 = tpu.matmul %1, %5, %cst {dimension_numbers = #tpu.dot_dimension_numbers<[1], [0], [0], [1], [0, 0, 1, 1], [], []>} : vector<8x1152xbf16>, vector<1152x128xbf16>, vector<8x128xf32> -> vector<8x128xf32>
    %cst_5 = arith.constant dense<0.000000e+00> : vector<8x128xf32>
    %8 = tpu.matmul %4, %5, %cst_5 {dimension_numbers = #tpu.dot_dimension_numbers<[1], [0], [0], [1], [0, 0, 1, 1], [], []>} : vector<8x1152xbf16>, vector<1152x128xbf16>, vector<8x128xf32> -> vector<8x128xf32>
    %9 = arith.addf %7, %8 : vector<8x128xf32>
    %cst_6 = arith.constant dense<0.000000e+00> : vector<8x128xf32>
    %10 = tpu.matmul %1, %6, %cst_6 {dimension_numbers = #tpu.dot_dimension_numbers<[1], [0], [0], [1], [0, 0, 1, 1], [], []>} : vector<8x1152xbf16>, vector<1152x128xbf16>, vector<8x128xf32> -> vector<8x128xf32>
    %11 = arith.addf %9, %10 : vector<8x128xf32>
    %c0_7 = arith.constant 0 : index
    %c0_8 = arith.constant 0 : index
    %12 = vector.load %arg4[%c0_7, %c0_8] : memref<1x128xf32, #tpu.memory_space<vmem>>, vector<1x128xf32>
    %13 = vector.broadcast %12 : vector<1x128xf32> to vector<8x128xf32>
    %14 = arith.addf %11, %13 : vector<8x128xf32>
    %cst_9 = arith.constant 0.000000e+00 : f32
    %15 = vector.broadcast %cst_9 : f32 to vector<8x128xf32>
    %16 = arith.maximumf %14, %15 : vector<8x128xf32>
    %cst_10 = arith.constant dense<0.000000e+00> : vector<128xf32>
    %17 = vector.multi_reduction <add>, %16, %cst_10 [0] : vector<8x128xf32> to vector<128xf32>
    %18 = vector.shape_cast %17 : vector<128xf32> to vector<1x128xf32>
    %cst_11 = arith.constant 1.250000e-01 : f32
    %19 = vector.broadcast %cst_11 : f32 to vector<1x128xf32>
    %20 = arith.mulf %18, %19 : vector<1x128xf32>
    %21 = vector.broadcast %20 : vector<1x128xf32> to vector<8x128xf32>
    %22 = arith.subf %16, %21 : vector<8x128xf32>
    %23 = arith.mulf %22, %22 : vector<8x128xf32>
    %cst_12 = arith.constant dense<0.000000e+00> : vector<128xf32>
    %24 = vector.multi_reduction <add>, %23, %cst_12 [0] : vector<8x128xf32> to vector<128xf32>
    %25 = vector.shape_cast %24 : vector<128xf32> to vector<1x128xf32>
    %cst_13 = arith.constant 1.250000e-01 : f32
    %26 = vector.broadcast %cst_13 : f32 to vector<1x128xf32>
    %27 = arith.mulf %25, %26 : vector<1x128xf32>
    %cst_14 = arith.constant 9.99999974E-6 : f32
    %28 = vector.broadcast %cst_14 : f32 to vector<1x128xf32>
    %29 = arith.addf %27, %28 : vector<1x128xf32>
    %30 = math.rsqrt %29 : vector<1x128xf32>
    %31 = vector.broadcast %30 : vector<1x128xf32> to vector<8x128xf32>
    %32 = arith.mulf %22, %31 : vector<8x128xf32>
    %c0_15 = arith.constant 0 : index
    %c0_16 = arith.constant 0 : index
    %33 = vector.load %arg5[%c0_15, %c0_16] : memref<1x128xf32, #tpu.memory_space<vmem>>, vector<1x128xf32>
    %34 = vector.broadcast %33 : vector<1x128xf32> to vector<8x128xf32>
    %35 = arith.mulf %32, %34 : vector<8x128xf32>
    %c0_17 = arith.constant 0 : index
    %c0_18 = arith.constant 0 : index
    %36 = vector.load %arg6[%c0_17, %c0_18] : memref<1x128xf32, #tpu.memory_space<vmem>>, vector<1x128xf32>
    %37 = vector.broadcast %36 : vector<1x128xf32> to vector<8x128xf32>
    %38 = arith.addf %35, %37 : vector<8x128xf32>
    %c0_19 = arith.constant 0 : index
    %c0_20 = arith.constant 0 : index
    %39 = vector.load %arg7[%c0_19, %c0_20] : memref<8x128xf32, #tpu.memory_space<vmem>>, vector<8x128xf32>
    tpu.vector_store %arg7[%c0_19, %c0_20], %38 {strides = array<i32>} : memref<8x128xf32, #tpu.memory_space<vmem>>, vector<8x128xf32>,
    return
  }
  func.func @transform_0(%arg0: i32) -> (i32, i32) {
    %c0_i32 = arith.constant 0 : i32
    %c0_i32_0 = arith.constant 0 : i32
    %c0_i32_1 = arith.constant 0 : i32
    return %c0_i32, %c0_i32_0 : i32, i32
  }
  func.func @transform_1(%arg0: i32) -> (i32, i32) {
    %c0_i32 = arith.constant 0 : i32
    %c0_i32_0 = arith.constant 0 : i32
    %c0_i32_1 = arith.constant 0 : i32
    return %c0_i32, %c0_i32_0 : i32, i32
  }
  func.func @transform_2(%arg0: i32) -> (i32, i32) {
    %c0_i32 = arith.constant 0 : i32
    %c0_i32_0 = arith.constant 0 : i32
    %c0_i32_1 = arith.constant 0 : i32
    return %c0_i32, %c0_i32_0 : i32, i32
  }
  func.func @transform_3(%arg0: i32) -> (i32, i32) {
    %c0_i32 = arith.constant 0 : i32
    %c0_i32_0 = arith.constant 0 : i32
    %c0_i32_1 = arith.constant 0 : i32
    return %c0_i32, %c0_i32_0 : i32, i32
  }
  func.func @transform_4(%arg0: i32) -> (i32, i32) {
    %c0_i32 = arith.constant 0 : i32
    %c0_i32_0 = arith.constant 0 : i32
    %c0_i32_1 = arith.constant 0 : i32
    return %c0_i32, %c0_i32_0 : i32, i32
  }
  func.func @transform_5(%arg0: i32) -> (i32, i32) {
    %c0_i32 = arith.constant 0 : i32
    %c0_i32_0 = arith.constant 0 : i32
    %c0_i32_1 = arith.constant 0 : i32
    return %c0_i32, %c0_i32_0 : i32, i32
  }
  func.func @transform_6(%arg0: i32) -> (i32, i32) {
    %c0_i32 = arith.constant 0 : i32
    %c0_i32_0 = arith.constant 0 : i32
    %c0_i32_1 = arith.constant 0 : i32
    return %c0_i32, %c0_i32_0 : i32, i32
  }
}

module attributes {stable_mosaic.version = 11 : i64} {
  func.func @_conv_block_fused_kernel(%arg0: i32, %arg1: memref<2x1152xf32, #tpu.memory_space<vmem>>, %arg2: memref<1152x128xbf16, #tpu.memory_space<vmem>>, %arg3: memref<1152x128xbf16, #tpu.memory_space<vmem>>, %arg4: memref<1x128xf32, #tpu.memory_space<vmem>>, %arg5: memref<1x128xf32, #tpu.memory_space<vmem>>, %arg6: memref<1x128xf32, #tpu.memory_space<vmem>>, %arg7: memref<2x128xf32, #tpu.memory_space<vmem>>) attributes {dimension_semantics = [#tpu.dimension_semantics<arbitrary>], iteration_bounds = array<i64: 1>, scalar_prefetch = 0 : i64, scratch_operands = 0 : i64, tpu.core_type = #tpu.core_type<tc>, window_params = [{pipeline_mode = #tpu.pipeline_mode<synchronous>, transform_indices = @transform_0, window_bounds = array<i64: 2, 1152>}, {pipeline_mode = #tpu.pipeline_mode<synchronous>, transform_indices = @transform_1, window_bounds = array<i64: 1152, 128>}, {pipeline_mode = #tpu.pipeline_mode<synchronous>, transform_indices = @transform_2, window_bounds = array<i64: 1152, 128>}, {pipeline_mode = #tpu.pipeline_mode<synchronous>, transform_indices = @transform_3, window_bounds = array<i64: 1, 128>}, {pipeline_mode = #tpu.pipeline_mode<synchronous>, transform_indices = @transform_4, window_bounds = array<i64: 1, 128>}, {pipeline_mode = #tpu.pipeline_mode<synchronous>, transform_indices = @transform_5, window_bounds = array<i64: 1, 128>}, {pipeline_mode = #tpu.pipeline_mode<synchronous>, transform_indices = @transform_6, window_bounds = array<i64: 2, 128>}]} {
    %c0 = arith.constant 0 : index
    %c0_0 = arith.constant 0 : index
    %0 = vector.load %arg1[%c0, %c0_0] : memref<2x1152xf32, #tpu.memory_space<vmem>>, vector<2x1152xf32>
    %1 = arith.truncf %0 : vector<2x1152xf32> to vector<2x1152xbf16>
    %2 = arith.extf %1 : vector<2x1152xbf16> to vector<2x1152xf32>
    %3 = arith.subf %0, %2 : vector<2x1152xf32>
    %4 = arith.truncf %3 : vector<2x1152xf32> to vector<2x1152xbf16>
    %c0_1 = arith.constant 0 : index
    %c0_2 = arith.constant 0 : index
    %5 = vector.load %arg2[%c0_1, %c0_2] : memref<1152x128xbf16, #tpu.memory_space<vmem>>, vector<1152x128xbf16>
    %c0_3 = arith.constant 0 : index
    %c0_4 = arith.constant 0 : index
    %6 = vector.load %arg3[%c0_3, %c0_4] : memref<1152x128xbf16, #tpu.memory_space<vmem>>, vector<1152x128xbf16>
    %cst = arith.constant dense<0.000000e+00> : vector<2x128xf32>
    %7 = tpu.matmul %1, %5, %cst {dimension_numbers = #tpu.dot_dimension_numbers<[1], [0], [0], [1], [0, 0, 1, 1], [], []>} : vector<2x1152xbf16>, vector<1152x128xbf16>, vector<2x128xf32> -> vector<2x128xf32>
    %cst_5 = arith.constant dense<0.000000e+00> : vector<2x128xf32>
    %8 = tpu.matmul %4, %5, %cst_5 {dimension_numbers = #tpu.dot_dimension_numbers<[1], [0], [0], [1], [0, 0, 1, 1], [], []>} : vector<2x1152xbf16>, vector<1152x128xbf16>, vector<2x128xf32> -> vector<2x128xf32>
    %9 = arith.addf %7, %8 : vector<2x128xf32>
    %cst_6 = arith.constant dense<0.000000e+00> : vector<2x128xf32>
    %10 = tpu.matmul %1, %6, %cst_6 {dimension_numbers = #tpu.dot_dimension_numbers<[1], [0], [0], [1], [0, 0, 1, 1], [], []>} : vector<2x1152xbf16>, vector<1152x128xbf16>, vector<2x128xf32> -> vector<2x128xf32>
    %11 = arith.addf %9, %10 : vector<2x128xf32>
    %c0_7 = arith.constant 0 : index
    %c0_8 = arith.constant 0 : index
    %12 = vector.load %arg4[%c0_7, %c0_8] : memref<1x128xf32, #tpu.memory_space<vmem>>, vector<1x128xf32>
    %13 = vector.broadcast %12 : vector<1x128xf32> to vector<2x128xf32>
    %14 = arith.addf %11, %13 : vector<2x128xf32>
    %cst_9 = arith.constant 0.000000e+00 : f32
    %15 = vector.broadcast %cst_9 : f32 to vector<2x128xf32>
    %16 = arith.maximumf %14, %15 : vector<2x128xf32>
    %cst_10 = arith.constant dense<0.000000e+00> : vector<128xf32>
    %17 = vector.multi_reduction <add>, %16, %cst_10 [0] : vector<2x128xf32> to vector<128xf32>
    %18 = vector.shape_cast %17 : vector<128xf32> to vector<1x128xf32>
    %cst_11 = arith.constant 5.000000e-01 : f32
    %19 = vector.broadcast %cst_11 : f32 to vector<1x128xf32>
    %20 = arith.mulf %18, %19 : vector<1x128xf32>
    %21 = vector.broadcast %20 : vector<1x128xf32> to vector<2x128xf32>
    %22 = arith.subf %16, %21 : vector<2x128xf32>
    %23 = arith.mulf %22, %22 : vector<2x128xf32>
    %cst_12 = arith.constant dense<0.000000e+00> : vector<128xf32>
    %24 = vector.multi_reduction <add>, %23, %cst_12 [0] : vector<2x128xf32> to vector<128xf32>
    %25 = vector.shape_cast %24 : vector<128xf32> to vector<1x128xf32>
    %cst_13 = arith.constant 5.000000e-01 : f32
    %26 = vector.broadcast %cst_13 : f32 to vector<1x128xf32>
    %27 = arith.mulf %25, %26 : vector<1x128xf32>
    %cst_14 = arith.constant 9.99999974E-6 : f32
    %28 = vector.broadcast %cst_14 : f32 to vector<1x128xf32>
    %29 = arith.addf %27, %28 : vector<1x128xf32>
    %30 = math.rsqrt %29 : vector<1x128xf32>
    %31 = vector.broadcast %30 : vector<1x128xf32> to vector<2x128xf32>
    %32 = arith.mulf %22, %31 : vector<2x128xf32>
    %c0_15 = arith.constant 0 : index
    %c0_16 = arith.constant 0 : index
    %33 = vector.load %arg5[%c0_15, %c0_16] : memref<1x128xf32, #tpu.memory_space<vmem>>, vector<1x128xf32>
    %34 = vector.broadcast %33 : vector<1x128xf32> to vector<2x128xf32>
    %35 = arith.mulf %32, %34 : vector<2x128xf32>
    %c0_17 = arith.constant 0 : index
    %c0_18 = arith.constant 0 : index
    %36 = vector.load %arg6[%c0_17, %c0_18] : memref<1x128xf32, #tpu.memory_space<vmem>>, vector<1x128xf32>
    %37 = vector.broadcast %36 : vector<1x128xf32> to vector<2x128xf32>
    %38 = arith.addf %35, %37 : vector<2x128xf32>
    %c0_19 = arith.constant 0 : index
    %c0_20 = arith.constant 0 : index
    %39 = vector.load %arg7[%c0_19, %c0_20] : memref<2x128xf32, #tpu.memory_space<vmem>>, vector<2x128xf32>
    tpu.vector_store %arg7[%c0_19, %c0_20], %38 {strides = array<i32>} : memref<2x128xf32, #tpu.memory_space<vmem>>, vector<2x128xf32>,
    return
  }
  func.func @transform_0(%arg0: i32) -> (i32, i32) {
    %c0_i32 = arith.constant 0 : i32
    %c0_i32_0 = arith.constant 0 : i32
    %c0_i32_1 = arith.constant 0 : i32
    return %c0_i32, %c0_i32_0 : i32, i32
  }
  func.func @transform_1(%arg0: i32) -> (i32, i32) {
    %c0_i32 = arith.constant 0 : i32
    %c0_i32_0 = arith.constant 0 : i32
    %c0_i32_1 = arith.constant 0 : i32
    return %c0_i32, %c0_i32_0 : i32, i32
  }
  func.func @transform_2(%arg0: i32) -> (i32, i32) {
    %c0_i32 = arith.constant 0 : i32
    %c0_i32_0 = arith.constant 0 : i32
    %c0_i32_1 = arith.constant 0 : i32
    return %c0_i32, %c0_i32_0 : i32, i32
  }
  func.func @transform_3(%arg0: i32) -> (i32, i32) {
    %c0_i32 = arith.constant 0 : i32
    %c0_i32_0 = arith.constant 0 : i32
    %c0_i32_1 = arith.constant 0 : i32
    return %c0_i32, %c0_i32_0 : i32, i32
  }
  func.func @transform_4(%arg0: i32) -> (i32, i32) {
    %c0_i32 = arith.constant 0 : i32
    %c0_i32_0 = arith.constant 0 : i32
    %c0_i32_1 = arith.constant 0 : i32
    return %c0_i32, %c0_i32_0 : i32, i32
  }
  func.func @transform_5(%arg0: i32) -> (i32, i32) {
    %c0_i32 = arith.constant 0 : i32
    %c0_i32_0 = arith.constant 0 : i32
    %c0_i32_1 = arith.constant 0 : i32
    return %c0_i32, %c0_i32_0 : i32, i32
  }
  func.func @transform_6(%arg0: i32) -> (i32, i32) {
    %c0_i32 = arith.constant 0 : i32
    %c0_i32_0 = arith.constant 0 : i32
    %c0_i32_1 = arith.constant 0 : i32
    return %c0_i32, %c0_i32_0 : i32, i32
  }
}

module attributes {stable_mosaic.version = 11 : i64} {
  func.func @_final_block_kernel(%arg0: i32, %arg1: memref<2x1152xf32, #tpu.memory_space<vmem>>, %arg2: memref<1152x8xbf16, #tpu.memory_space<vmem>>, %arg3: memref<1152x8xbf16, #tpu.memory_space<vmem>>, %arg4: memref<1x8xf32, #tpu.memory_space<vmem>>, %arg5: memref<1x8xf32, #tpu.memory_space<vmem>>, %arg6: memref<1x8xf32, #tpu.memory_space<vmem>>, %arg7: memref<2x4x256xf32, #tpu.memory_space<vmem>>, %arg8: memref<2x4x256xf32, #tpu.memory_space<vmem>>) attributes {dimension_semantics = [#tpu.dimension_semantics<arbitrary>], iteration_bounds = array<i64: 1>, scalar_prefetch = 0 : i64, scratch_operands = 0 : i64, tpu.core_type = #tpu.core_type<tc>, window_params = [{pipeline_mode = #tpu.pipeline_mode<synchronous>, transform_indices = @transform_0, window_bounds = array<i64: 2, 1152>}, {pipeline_mode = #tpu.pipeline_mode<synchronous>, transform_indices = @transform_1, window_bounds = array<i64: 1152, 8>}, {pipeline_mode = #tpu.pipeline_mode<synchronous>, transform_indices = @transform_2, window_bounds = array<i64: 1152, 8>}, {pipeline_mode = #tpu.pipeline_mode<synchronous>, transform_indices = @transform_3, window_bounds = array<i64: 1, 8>}, {pipeline_mode = #tpu.pipeline_mode<synchronous>, transform_indices = @transform_4, window_bounds = array<i64: 1, 8>}, {pipeline_mode = #tpu.pipeline_mode<synchronous>, transform_indices = @transform_5, window_bounds = array<i64: 1, 8>}, {pipeline_mode = #tpu.pipeline_mode<synchronous>, transform_indices = @transform_6, window_bounds = array<i64: 2, 4, 256>}, {pipeline_mode = #tpu.pipeline_mode<synchronous>, transform_indices = @transform_7, window_bounds = array<i64: 2, 4, 256>}]} {
    %c0 = arith.constant 0 : index
    %c0_0 = arith.constant 0 : index
    %0 = vector.load %arg1[%c0, %c0_0] : memref<2x1152xf32, #tpu.memory_space<vmem>>, vector<2x1152xf32>
    %1 = arith.truncf %0 : vector<2x1152xf32> to vector<2x1152xbf16>
    %2 = arith.extf %1 : vector<2x1152xbf16> to vector<2x1152xf32>
    %3 = arith.subf %0, %2 : vector<2x1152xf32>
    %4 = arith.truncf %3 : vector<2x1152xf32> to vector<2x1152xbf16>
    %c0_1 = arith.constant 0 : index
    %c0_2 = arith.constant 0 : index
    %5 = vector.load %arg2[%c0_1, %c0_2] : memref<1152x8xbf16, #tpu.memory_space<vmem>>, vector<1152x8xbf16>
    %c0_3 = arith.constant 0 : index
    %c0_4 = arith.constant 0 : index
    %6 = vector.load %arg3[%c0_3, %c0_4] : memref<1152x8xbf16, #tpu.memory_space<vmem>>, vector<1152x8xbf16>
    %cst = arith.constant dense<0.000000e+00> : vector<2x8xf32>
    %7 = tpu.matmul %1, %5, %cst {dimension_numbers = #tpu.dot_dimension_numbers<[1], [0], [0], [1], [0, 0, 1, 1], [], []>} : vector<2x1152xbf16>, vector<1152x8xbf16>, vector<2x8xf32> -> vector<2x8xf32>
    %cst_5 = arith.constant dense<0.000000e+00> : vector<2x8xf32>
    %8 = tpu.matmul %4, %5, %cst_5 {dimension_numbers = #tpu.dot_dimension_numbers<[1], [0], [0], [1], [0, 0, 1, 1], [], []>} : vector<2x1152xbf16>, vector<1152x8xbf16>, vector<2x8xf32> -> vector<2x8xf32>
    %9 = arith.addf %7, %8 : vector<2x8xf32>
    %cst_6 = arith.constant dense<0.000000e+00> : vector<2x8xf32>
    %10 = tpu.matmul %1, %6, %cst_6 {dimension_numbers = #tpu.dot_dimension_numbers<[1], [0], [0], [1], [0, 0, 1, 1], [], []>} : vector<2x1152xbf16>, vector<1152x8xbf16>, vector<2x8xf32> -> vector<2x8xf32>
    %11 = arith.addf %9, %10 : vector<2x8xf32>
    %c0_7 = arith.constant 0 : index
    %c0_8 = arith.constant 0 : index
    %12 = vector.load %arg4[%c0_7, %c0_8] : memref<1x8xf32, #tpu.memory_space<vmem>>, vector<1x8xf32>
    %13 = vector.broadcast %12 : vector<1x8xf32> to vector<2x8xf32>
    %14 = arith.addf %11, %13 : vector<2x8xf32>
    %cst_9 = arith.constant 0.000000e+00 : f32
    %15 = vector.broadcast %cst_9 : f32 to vector<2x8xf32>
    %16 = arith.maximumf %14, %15 : vector<2x8xf32>
    %cst_10 = arith.constant dense<0.000000e+00> : vector<8xf32>
    %17 = vector.multi_reduction <add>, %16, %cst_10 [0] : vector<2x8xf32> to vector<8xf32>
    %18 = vector.shape_cast %17 : vector<8xf32> to vector<1x8xf32>
    %cst_11 = arith.constant 5.000000e-01 : f32
    %19 = vector.broadcast %cst_11 : f32 to vector<1x8xf32>
    %20 = arith.mulf %18, %19 : vector<1x8xf32>
    %21 = vector.broadcast %20 : vector<1x8xf32> to vector<2x8xf32>
    %22 = arith.subf %16, %21 : vector<2x8xf32>
    %23 = arith.mulf %22, %22 : vector<2x8xf32>
    %cst_12 = arith.constant dense<0.000000e+00> : vector<8xf32>
    %24 = vector.multi_reduction <add>, %23, %cst_12 [0] : vector<2x8xf32> to vector<8xf32>
    %25 = vector.shape_cast %24 : vector<8xf32> to vector<1x8xf32>
    %cst_13 = arith.constant 5.000000e-01 : f32
    %26 = vector.broadcast %cst_13 : f32 to vector<1x8xf32>
    %27 = arith.mulf %25, %26 : vector<1x8xf32>
    %cst_14 = arith.constant 9.99999974E-6 : f32
    %28 = vector.broadcast %cst_14 : f32 to vector<1x8xf32>
    %29 = arith.addf %27, %28 : vector<1x8xf32>
    %30 = math.rsqrt %29 : vector<1x8xf32>
    %31 = vector.broadcast %30 : vector<1x8xf32> to vector<2x8xf32>
    %32 = arith.mulf %22, %31 : vector<2x8xf32>
    %c0_15 = arith.constant 0 : index
    %c0_16 = arith.constant 0 : index
    %33 = vector.load %arg5[%c0_15, %c0_16] : memref<1x8xf32, #tpu.memory_space<vmem>>, vector<1x8xf32>
    %34 = vector.broadcast %33 : vector<1x8xf32> to vector<2x8xf32>
    %35 = arith.mulf %32, %34 : vector<2x8xf32>
    %c0_17 = arith.constant 0 : index
    %c0_18 = arith.constant 0 : index
    %36 = vector.load %arg6[%c0_17, %c0_18] : memref<1x8xf32, #tpu.memory_space<vmem>>, vector<1x8xf32>
    %37 = vector.broadcast %36 : vector<1x8xf32> to vector<2x8xf32>
    %38 = arith.addf %35, %37 : vector<2x8xf32>
    %39 = tpu.iota {dimensions = array<i32: 0>} : vector<8x8xi32>
    %40 = tpu.iota {dimensions = array<i32: 1>} : vector<8x8xi32>
    %41 = arith.cmpi eq, %39, %40 : vector<8x8xi32>
    %42 = arith.extui %41 : vector<8x8xi1> to vector<8x8xi32>
    %43 = arith.sitofp %42 : vector<8x8xi32> to vector<8x8xf32>
    %44 = vector.extract_strided_slice %38 {offsets = [0, 0], sizes = [1, 8], strides = [1, 1]} : vector<2x8xf32> to vector<1x8xf32>
    %cst_19 = arith.constant dense<0.000000e+00> : vector<8xf32>
    %45 = vector.multi_reduction <add>, %44, %cst_19 [0] : vector<1x8xf32> to vector<8xf32>
    %46 = vector.shape_cast %45 : vector<8xf32> to vector<1x8xf32>
    %cst_20 = arith.constant 1.000000e+00 : f32
    %47 = vector.broadcast %cst_20 : f32 to vector<1x8xf32>
    %48 = arith.mulf %46, %47 : vector<1x8xf32>
    %49 = vector.shape_cast %48 : vector<1x8xf32> to vector<1x8xf32>
    %50 = vector.broadcast %49 : vector<1x8xf32> to vector<8x8xf32>
    %51 = arith.mulf %50, %43 : vector<8x8xf32>
    %cst_21 = arith.constant dense<0.000000e+00> : vector<8xf32>
    %52 = vector.multi_reduction <add>, %51, %cst_21 [1] : vector<8x8xf32> to vector<8xf32>
    %53 = vector.shape_cast %52 : vector<8xf32> to vector<8x1xf32>
    %c0_22 = arith.constant 0 : index
    %c0_23 = arith.constant 0 : index
    %c0_24 = arith.constant 0 : index
    %54 = vector.load %arg7[%c0_22, %c0_23, %c0_24] : memref<2x4x256xf32, #tpu.memory_space<vmem>>, vector<1x4x256xf32>
    %55 = vector.shape_cast %54 : vector<1x4x256xf32> to vector<4x256xf32>
    %56 = vector.extract_strided_slice %53 {offsets = [4, 0], sizes = [4, 1], strides = [1, 1]} : vector<8x1xf32> to vector<4x1xf32>
    %57 = vector.broadcast %56 : vector<4x1xf32> to vector<4x256xf32>
    %58 = arith.mulf %55, %57 : vector<4x256xf32>
    %59 = vector.extract_strided_slice %53 {offsets = [0, 0], sizes = [4, 1], strides = [1, 1]} : vector<8x1xf32> to vector<4x1xf32>
    %60 = vector.broadcast %59 : vector<4x1xf32> to vector<4x256xf32>
    %61 = arith.addf %58, %60 : vector<4x256xf32>
    %c0_25 = arith.constant 0 : index
    %c0_26 = arith.constant 0 : index
    %c0_27 = arith.constant 0 : index
    %62 = vector.load %arg8[%c0_25, %c0_26, %c0_27] : memref<2x4x256xf32, #tpu.memory_space<vmem>>, vector<1x4x256xf32>
    %63 = vector.shape_cast %62 : vector<1x4x256xf32> to vector<4x256xf32>
    %64 = vector.shape_cast %61 : vector<4x256xf32> to vector<1x4x256xf32>
    tpu.vector_store %arg8[%c0_25, %c0_26, %c0_27], %64 {strides = array<i32>} : memref<2x4x256xf32, #tpu.memory_space<vmem>>, vector<1x4x256xf32>,
    %65 = vector.extract_strided_slice %38 {offsets = [1, 0], sizes = [1, 8], strides = [1, 1]} : vector<2x8xf32> to vector<1x8xf32>
    %cst_28 = arith.constant dense<0.000000e+00> : vector<8xf32>
    %66 = vector.multi_reduction <add>, %65, %cst_28 [0] : vector<1x8xf32> to vector<8xf32>
    %67 = vector.shape_cast %66 : vector<8xf32> to vector<1x8xf32>
    %cst_29 = arith.constant 1.000000e+00 : f32
    %68 = vector.broadcast %cst_29 : f32 to vector<1x8xf32>
    %69 = arith.mulf %67, %68 : vector<1x8xf32>
    %70 = vector.shape_cast %69 : vector<1x8xf32> to vector<1x8xf32>
    %71 = vector.broadcast %70 : vector<1x8xf32> to vector<8x8xf32>
    %72 = arith.mulf %71, %43 : vector<8x8xf32>
    %cst_30 = arith.constant dense<0.000000e+00> : vector<8xf32>
    %73 = vector.multi_reduction <add>, %72, %cst_30 [1] : vector<8x8xf32> to vector<8xf32>
    %74 = vector.shape_cast %73 : vector<8xf32> to vector<8x1xf32>
    %c1 = arith.constant 1 : index
    %c0_31 = arith.constant 0 : index
    %c0_32 = arith.constant 0 : index
    %75 = vector.load %arg7[%c1, %c0_31, %c0_32] : memref<2x4x256xf32, #tpu.memory_space<vmem>>, vector<1x4x256xf32>
    %76 = vector.shape_cast %75 : vector<1x4x256xf32> to vector<4x256xf32>
    %77 = vector.extract_strided_slice %74 {offsets = [4, 0], sizes = [4, 1], strides = [1, 1]} : vector<8x1xf32> to vector<4x1xf32>
    %78 = vector.broadcast %77 : vector<4x1xf32> to vector<4x256xf32>
    %79 = arith.mulf %76, %78 : vector<4x256xf32>
    %80 = vector.extract_strided_slice %74 {offsets = [0, 0], sizes = [4, 1], strides = [1, 1]} : vector<8x1xf32> to vector<4x1xf32>
    %81 = vector.broadcast %80 : vector<4x1xf32> to vector<4x256xf32>
    %82 = arith.addf %79, %81 : vector<4x256xf32>
    %c1_33 = arith.constant 1 : index
    %c0_34 = arith.constant 0 : index
    %c0_35 = arith.constant 0 : index
    %83 = vector.load %arg8[%c1_33, %c0_34, %c0_35] : memref<2x4x256xf32, #tpu.memory_space<vmem>>, vector<1x4x256xf32>
    %84 = vector.shape_cast %83 : vector<1x4x256xf32> to vector<4x256xf32>
    %85 = vector.shape_cast %82 : vector<4x256xf32> to vector<1x4x256xf32>
    tpu.vector_store %arg8[%c1_33, %c0_34, %c0_35], %85 {strides = array<i32>} : memref<2x4x256xf32, #tpu.memory_space<vmem>>, vector<1x4x256xf32>,
    return
  }
  func.func @transform_0(%arg0: i32) -> (i32, i32) {
    %c0_i32 = arith.constant 0 : i32
    %c0_i32_0 = arith.constant 0 : i32
    %c0_i32_1 = arith.constant 0 : i32
    return %c0_i32, %c0_i32_0 : i32, i32
  }
  func.func @transform_1(%arg0: i32) -> (i32, i32) {
    %c0_i32 = arith.constant 0 : i32
    %c0_i32_0 = arith.constant 0 : i32
    %c0_i32_1 = arith.constant 0 : i32
    return %c0_i32, %c0_i32_0 : i32, i32
  }
  func.func @transform_2(%arg0: i32) -> (i32, i32) {
    %c0_i32 = arith.constant 0 : i32
    %c0_i32_0 = arith.constant 0 : i32
    %c0_i32_1 = arith.constant 0 : i32
    return %c0_i32, %c0_i32_0 : i32, i32
  }
  func.func @transform_3(%arg0: i32) -> (i32, i32) {
    %c0_i32 = arith.constant 0 : i32
    %c0_i32_0 = arith.constant 0 : i32
    %c0_i32_1 = arith.constant 0 : i32
    return %c0_i32, %c0_i32_0 : i32, i32
  }
  func.func @transform_4(%arg0: i32) -> (i32, i32) {
    %c0_i32 = arith.constant 0 : i32
    %c0_i32_0 = arith.constant 0 : i32
    %c0_i32_1 = arith.constant 0 : i32
    return %c0_i32, %c0_i32_0 : i32, i32
  }
  func.func @transform_5(%arg0: i32) -> (i32, i32) {
    %c0_i32 = arith.constant 0 : i32
    %c0_i32_0 = arith.constant 0 : i32
    %c0_i32_1 = arith.constant 0 : i32
    return %c0_i32, %c0_i32_0 : i32, i32
  }
  func.func @transform_6(%arg0: i32) -> (i32, i32, i32) {
    %c0_i32 = arith.constant 0 : i32
    %c0_i32_0 = arith.constant 0 : i32
    %c0_i32_1 = arith.constant 0 : i32
    %c0_i32_2 = arith.constant 0 : i32
    return %c0_i32, %c0_i32_0, %c0_i32_1 : i32, i32, i32
  }
  func.func @transform_7(%arg0: i32) -> (i32, i32, i32) {
    %c0_i32 = arith.constant 0 : i32
    %c0_i32_0 = arith.constant 0 : i32
    %c0_i32_1 = arith.constant 0 : i32
    %c0_i32_2 = arith.constant 0 : i32
    return %c0_i32, %c0_i32_0, %c0_i32_1 : i32, i32, i32
  }
}

</mosaic_0001>

<bundles_post_ra>
// kernel: film_layer_forward.5
= control target key start
LH: loop header
LB: loop body
LE: loop exit
PB: predicated region body
PF: predicated region fallthrough
CT: control target
= control target key end

     0   :  { %s1253_s1 = inlined_call_operand.vmem [shape: bf16[128,128], index: 1, kind: input, shape index: {}]   ;;  %s1254_s0 = inlined_call_operand.vmem [shape: f32[128,128], index: 0, kind: input, shape index: {}]   ;;  %s1255_s2 = inlined_call_operand.vmem [shape: bf16[128,128], index: 2, kind: input, shape index: {}]   ;;  %s1256_s3 = inlined_call_operand.vmem [shape: f32[1,128], index: 3, kind: input, shape index: {}]   ;;  %s1257_s4 = inlined_call_operand.vmem [shape: f32[1,128], index: 4, kind: input, shape index: {}]   ;;  %s1258_s5 = inlined_call_operand.vmem [shape: f32[1,128], index: 5, kind: input, shape index: {}]   ;;  %s1259_s6 = inlined_call_operand.vmem [shape: f32[128,128], index: 6, kind: output, shape index: {}]  }
   0x1   :  { %v901_v0 = vld [vmem:[%s1253_s1 + $0x38] sm:$0xff]   ;;  %v902_v1 = vld [vmem:[%s1253_s1 + $0x30] sm:$0xff]   ;;  %v903_v2 = vld [vmem:[%s1253_s1 + $0x28] sm:$0xff]  }
   0x2   :  { %789 = vmatprep.subr.bf16.mxu0 %v901_v0  ;;  %821 = vmatprep.subr.bf16.mxu1 %v901_v0  ;;  %v904_v3 = vld [vmem:[%s1253_s1 + $0x20] sm:$0xff]   ;;  %v25_v5 = vld [vmem:[%s1254_s0 + $0x8] sm:$0xff]  ;;  %v905_v9 = vld [vmem:[%s1253_s1 + $0x18] sm:$0xff]  }
   0x3   :  { %790 = vmatpush3.bf16.msra.mxu0 %v901_v0  ;;  %822 = vmatpush3.bf16.msra.mxu1 %v901_v0  ;;  %v24_v4 = vld [vmem:[%s1254_s0] sm:$0xff]  ;;  %v26_v13 = vld [vmem:[%s1254_s0 + $0x10] sm:$0xff]  ;;  %v27_v14 = vld [vmem:[%s1254_s0 + $0x18] sm:$0xff] }
   0x4   :  { %791 = vmatprep.subr.bf16.mxu0 %v902_v1  ;;  %823 = vmatprep.subr.bf16.mxu1 %v902_v1  ;;  %v972_v6 = vpack.c.bf16 %v25_v5, %v24_v4  ;;  %v906_v15 = vld [vmem:[%s1253_s1 + $0x10] sm:$0xff]   ;;  %v989_v16 = vpack.c.bf16 %v27_v14, %v26_v13  ;;  %v28_v17 = vld [vmem:[%s1254_s0 + $0x20] sm:$0xff]  ;;  %v29_v18 = vld [vmem:[%s1254_s0 + $0x28] sm:$0xff] }
   0x5   :  { %v907_v19 = vld [vmem:[%s1253_s1 + $0x8] sm:$0xff]   ;;  %v1000_v20 = vpack.c.bf16 %v29_v18, %v28_v17  ;;  %v30_v23 = vld [vmem:[%s1254_s0 + $0x30] sm:$0xff]  ;;  %v31_v24 = vld [vmem:[%s1254_s0 + $0x38] sm:$0xff] }
   0x6   :  { %v48_v7 = vunpack.c.l.bf16 %v972_v6  ;;  %v49_v8 = vunpack.c.h.bf16 %v972_v6  ;;  %837 = vmatprep.mubr.bf16.mxu1 %v972_v6  ;;  %v50_v21 = vunpack.c.l.bf16 %v989_v16  ;;  %v51_v22 = vunpack.c.h.bf16 %v989_v16  ;;  %v908_v25 = vld [vmem:[%s1253_s1] sm:$0xff]   ;;  %v33_v32 = vld [vmem:[%s1254_s0 + $0x48] sm:$0xff]  ;;  %v909_v33 = vld [vmem:[%s1255_s2 + $0x38] sm:$0xff]  }
   0x7   :  { %792 = vmatpush3.bf16.msra.mxu0 %v902_v1  ;;  %824 = vmatpush3.bf16.msra.mxu1 %v902_v1  ;;  %v52_v26 = vunpack.c.l.bf16 %v1000_v20  ;;  %v53_v27 = vunpack.c.h.bf16 %v1000_v20  ;;  %v1015_v30 = vpack.c.bf16 %v31_v24, %v30_v23  ;;  %v32_v31 = vld [vmem:[%s1254_s0 + $0x40] sm:$0xff]  ;;  %v34_v40 = vld [vmem:[%s1254_s0 + $0x50] sm:$0xff]  ;;  %v35_v41 = vld [vmem:[%s1254_s0 + $0x58] sm:$0xff] }
   0x8   :  { %793 = vmatprep.subr.bf16.mxu0 %v903_v2  ;;  %825 = vmatprep.subr.bf16.mxu1 %v903_v2  ;;  %v64_v10 = vsub.f32 %v24_v4, %v48_v7  ;;  %v65_v11 = vsub.f32 %v25_v5, %v49_v8  ;;  %v66_v28 = vsub.f32 %v26_v13, %v50_v21  ;;  %v910_v42 = vld [vmem:[%s1255_s2 + $0x30] sm:$0xff]   ;;  %v36_v49 = vld [vmem:[%s1254_s0 + $0x60] sm:$0xff]  ;;  %v37_v50 = vld [vmem:[%s1254_s0 + $0x68] sm:$0xff] }
   0x9   :  { %v67_v29 = vsub.f32 %v27_v14, %v51_v22  ;;  %v68_v34 = vsub.f32 %v28_v17, %v52_v26  ;;  %v69_v35 = vsub.f32 %v29_v18, %v53_v27  ;;  %v1026_v36 = vpack.c.bf16 %v33_v32, %v32_v31  ;;  %v911_v51 = vld [vmem:[%s1255_s2 + $0x28] sm:$0xff]   ;;  %v38_v58 = vld [vmem:[%s1254_s0 + $0x70] sm:$0xff]  ;;  %v39_v59 = vld [vmem:[%s1254_s0 + $0x78] sm:$0xff] }
   0xa   :  { %v80_v12 = vpack.c.bf16 %v65_v11, %v64_v10  ;;  %v54_v38 = vunpack.c.l.bf16 %v1015_v30  ;;  %v55_v39 = vunpack.c.h.bf16 %v1015_v30  ;;  %v1042_v48 = vpack.c.bf16 %v35_v41, %v34_v40  ;;  %v912_v60 = vld [vmem:[%s1255_s2 + $0x20] sm:$0xff]   ;;  %v914_v10 = vld [vmem:[%s1255_s2 + $0x10] sm:$0xff]   ;;  %v915_v14 = vld [vmem:[%s1255_s2 + $0x8] sm:$0xff]  }
   0xb   :  { %794 = vmatpush3.bf16.msra.mxu0 %v903_v2  ;;  %826 = vmatpush3.bf16.msra.mxu1 %v903_v2  ;;  %v81_v37 = vpack.c.bf16 %v67_v29, %v66_v28  ;;  %v82_v43 = vpack.c.bf16 %v69_v35, %v68_v34  ;;  %v56_v44 = vunpack.c.l.bf16 %v1026_v36  ;;  %v57_v45 = vunpack.c.h.bf16 %v1026_v36  ;;  %v916_v17 = vld [vmem:[%s1255_s2] sm:$0xff]  }
   0xc   :  { %795 = vmatprep.subr.bf16.mxu0 %v904_v3  ;;  %827 = vmatprep.subr.bf16.mxu1 %v904_v3  ;;  %v70_v46 = vsub.f32 %v30_v23, %v54_v38  ;;  %v71_v47 = vsub.f32 %v31_v24, %v55_v39  ;;  %v1054_v54 = vpack.c.bf16 %v37_v50, %v36_v49  ;;  %v58_v56 = vunpack.c.l.bf16 %v1042_v48 }
   0xd   :  { %805 = vmatprep.mubr.bf16.mxu0 %v80_v12  ;;  %v72_v52 = vsub.f32 %v32_v31, %v56_v44  ;;  %v73_v53 = vsub.f32 %v33_v32, %v57_v45  ;;  %v59_v57 = vunpack.c.h.bf16 %v1042_v48  ;;  %v47_v2 = vpack.c.bf16 %v39_v59, %v38_v58 }
   0xe   :  { %v83_v55 = vpack.c.bf16 %v71_v47, %v70_v46  ;;  %v60_v62 = vunpack.c.l.bf16 %v1054_v54  ;;  %v61_v63 = vunpack.c.h.bf16 %v1054_v54  ;;  %v74_v0 = vsub.f32 %v34_v40, %v58_v56 }
   0xf   :  { %796 = vmatpush3.bf16.msra.mxu0 %v904_v3  ;;  %828 = vmatpush3.bf16.msra.mxu1 %v904_v3  ;;  %v84_v61 = vpack.c.bf16 %v73_v53, %v72_v52  ;;  %v75_v1 = vsub.f32 %v35_v41, %v59_v57  ;;  %v913_v3 = vld [vmem:[%s1255_s2 + $0x18] sm:$0xff]   ;;  %v62_v8 = vunpack.c.l.bf16 %v47_v2 }
  0x10   :  { %797 = vmatprep.subr.bf16.mxu0 %v905_v9  ;;  %829 = vmatprep.subr.bf16.mxu1 %v905_v9  ;;  %v76_v4 = vsub.f32 %v36_v49, %v60_v62  ;;  %v77_v5 = vsub.f32 %v37_v50, %v61_v63 }
  0x11   :  { %v85_v7 = vpack.c.bf16 %v75_v1, %v74_v0  ;;  %v78_v12 = vsub.f32 %v38_v58, %v62_v8 }
  0x12   :  { %v86_v11 = vpack.c.bf16 %v77_v5, %v76_v4 }
  0x13   :  { %798 = vmatpush3.bf16.msra.mxu0 %v905_v9  ;;  %830 = vmatpush3.bf16.msra.mxu1 %v905_v9  ;;  %v63_v9 = vunpack.c.h.bf16 %v47_v2 }
  0x14   :  { %799 = vmatprep.subr.bf16.mxu0 %v906_v15  ;;  %831 = vmatprep.subr.bf16.mxu1 %v906_v15 }
  0x15   :  { %v79_v13 = vsub.f32 %v39_v59, %v63_v9 }
  0x17   :  { %800 = vmatpush3.bf16.msra.mxu0 %v906_v15  ;;  %832 = vmatpush3.bf16.msra.mxu1 %v906_v15  ;;  %v87_v15 = vpack.c.bf16 %v79_v13, %v78_v12 }
  0x18   :  { %801 = vmatprep.subr.bf16.mxu0 %v907_v19  ;;  %833 = vmatprep.subr.bf16.mxu1 %v907_v19 }
  0x1b   :  { %802 = vmatpush3.bf16.msra.mxu0 %v907_v19  ;;  %834 = vmatpush3.bf16.msra.mxu1 %v907_v19 }
  0x1c   :  { %803 = vmatprep.subr.bf16.mxu0 %v908_v25  ;;  %835 = vmatprep.subr.bf16.mxu1 %v908_v25 }
  0x1f   :  { %804 = vmatpush3.bf16.msra.mxu0 %v908_v25  ;;  %836 = vmatpush3.bf16.msra.mxu1 %v908_v25 }
  0x20   :  { %853 = vmatprep.subr.bf16.mxu0 %v909_v33  ;;  %885 = vmatprep.subr.bf16.mxu1 %v909_v33 }
  0x22   :  { %806 = vmatmul.mubr.bf16.vlgmr.msra.gmra.mxu0 %v81_v37  ;;  %838 = vmatmul.mubr.bf16.vlgmr.msra.gmra.mxu1 %v989_v16 }
  0x23   :  { %854 = vmatpush3.bf16.msra.mxu0 %v909_v33  ;;  %893 = vmatpush3.bf16.msra.mxu1 %v909_v33 }
  0x24   :  { %855 = vmatprep.subr.bf16.mxu0 %v910_v42  ;;  %886 = vmatprep.subr.bf16.mxu1 %v910_v42 }
  0x25   :  { %809 = vmatprep.mubr.bf16.mxu0 %v82_v43  ;;  %841 = vmatprep.mubr.bf16.mxu1 %v1000_v20 }
  0x27   :  { %856 = vmatpush3.bf16.msra.mxu0 %v910_v42  ;;  %894 = vmatpush3.bf16.msra.mxu1 %v910_v42 }
  0x28   :  { %857 = vmatprep.subr.bf16.mxu0 %v911_v51  ;;  %887 = vmatprep.subr.bf16.mxu1 %v911_v51 }
  0x2a   :  { %810 = vmatmul.mubr.bf16.gmra.mxu0 %v83_v55  ;;  %842 = vmatmul.mubr.bf16.gmra.mxu1 %v1015_v30 }
  0x2b   :  { %858 = vmatpush3.bf16.msra.mxu0 %v911_v51  ;;  %895 = vmatpush3.bf16.msra.mxu1 %v911_v51 }
  0x2c   :  { %859 = vmatprep.subr.bf16.mxu0 %v912_v60  ;;  %888 = vmatprep.subr.bf16.mxu1 %v912_v60 }
  0x2d   :  { %813 = vmatprep.mubr.bf16.mxu0 %v84_v61  ;;  %845 = vmatprep.mubr.bf16.mxu1 %v1026_v36 }
  0x2f   :  { %860 = vmatpush3.bf16.msra.mxu0 %v912_v60  ;;  %896 = vmatpush3.bf16.msra.mxu1 %v912_v60  ;;  %v1119_v60 = vld [vmem:[%s1256_s3] ss:$0 sm:$0xff] }
  0x30   :  { %861 = vmatprep.subr.bf16.mxu0 %v913_v3  ;;  %889 = vmatprep.subr.bf16.mxu1 %v913_v3 }
  0x32   :  { %814 = vmatmul.mubr.bf16.gmra.mxu0 %v85_v7  ;;  %846 = vmatmul.mubr.bf16.gmra.mxu1 %v1042_v48 }
  0x33   :  { %862 = vmatpush3.bf16.msra.mxu0 %v913_v3  ;;  %897 = vmatpush3.bf16.msra.mxu1 %v913_v3 }
  0x34   :  { %863 = vmatprep.subr.bf16.mxu0 %v914_v10  ;;  %890 = vmatprep.subr.bf16.mxu1 %v914_v10 }
  0x35   :  { %817 = vmatprep.mubr.bf16.mxu0 %v86_v11  ;;  %849 = vmatprep.mubr.bf16.mxu1 %v1054_v54 }
  0x37   :  { %864 = vmatpush3.bf16.msra.mxu0 %v914_v10  ;;  %898 = vmatpush3.bf16.msra.mxu1 %v914_v10 }
  0x38   :  { %865 = vmatprep.subr.bf16.mxu0 %v915_v14  ;;  %891 = vmatprep.subr.bf16.mxu1 %v915_v14 }
  0x3a   :  { %818 = vmatmul.mubr.bf16.gmra.mxu0 %v87_v15  ;;  %850 = vmatmul.mubr.bf16.gmra.mxu1 %v47_v2 }
  0x3b   :  { %866 = vmatpush3.bf16.msra.mxu0 %v915_v14  ;;  %899 = vmatpush3.bf16.msra.mxu1 %v915_v14 }
  0x3c   :  { %867 = vmatprep.subr.bf16.mxu0 %v916_v17  ;;  %892 = vmatprep.subr.bf16.mxu1 %v916_v17 }
  0x3d   :  { %869 = vmatprep.mubr.bf16.mxu0 %v972_v6  ;;  %877 = vmatprep.mubr.bf16.mxu1 %v1026_v36 }
  0x3f   :  { %868 = vmatpush3.bf16.msra.mxu0 %v916_v17  ;;  %900 = vmatpush3.bf16.msra.mxu1 %v916_v17 }
  0x42   :  { %870 = vmatmul.mubr.bf16.vlgmr.msra.gmra.mxu0 %v989_v16  ;;  %878 = vmatmul.mubr.bf16.vlgmr.msra.gmra.mxu1 %v1042_v48 }
  0x43   :  { %873 = vmatprep.mubr.bf16.mxu0 %v1000_v20  ;;  %881 = vmatprep.mubr.bf16.mxu1 %v1054_v54 }
  0x4a   :  { %874 = vmatmul.mubr.bf16.gmra.mxu0 %v1015_v30  ;;  %882 = vmatmul.mubr.bf16.gmra.mxu1 %v47_v2 }
  0xe2   :  { %v807_v18 = vpop.f32.mrf.mxu0  ;;  %v839_v19 = vpop.f32.mrf.mxu1 }
  0xe3   :  { %v308_v53 = vadd.f32 %v839_v19, %v807_v18 }
  0xe4   :  { %v202_v21 = vpop.f32.mrf.mxu0  ;;  %v299_v22 = vpop.f32.mrf.mxu1 }
  0xe5   :  { %v300_v50 = vadd.f32 %v299_v22, %v202_v21 }
  0xe6   :  { %v808_v6 = vpop.f32.mrf.mxu0  ;;  %v840_v23 = vpop.f32.mrf.mxu1 }
  0xe7   :  { %v311_v57 = vadd.f32 %v840_v23, %v808_v6 }
  0xe8   :  { %v205_v24 = vpop.f32.mrf.mxu0  ;;  %v302_v25 = vpop.f32.mrf.mxu1 }
  0xe9   :  { %v303_v58 = vadd.f32 %v302_v25, %v205_v24 }
  0xea   :  { %v811_v26 = vpop.f32.mrf.mxu0  ;;  %v843_v27 = vpop.f32.mrf.mxu1 }
  0xeb   :  { %v324_v8 = vadd.f32 %v843_v27, %v811_v26 }
  0xec   :  { %v218_v16 = vpop.f32.mrf.mxu0  ;;  %v315_v28 = vpop.f32.mrf.mxu1 }
  0xed   :  { %v316_v5 = vadd.f32 %v315_v28, %v218_v16 }
  0xee   :  { %v812_v29 = vpop.f32.mrf.mxu0  ;;  %v844_v31 = vpop.f32.mrf.mxu1 }
  0xef   :  { %v327_v12 = vadd.f32 %v844_v31, %v812_v29 }
  0xf0   :  { %v221_v20 = vpop.f32.mrf.mxu0  ;;  %v318_v32 = vpop.f32.mrf.mxu1 }
  0xf1   :  { %v319_v17 = vadd.f32 %v318_v32, %v221_v20 }
  0xf2   :  { %v1092_v33 = vpop.f32.mrf.mxu0  ;;  %v1094_v30 = vpop.f32.mrf.mxu1 }
  0xf4   :  { %v234_v34 = vpop.f32.mrf.mxu0  ;;  %v331_v35 = vpop.f32.mrf.mxu1 }
  0xf5   :  { %v332_v22 = vadd.f32 %v331_v35, %v234_v34  ;;  %v340_v35 = vadd.f32 %v1094_v30, %v1092_v33 }
  0xf6   :  { %v1096_v36 = vpop.f32.mrf.mxu0  ;;  %v1098_v37 = vpop.f32.mrf.mxu1 }
  0xf8   :  { %v237_v38 = vpop.f32.mrf.mxu0  ;;  %v334_v39 = vpop.f32.mrf.mxu1 }
  0xf9   :  { %v335_v16 = vadd.f32 %v334_v39, %v237_v38 }
  0xfa   :  { %v1100_v40 = vpop.f32.mrf.mxu0  ;;  %v1102_v41 = vpop.f32.mrf.mxu1 }
  0xfc   :  { %v1104_v42 = vpop.f32.mrf.mxu0  ;;  %v1106_v43 = vpop.f32.mrf.mxu1 }
  0xfd   :  { %v348_v30 = vadd.f32 %v1106_v43, %v1104_v42  ;;  %v356_v42 = vadd.f32 %v1102_v41, %v1100_v40 }
  0xfe   :  { %v1108_v44 = vpop.f32.mrf.mxu0  ;;  %v1110_v45 = vpop.f32.mrf.mxu1 }
 0x100   :  { %v1112_v46 = vpop.f32.mrf.mxu0  ;;  %v1114_v47 = vpop.f32.mrf.mxu1 }
 0x102   :  { %v871_v48 = vpop.f32.mrf.mxu0  ;;  %v879_v49 = vpop.f32.mrf.mxu1 }
 0x103   :  { %v509_v59 = vadd.f32 %v871_v48, %v308_v53  ;;  %v517_v53 = vadd.f32 %v879_v49, %v340_v35 }
 0x104   :  { %v444_v51 = vpop.f32.mrf.mxu0  ;;  %v476_v52 = vpop.f32.mrf.mxu1 }
 0x105   :  { %v507_v54 = vadd.f32 %v444_v51, %v300_v50  ;;  %v1125_v3 = vadd.f32 %v1119_v60, %v509_v59  ;;  %v515_v28 = vadd.f32 %v476_v52, %v332_v22  ;;  %v343_v51 = vadd.f32 %v1098_v37, %v1096_v36 }
 0x106   :  { %v872_v55 = vpop.f32.mrf.mxu0  ;;  %v880_v56 = vpop.f32.mrf.mxu1  ;;  %v351_v36 = vadd.f32 %v1114_v47, %v1112_v46  ;;  %v540_v49 = vadd.f32 %v1119_v60, %v517_v53 }
 0x107   :  { %v1122_v62 = vadd.f32 %v1119_v60, %v507_v54  ;;  %v510_v63 = vadd.f32 %v872_v55, %v311_v57  ;;  %v548_v18 = vmax.f32 %v1125_v3, 0.0  ;;  %v1166_v54 = vadd.f32 %v1119_v60, %v515_v28 }
 0x108   :  { %v447_v61 = vpop.f32.mrf.mxu0  ;;  %v479_v1 = vpop.f32.mrf.mxu1  ;;  %v518_v57 = vadd.f32 %v880_v56, %v343_v51  ;;  %v556_v46 = vmax.f32 %v540_v49, 0.0 }
 0x109   :  { %v508_v0 = vadd.f32 %v447_v61, %v303_v58  ;;  %v546_v9 = vmax.f32 %v1122_v62, 0.0  ;;  %v1132_v10 = vadd.f32 %v1119_v60, %v510_v63  ;;  %v516_v48 = vadd.f32 %v479_v1, %v335_v16 }
 0x10a   :  { %v875_v2 = vpop.f32.mrf.mxu0  ;;  %v883_v13 = vpop.f32.mrf.mxu1  ;;  %v554_v63 = vmax.f32 %v1166_v54, 0.0  ;;  %v541_v43 = vadd.f32 %v1119_v60, %v518_v57 }
 0x10b   :  { %v1128_v4 = vadd.f32 %v1119_v60, %v508_v0  ;;  %v513_v21 = vadd.f32 %v875_v2, %v324_v8  ;;  %v549_v24 = vmax.f32 %v1132_v10, 0.0  ;;  %v1172_v58 = vadd.f32 %v1119_v60, %v516_v48 }
 0x10c   :  { %v460_v7 = vpop.f32.mrf.mxu0  ;;  %v492_v29 = vpop.f32.mrf.mxu1  ;;  %v521_v47 = vadd.f32 %v883_v13, %v356_v42 }
 0x10d   :  { %v547_v11 = vmax.f32 %v1128_v4, 0.0  ;;  %v511_v14 = vadd.f32 %v460_v7, %v316_v5  ;;  %v1147_v31 = vadd.f32 %v1119_v60, %v513_v21  ;;  %v519_v0 = vadd.f32 %v492_v29, %v348_v30 }
 0x10e   :  { %v876_v15 = vpop.f32.mrf.mxu0  ;;  %v884_v52 = vpop.f32.mrf.mxu1  ;;  %v555_v56 = vmax.f32 %v1172_v58, 0.0  ;;  %v359_v7 = vadd.f32 %v1110_v45, %v1108_v44  ;;  %v544_v40 = vadd.f32 %v1119_v60, %v521_v47 }
 0x10f   :  { %v562_v19 = vadd.f32 %v547_v11, %v546_v9  ;;  %v1141_v6 = vadd.f32 %v1119_v60, %v511_v14  ;;  %v514_v26 = vadd.f32 %v876_v15, %v327_v12  ;;  %v552_v55 = vmax.f32 %v1147_v31, 0.0 }
 0x110   :  { %v463_v23 = vpop.f32.mrf.mxu0  ;;  %v495_v37 = vpop.f32.mrf.mxu1  ;;  %v542_v8 = vadd.f32 %v1119_v60, %v519_v0  ;;  %v557_v14 = vmax.f32 %v541_v43, 0.0  ;;  %v522_v15 = vadd.f32 %v884_v52, %v359_v7 }
 0x111   :  { %v563_v25 = vadd.f32 %v562_v19, %v548_v18  ;;  %v512_v27 = vadd.f32 %v463_v23, %v319_v17  ;;  %v550_v20 = vmax.f32 %v1141_v6, 0.0  ;;  %v1160_v39 = vadd.f32 %v1119_v60, %v514_v26 }
 0x112   :  { %v520_v5 = vadd.f32 %v495_v37, %v351_v36  ;;  %v558_v41 = vmax.f32 %v542_v8, 0.0  ;;  %v545_v22 = vadd.f32 %v1119_v60, %v522_v15  ;;  %v560_v26 = vmax.f32 %v544_v40, 0.0 }
 0x113   :  { %v564_v32 = vadd.f32 %v563_v25, %v549_v24  ;;  %v1153_v34 = vadd.f32 %v1119_v60, %v512_v27  ;;  %v553_v59 = vmax.f32 %v1160_v39, 0.0 }
 0x114   :  { %v543_v17 = vadd.f32 %v1119_v60, %v520_v5  ;;  %v561_v45 = vmax.f32 %v545_v22, 0.0 }
 0x115   :  { %v565_v38 = vadd.f32 %v564_v32, %v550_v20  ;;  %v551_v50 = vmax.f32 %v1153_v34, 0.0 }
 0x116   :  { %v559_v23 = vmax.f32 %v543_v17, 0.0 }
 0x117   :  { %v566_v33 = vadd.f32 %v565_v38, %v551_v50 }
 0x119   :  { %v567_v61 = vadd.f32 %v566_v33, %v552_v55 }
 0x11b   :  { %v568_v1 = vadd.f32 %v567_v61, %v553_v59 }
 0x11d   :  { %v569_v2 = vadd.f32 %v568_v1, %v554_v63 }
 0x11f   :  { %v570_v12 = vadd.f32 %v569_v2, %v555_v56 }
 0x121   :  { %v571_v19 = vadd.f32 %v570_v12, %v556_v46 }
 0x123   :  { %v572_v21 = vadd.f32 %v571_v19, %v557_v14 }
 0x125   :  { %v573_v25 = vadd.f32 %v572_v21, %v558_v41 }
 0x127   :  { %v574_v44 = vadd.f32 %v573_v25, %v559_v23 }
 0x129   :  { %v575_v13 = vadd.f32 %v574_v44, %v560_v26 }
 0x12b   :  { %v576_v27 = vadd.f32 %v575_v13, %v561_v45 }
 0x12d   :  { %v577_v16 = vrot.slane %v576_v27, 4 }
 0x12f   :  { %v578_v28 = vadd.f32 %v577_v16, %v576_v27 }
 0x131   :  { %v579_v29 = vrot.slane %v578_v28, 2 }
 0x133   :  { %v580_v31 = vadd.f32 %v579_v29, %v578_v28 }
 0x135   :  { %v581_v32 = vrot.slane %v580_v31, 1 }
 0x137   :  { %v582_v34 = vadd.f32 %v581_v32, %v580_v31 }
 0x139   :  { %v583_v35 = vmul.f32 0.0078125, %v582_v34 }
 0x13b   :  { %v584_v48 = vsub.f32 %v546_v9, %v583_v35  ;;  %v585_v60 = vsub.f32 %v547_v11, %v583_v35  ;;  %v586_v38 = vsub.f32 %v548_v18, %v583_v35  ;;  %v587_v52 = vsub.f32 %v549_v24, %v583_v35 }
 0x13c   :  { %v588_v53 = vsub.f32 %v550_v20, %v583_v35  ;;  %v589_v30 = vsub.f32 %v551_v50, %v583_v35  ;;  %v590_v9 = vsub.f32 %v552_v55, %v583_v35  ;;  %v591_v11 = vsub.f32 %v553_v59, %v583_v35 }
 0x13d   :  { %v600_v39 = vmul.f32 %v584_v48, %v584_v48  ;;  %v601_v51 = vmul.f32 %v585_v60, %v585_v60  ;;  %v602_v54 = vmul.f32 %v586_v38, %v586_v38  ;;  %v603_v57 = vmul.f32 %v587_v52, %v587_v52 }
 0x13e   :  { %v604_v58 = vmul.f32 %v588_v53, %v588_v53  ;;  %v605_v61 = vmul.f32 %v589_v30, %v589_v30  ;;  %v592_v18 = vsub.f32 %v554_v63, %v583_v35  ;;  %v606_v36 = vmul.f32 %v590_v9, %v590_v9 }
 0x13f   :  { %v616_v33 = vadd.f32 %v601_v51, %v600_v39  ;;  %v593_v49 = vsub.f32 %v555_v56, %v583_v35  ;;  %v607_v10 = vmul.f32 %v591_v11, %v591_v11  ;;  %v594_v0 = vsub.f32 %v556_v46, %v583_v35  ;;  %v739_v39 = vld [vmem:[%s1257_s4] ss:$0 sm:$0xff] }
 0x140   :  { %v608_v6 = vmul.f32 %v592_v18, %v592_v18  ;;  %v595_v1 = vsub.f32 %v557_v14, %v583_v35  ;;  %v596_v43 = vsub.f32 %v558_v41, %v583_v35  ;;  %v597_v5 = vsub.f32 %v559_v23, %v583_v35 }
 0x141   :  { %v617_v62 = vadd.f32 %v616_v33, %v602_v54  ;;  %v609_v42 = vmul.f32 %v593_v49, %v593_v49  ;;  %v610_v2 = vmul.f32 %v594_v0, %v594_v0  ;;  %v598_v47 = vsub.f32 %v560_v26, %v583_v35 }
 0x142   :  { %v611_v7 = vmul.f32 %v595_v1, %v595_v1  ;;  %v612_v8 = vmul.f32 %v596_v43, %v596_v43  ;;  %v599_v12 = vsub.f32 %v561_v45, %v583_v35  ;;  %v613_v15 = vmul.f32 %v597_v5, %v597_v5 }
 0x143   :  { %v618_v4 = vadd.f32 %v617_v62, %v603_v57  ;;  %v614_v17 = vmul.f32 %v598_v47, %v598_v47 }
 0x144   :  { %v615_v46 = vmul.f32 %v599_v12, %v599_v12 }
 0x145   :  { %v619_v3 = vadd.f32 %v618_v4, %v604_v58 }
 0x147   :  { %v620_v37 = vadd.f32 %v619_v3, %v605_v61  ;;  %v740_v3 = vld [vmem:[%s1258_s5] ss:$0 sm:$0xff] }
 0x149   :  { %v621_v24 = vadd.f32 %v620_v37, %v606_v36 }
 0x14b   :  { %v622_v20 = vadd.f32 %v621_v24, %v607_v10 }
 0x14d   :  { %v623_v50 = vadd.f32 %v622_v20, %v608_v6 }
 0x14f   :  { %v624_v55 = vadd.f32 %v623_v50, %v609_v42 }
 0x151   :  { %v625_v59 = vadd.f32 %v624_v55, %v610_v2 }
 0x153   :  { %v626_v63 = vadd.f32 %v625_v59, %v611_v7 }
 0x155   :  { %v627_v56 = vadd.f32 %v626_v63, %v612_v8 }
 0x157   :  { %v628_v19 = vadd.f32 %v627_v56, %v613_v15 }
 0x159   :  { %v629_v40 = vadd.f32 %v628_v19, %v614_v17 }
 0x15b   :  { %v630_v21 = vadd.f32 %v629_v40, %v615_v46 }
 0x15d   :  { %v631_v14 = vrot.slane %v630_v21, 4 }
 0x15f   :  { %v632_v22 = vadd.f32 %v631_v14, %v630_v21 }
 0x161   :  { %v633_v25 = vrot.slane %v632_v22, 2 }
 0x163   :  { %v634_v41 = vadd.f32 %v633_v25, %v632_v22 }
 0x165   :  { %v635_v44 = vrot.slane %v634_v41, 1 }
 0x167   :  { %v636_v13 = vadd.f32 %v635_v44, %v634_v41 }
 0x169   :  { %v637_v23 = vmul.f32 0.0078125, %v636_v13 }
 0x16b   :  { %v638_v27 = vadd.f32 1e-05, %v637_v23 }
 0x16d   :  { %917 = vrsqrt.f32 %v638_v27 }
 0x17a   :  { %v918_v26 = vpop.eup %917 }
 0x17b   :  { %v640_v16 = vmul.f32 %v918_v26, %v584_v48  ;;  %v641_v28 = vmul.f32 %v918_v26, %v585_v60  ;;  %v642_v45 = vmul.f32 %v918_v26, %v586_v38  ;;  %v643_v29 = vmul.f32 %v918_v26, %v587_v52 }
 0x17c   :  { %v644_v31 = vmul.f32 %v918_v26, %v588_v53  ;;  %v645_v32 = vmul.f32 %v918_v26, %v589_v30  ;;  %v646_v34 = vmul.f32 %v918_v26, %v590_v9  ;;  %v647_v35 = vmul.f32 %v918_v26, %v591_v11 }
 0x17d   :  { %v648_v51 = vmul.f32 %v918_v26, %v592_v18  ;;  %v649_v54 = vmul.f32 %v918_v26, %v593_v49  ;;  %v650_v33 = vmul.f32 %v918_v26, %v594_v0  ;;  %v651_v57 = vmul.f32 %v918_v26, %v595_v1 }
 0x17e   :  { %v652_v62 = vmul.f32 %v918_v26, %v596_v43  ;;  %v653_v58 = vmul.f32 %v918_v26, %v597_v5  ;;  %v654_v4 = vmul.f32 %v918_v26, %v598_v47  ;;  %v655_v61 = vmul.f32 %v918_v26, %v599_v12 }
 0x17f   :  { %v663_v48 = vmul.f32 %v739_v39, %v640_v16  ;;  %v664_v60 = vmul.f32 %v739_v39, %v641_v28  ;;  %v665_v38 = vmul.f32 %v739_v39, %v642_v45  ;;  %v666_v52 = vmul.f32 %v739_v39, %v643_v29 }
 0x180   :  { %v667_v53 = vmul.f32 %v739_v39, %v644_v31  ;;  %v668_v30 = vmul.f32 %v739_v39, %v645_v32  ;;  %v669_v9 = vmul.f32 %v739_v39, %v646_v34  ;;  %v670_v11 = vmul.f32 %v739_v39, %v647_v35 }
 0x181   :  { %v671_v18 = vmul.f32 %v739_v39, %v648_v51  ;;  %v672_v36 = vmul.f32 %v739_v39, %v649_v54  ;;  %v673_v37 = vmul.f32 %v739_v39, %v650_v33  ;;  %v674_v49 = vmul.f32 %v739_v39, %v651_v57 }
 0x182   :  { %v675_v10 = vmul.f32 %v739_v39, %v652_v62  ;;  %v676_v24 = vmul.f32 %v739_v39, %v653_v58  ;;  %v677_v0 = vmul.f32 %v739_v39, %v654_v4  ;;  %v678_v6 = vmul.f32 %v739_v39, %v655_v61 }
 0x183   :  { %v686_v20 = vadd.f32 %v740_v3, %v663_v48  ;;  %v687_v1 = vadd.f32 %v740_v3, %v664_v60  ;;  %v688_v42 = vadd.f32 %v740_v3, %v665_v38  ;;  %v689_v50 = vadd.f32 %v740_v3, %v666_v52 }
 0x184   :  { %v690_v43 = vadd.f32 %v740_v3, %v667_v53  ;;  %v691_v2 = vadd.f32 %v740_v3, %v668_v30  ;;  %v692_v55 = vadd.f32 %v740_v3, %v669_v9  ;;  %v693_v5 = vadd.f32 %v740_v3, %v670_v11 }
 0x185   :  { %v694_v7 = vadd.f32 %v740_v3, %v671_v18  ;;  %v695_v59 = vadd.f32 %v740_v3, %v672_v36  ;;  %v696_v47 = vadd.f32 %v740_v3, %v673_v37  ;;  %v697_v8 = vadd.f32 %v740_v3, %v674_v49  ;;  %702 = vst [vmem:[%s1259_s6] sm:$0xff] %v686_v20 }
 0x186   :  { %703 = vst [vmem:[%s1259_s6 + $0x8] sm:$0xff] %v687_v1  ;;  %704 = vst [vmem:[%s1259_s6 + $0x10] sm:$0xff] %v688_v42  ;;  %v698_v63 = vadd.f32 %v740_v3, %v675_v10  ;;  %v699_v12 = vadd.f32 %v740_v3, %v676_v24  ;;  %v700_v15 = vadd.f32 %v740_v3, %v677_v0 }
 0x187   :  { %705 = vst [vmem:[%s1259_s6 + $0x18] sm:$0xff] %v689_v50  ;;  %v701_v56 = vadd.f32 %v740_v3, %v678_v6  ;;  %706 = vst [vmem:[%s1259_s6 + $0x20] sm:$0xff] %v690_v43 }
 0x188   :  { %707 = vst [vmem:[%s1259_s6 + $0x28] sm:$0xff] %v691_v2  ;;  %708 = vst [vmem:[%s1259_s6 + $0x30] sm:$0xff] %v692_v55 }
 0x189   :  { %709 = vst [vmem:[%s1259_s6 + $0x38] sm:$0xff] %v693_v5  ;;  %710 = vst [vmem:[%s1259_s6 + $0x40] sm:$0xff] %v694_v7 }
 0x18a   :  { %711 = vst [vmem:[%s1259_s6 + $0x48] sm:$0xff] %v695_v59  ;;  %712 = vst [vmem:[%s1259_s6 + $0x50] sm:$0xff] %v696_v47 }
 0x18b   :  { %713 = vst [vmem:[%s1259_s6 + $0x58] sm:$0xff] %v697_v8  ;;  %714 = vst [vmem:[%s1259_s6 + $0x60] sm:$0xff] %v698_v63 }
 0x18c   :  { %715 = vst [vmem:[%s1259_s6 + $0x68] sm:$0xff] %v699_v12  ;;  %716 = vst [vmem:[%s1259_s6 + $0x70] sm:$0xff] %v700_v15 }
 0x18d   :  { %717 = vst [vmem:[%s1259_s6 + $0x78] sm:$0xff] %v701_v56 }

// kernel: film_layer_forward.6
= control target key start
LH: loop header
LB: loop body
LE: loop exit
PB: predicated region body
PF: predicated region fallthrough
CT: control target
= control target key end

     0   :  { %s3958_s1 = inlined_call_operand.vmem [shape: bf16[1152,128], index: 1, kind: input, shape index: {}]   ;;  %s3959_s0 = inlined_call_operand.vmem [shape: f32[32,1152], index: 0, kind: input, shape index: {}]   ;;  %s3960_s2 = inlined_call_operand.vmem [shape: bf16[1152,128], index: 2, kind: input, shape index: {}]   ;;  %s3961_s3 = inlined_call_operand.vmem [shape: f32[1,128], index: 3, kind: input, shape index: {}]   ;;  %s3962_s4 = inlined_call_operand.vmem [shape: f32[1,128], index: 4, kind: input, shape index: {}]   ;;  %s3963_s5 = inlined_call_operand.vmem [shape: f32[1,128], index: 5, kind: input, shape index: {}]   ;;  %s3964_s6 = inlined_call_operand.vmem [shape: f32[32,128], index: 6, kind: output, shape index: {}]  }
   0x1   :  { %v2903_v0 = vld [vmem:[%s3958_s1 + $0x78] sm:$0xff]   ;;  %v2921_v4 = vld [vmem:[%s3958_s1 + $0x70] sm:$0xff]   ;;  %v2939_v8 = vld [vmem:[%s3958_s1 + $0x68] sm:$0xff]  }
   0x2   :  { %v2712_v1 = vld [vmem:[%s3958_s1 + $0xf8] sm:$0xff]   ;;  %2285 = vmatprep.subr.bf16.mxu0 %v2903_v0  ;;  %v2716_v5 = vld [vmem:[%s3958_s1 + $0xf0] sm:$0xff]   ;;  %v2720_v9 = vld [vmem:[%s3958_s1 + $0xe8] sm:$0xff]  }
   0x3   :  { %v2912_v2 = vld [vmem:[%s3958_s1 + $0x38] sm:$0xff]   ;;  %2313 = vmatprep.subr.bf16.mxu1 %v2712_v1  ;;  %v2930_v6 = vld [vmem:[%s3958_s1 + $0x30] sm:$0xff]   ;;  %v2948_v10 = vld [vmem:[%s3958_s1 + $0x28] sm:$0xff]  }
   0x4   :  { %v2714_v3 = vld [vmem:[%s3958_s1 + $0xb8] sm:$0xff]   ;;  %2286 = vmatpush3.bf16.msra.mxu0 %v2912_v2  ;;  %v2718_v7 = vld [vmem:[%s3958_s1 + $0xb0] sm:$0xff]   ;;  %v2722_v11 = vld [vmem:[%s3958_s1 + $0xa8] sm:$0xff]  }
   0x5   :  { %2314 = vmatpush3.bf16.msra.mxu1 %v2714_v3  ;;  %2287 = vmatprep.subr.bf16.mxu0 %v2921_v4  ;;  %v2957_v12 = vld [vmem:[%s3958_s1 + $0x60] sm:$0xff]   ;;  %v2975_v16 = vld [vmem:[%s3958_s1 + $0x58] sm:$0xff]   ;;  %v2998_v20 = vld [vmem:[%s3958_s1 + $0x50] sm:$0xff]  }
   0x6   :  { %2315 = vmatprep.subr.bf16.mxu1 %v2716_v5  ;;  %v2724_v13 = vld [vmem:[%s3958_s1 + $0xe0] sm:$0xff]   ;;  %v2980_v17 = vld [vmem:[%s3958_s1 + $0xd8] sm:$0xff]   ;;  %v3004_v21 = vld [vmem:[%s3958_s1 + $0xd0] sm:$0xff]  }
   0x7   :  { %v2966_v14 = vld [vmem:[%s3958_s1 + $0x20] sm:$0xff]   ;;  %v2986_v18 = vld [vmem:[%s3958_s1 + $0x18] sm:$0xff]   ;;  %v3010_v22 = vld [vmem:[%s3958_s1 + $0x10] sm:$0xff]  }
   0x8   :  { %2288 = vmatpush3.bf16.msra.mxu0 %v2930_v6  ;;  %v2726_v15 = vld [vmem:[%s3958_s1 + $0xa0] sm:$0xff]   ;;  %v2992_v19 = vld [vmem:[%s3958_s1 + $0x98] sm:$0xff]   ;;  %v3016_v23 = vld [vmem:[%s3958_s1 + $0x90] sm:$0xff]  }
   0x9   :  { %2316 = vmatpush3.bf16.msra.mxu1 %v2718_v7  ;;  %2289 = vmatprep.subr.bf16.mxu0 %v2939_v8  ;;  %v3022_v24 = vld [vmem:[%s3958_s1 + $0x48] sm:$0xff]   ;;  %v3046_v28 = vld [vmem:[%s3958_s1 + $0x40] sm:$0xff]   ;;  %v34_v33 = vld [vmem:[%s3959_s0 + $0x50] sm:$0xff] }
   0xa   :  { %2317 = vmatprep.subr.bf16.mxu1 %v2720_v9  ;;  %v3028_v25 = vld [vmem:[%s3958_s1 + $0xc8] sm:$0xff]   ;;  %v3052_v29 = vld [vmem:[%s3958_s1 + $0xc0] sm:$0xff]   ;;  %v27_v34 = vld [vmem:[%s3959_s0 + $0x18] sm:$0xff] }
   0xb   :  { %4002 = vst [vmem:[#allocation2_spill] sm:$0xff] %v3028_v25  ;;  %v3034_v26 = vld [vmem:[%s3958_s1 + $0x8] sm:$0xff]   ;;  %4004 = vst [vmem:[#allocation4_spill] sm:$0xff] %v3052_v29  ;;  %v3058_v30 = vld [vmem:[%s3958_s1] sm:$0xff]  }
   0xc   :  { %2290 = vmatpush3.bf16.msra.mxu0 %v2948_v10  ;;  %v3040_v27 = vld [vmem:[%s3958_s1 + $0x88] sm:$0xff]   ;;  %v3064_v31 = vld [vmem:[%s3958_s1 + $0x80] sm:$0xff]   ;;  %v26_v41 = vld [vmem:[%s3959_s0 + $0x10] sm:$0xff] }
   0xd   :  { %2318 = vmatpush3.bf16.msra.mxu1 %v2722_v11  ;;  %2291 = vmatprep.subr.bf16.mxu0 %v2957_v12  ;;  %4003 = vst [vmem:[#allocation3_spill] sm:$0xff] %v3040_v27  ;;  %4005 = vst [vmem:[#allocation5_spill] sm:$0xff] %v3064_v31  ;;  %v25_v32 = vld [vmem:[%s3959_s0 + $0x8] sm:$0xff]  ;;  %v36_v36 = vld [vmem:[%s3959_s0 + $0x60] sm:$0xff] }
   0xe   :  { %2319 = vmatprep.subr.bf16.mxu1 %v2724_v13  ;;  %v3077_v35 = vpack.c.bf16 %v34_v33, %v25_v32  ;;  %v24_v37 = vld [vmem:[%s3959_s0] sm:$0xff]  ;;  %v33_v38 = vld [vmem:[%s3959_s0 + $0x48] sm:$0xff]  ;;  %v3088_v39 = vpack.c.bf16 %v36_v36, %v27_v34  ;;  %v35_v42 = vld [vmem:[%s3959_s0 + $0x58] sm:$0xff] }
   0xf   :  { %v3090_v40 = vpack.c.bf16 %v33_v38, %v24_v37  ;;  %v3100_v45 = vpack.c.bf16 %v35_v42, %v26_v41  ;;  %v3105_v46 = vld [vmem:[%s3958_s1 + $0x178] sm:$0xff]   ;;  %v3133_v3 = vld [vmem:[%s3958_s1 + $0x170] sm:$0xff]  }
  0x10   :  { %2292 = vmatpush3.bf16.msra.mxu0 %v2966_v14  ;;  %v79_v43 = vunpack.c.l.bf16 %v3077_v35  ;;  %v88_v44 = vunpack.c.h.bf16 %v3077_v35  ;;  %v81_v47 = vunpack.c.l.bf16 %v3088_v39  ;;  %v90_v48 = vunpack.c.h.bf16 %v3088_v39  ;;  %v3114_v51 = vld [vmem:[%s3958_s1 + $0x1f8] sm:$0xff]   ;;  %v3138_v9 = vld [vmem:[%s3958_s1 + $0x1f0] sm:$0xff]  }
  0x11   :  { %2320 = vmatpush3.bf16.msra.mxu1 %v2726_v15  ;;  %2293 = vmatprep.subr.bf16.mxu0 %v2975_v16  ;;  %4006 = vst [vmem:[#allocation6_spill] sm:$0xff] %v3100_v45  ;;  %v78_v49 = vunpack.c.l.bf16 %v3090_v40  ;;  %v87_v50 = vunpack.c.h.bf16 %v3090_v40  ;;  %4007 = vst [vmem:[#allocation7_spill] sm:$0xff] %v3114_v51  ;;  %v80_v54 = vunpack.c.l.bf16 %v3100_v45  ;;  %v89_v55 = vunpack.c.h.bf16 %v3100_v45  ;;  %v3122_v56 = vld [vmem:[%s3958_s1 + $0x138] sm:$0xff]   ;;  %v3143_v13 = vld [vmem:[%s3958_s1 + $0x130] sm:$0xff]  }
  0x12   :  { %2321 = vmatprep.subr.bf16.mxu1 %v2980_v17  ;;  %v115_v52 = vsub.f32 %v25_v32, %v79_v43  ;;  %v124_v53 = vsub.f32 %v34_v33, %v88_v44  ;;  %v117_v57 = vsub.f32 %v27_v34, %v81_v47  ;;  %v126_v58 = vsub.f32 %v36_v36, %v90_v48  ;;  %v3128_v61 = vld [vmem:[%s3958_s1 + $0x1b8] sm:$0xff]   ;;  %v3148_v15 = vld [vmem:[%s3958_s1 + $0x1b0] sm:$0xff]   ;;  %v3154_v32 = vld [vmem:[%s3958_s1 + $0x168] sm:$0xff]  }
  0x13   :  { %v114_v59 = vsub.f32 %v24_v37, %v78_v49  ;;  %v123_v60 = vsub.f32 %v33_v38, %v87_v50  ;;  %4008 = vst [vmem:[#allocation8_spill] sm:$0xff] %v3128_v61  ;;  %v116_v63 = vsub.f32 %v26_v41, %v80_v54  ;;  %v125_v1 = vsub.f32 %v35_v42, %v89_v55  ;;  %v3161_v33 = vld [vmem:[%s3958_s1 + $0x1e8] sm:$0xff]   ;;  %v3178_v37 = vld [vmem:[%s3958_s1 + $0x160] sm:$0xff]   ;;  %v3202_v43 = vld [vmem:[%s3958_s1 + $0x158] sm:$0xff]  }
  0x14   :  { %2294 = vmatpush3.bf16.msra.mxu0 %v2986_v18  ;;  %v151_v62 = vpack.c.bf16 %v124_v53, %v115_v52  ;;  %v153_v5 = vpack.c.bf16 %v126_v58, %v117_v57  ;;  %4009 = vst [vmem:[#allocation9_spill] sm:$0xff] %v3138_v9  ;;  %4010 = vst [vmem:[#allocation10_spill] sm:$0xff] %v3148_v15  ;;  %v3167_v34 = vld [vmem:[%s3958_s1 + $0x128] sm:$0xff]   ;;  %v3185_v38 = vld [vmem:[%s3958_s1 + $0x1e0] sm:$0xff]  }
  0x15   :  { %2322 = vmatpush3.bf16.msra.mxu1 %v2992_v19  ;;  %2295 = vmatprep.subr.bf16.mxu0 %v2998_v20  ;;  %v150_v7 = vpack.c.bf16 %v123_v60, %v114_v59  ;;  %v152_v11 = vpack.c.bf16 %v125_v1, %v116_v63  ;;  %4011 = vst [vmem:[#allocation11_spill] sm:$0xff] %v3161_v33  ;;  %v3172_v36 = vld [vmem:[%s3958_s1 + $0x1a8] sm:$0xff]   ;;  %4013 = vst [vmem:[#allocation13_spill] sm:$0xff] %v3185_v38  ;;  %v3191_v41 = vld [vmem:[%s3958_s1 + $0x120] sm:$0xff]  }
  0x16   :  { %2323 = vmatprep.subr.bf16.mxu1 %v3004_v21  ;;  %920 = vmatprep.mubr.bf16.mxu0 %v151_v62  ;;  %4012 = vst [vmem:[#allocation12_spill] sm:$0xff] %v3172_v36  ;;  %v3196_v42 = vld [vmem:[%s3958_s1 + $0x1a0] sm:$0xff]   ;;  %v3209_v44 = vld [vmem:[%s3958_s1 + $0x1d8] sm:$0xff]   ;;  %v45_v52 = vld [vmem:[%s3959_s0 + $0xa8] sm:$0xff] }
  0x17   :  { %969 = vmatprep.mubr.bf16.mxu1 %v153_v5  ;;  %4014 = vst [vmem:[#allocation14_spill] sm:$0xff] %v3196_v42  ;;  %4015 = vst [vmem:[#allocation15_spill] sm:$0xff] %v3209_v44  ;;  %v3215_v47 = vld [vmem:[%s3958_s1 + $0x118] sm:$0xff]   ;;  %v52_v50 = vld [vmem:[%s3959_s0 + $0xe0] sm:$0xff] }
  0x18   :  { %2296 = vmatpush3.bf16.msra.mxu0 %v3010_v22  ;;  %v3220_v48 = vld [vmem:[%s3958_s1 + $0x198] sm:$0xff]   ;;  %v54_v53 = vld [vmem:[%s3959_s0 + $0xf0] sm:$0xff]  ;;  %v44_v59 = vld [vmem:[%s3959_s0 + $0xa0] sm:$0xff] }
  0x19   :  { %2324 = vmatpush3.bf16.msra.mxu1 %v3016_v23  ;;  %2297 = vmatprep.subr.bf16.mxu0 %v3022_v24  ;;  %4016 = vst [vmem:[#allocation16_spill] sm:$0xff] %v3220_v48  ;;  %v43_v49 = vld [vmem:[%s3959_s0 + $0x98] sm:$0xff]  ;;  %v3239_v55 = vpack.c.bf16 %v54_v53, %v45_v52  ;;  %v42_v57 = vld [vmem:[%s3959_s0 + $0x90] sm:$0xff]  ;;  %v53_v62 = vld [vmem:[%s3959_s0 + $0xe8] sm:$0xff] }
  0x1a   :  { %2325 = vmatprep.subr.bf16.mxu1 %v3028_v25  ;;  %v3237_v54 = vpack.c.bf16 %v52_v50, %v43_v49  ;;  %v51_v58 = vld [vmem:[%s3959_s0 + $0xd8] sm:$0xff] }
  0x1b   :  { %4017 = vst [vmem:[#allocation17_spill] sm:$0xff] %v3239_v55  ;;  %v3251_v60 = vpack.c.bf16 %v51_v58, %v42_v57  ;;  %v99_v5 = vunpack.c.l.bf16 %v3239_v55 }
  0x1c   :  { %2298 = vmatpush3.bf16.msra.mxu0 %v3034_v26  ;;  %v97_v63 = vunpack.c.l.bf16 %v3237_v54  ;;  %v106_v1 = vunpack.c.h.bf16 %v3237_v54 }
  0x1d   :  { %2326 = vmatpush3.bf16.msra.mxu1 %v3040_v27  ;;  %2299 = vmatprep.subr.bf16.mxu0 %v3046_v28 }
  0x1e   :  { %2327 = vmatprep.subr.bf16.mxu1 %v3052_v29 }
  0x20   :  { %2300 = vmatpush3.bf16.msra.mxu0 %v3058_v30 }
  0x21   :  { %2328 = vmatpush3.bf16.msra.mxu1 %v3064_v31  ;;  %2341 = vmatprep.subr.bf16.mxu0 %v3105_v46 }
  0x22   :  { %2369 = vmatprep.subr.bf16.mxu1 %v3114_v51 }
  0x23   :  { %921 = vmatmul.mubr.bf16.vlgmr.msra.gmra.mxu0 %v150_v7  ;;  %v108_v7 = vunpack.c.h.bf16 %v3239_v55 }
  0x24   :  { %970 = vmatmul.mubr.bf16.vlgmr.msra.gmra.mxu1 %v152_v11  ;;  %2342 = vmatpush3.bf16.msra.mxu0 %v3122_v56  ;;  %v3263_v11 = vld [vmem:[%s3958_s1 + $0x150] sm:$0xff]  }
  0x25   :  { %2370 = vmatpush3.bf16.msra.mxu1 %v3128_v61  ;;  %2343 = vmatprep.subr.bf16.mxu0 %v3133_v3  ;;  %v144_v55 = vsub.f32 %v54_v53, %v108_v7  ;;  %v3279_v61 = vld [vmem:[%s3958_s1 + $0x110] sm:$0xff]  }
  0x26   :  { %2371 = vmatprep.subr.bf16.mxu1 %v3138_v9  ;;  %v135_v9 = vsub.f32 %v45_v52, %v99_v5  ;;  %4020 = vst [vmem:[#allocation20_spill] sm:$0xff] %v3279_v61  ;;  %v31_v5 = vld [vmem:[%s3959_s0 + $0x38] sm:$0xff] }
  0x28   :  { %2344 = vmatpush3.bf16.msra.mxu0 %v3143_v13  ;;  %v162_v52 = vpack.c.bf16 %v144_v55, %v135_v9  ;;  %v3304_v9 = vld [vmem:[%s3958_s1 + $0x108] sm:$0xff]  }
  0x29   :  { %2372 = vmatpush3.bf16.msra.mxu1 %v3148_v15  ;;  %2345 = vmatprep.subr.bf16.mxu0 %v3154_v32  ;;  %v142_v15 = vsub.f32 %v52_v50, %v106_v1  ;;  %4024 = vst [vmem:[#allocation24_spill] sm:$0xff] %v3304_v9  ;;  %v29_v55 = vld [vmem:[%s3959_s0 + $0x28] sm:$0xff] }
  0x2a   :  { %2373 = vmatprep.subr.bf16.mxu1 %v3161_v33  ;;  %v133_v33 = vsub.f32 %v43_v49, %v97_v63  ;;  %v3288_v49 = vld [vmem:[%s3958_s1 + $0x190] sm:$0xff]   ;;  %977 = vmatprep.mubr.bf16.mxu1 %v162_v52  ;;  %v28_v63 = vld [vmem:[%s3959_s0 + $0x20] sm:$0xff]  ;;  %v37_v1 = vld [vmem:[%s3959_s0 + $0x68] sm:$0xff] }
  0x2b   :  { %4021 = vst [vmem:[#allocation21_spill] sm:$0xff] %v3288_v49  ;;  %v3356_v7 = vpack.c.bf16 %v37_v1, %v28_v63 }
  0x2c   :  { %2346 = vmatpush3.bf16.msra.mxu0 %v3167_v34  ;;  %v160_v50 = vpack.c.bf16 %v142_v15, %v133_v33  ;;  %v3335_v33 = vld [vmem:[%s3958_s1 + $0x180] sm:$0xff]  }
  0x2d   :  { %2374 = vmatpush3.bf16.msra.mxu1 %v3172_v36  ;;  %2347 = vmatprep.subr.bf16.mxu0 %v3178_v37  ;;  %v3273_v36 = vld [vmem:[%s3958_s1 + $0x1d0] sm:$0xff]   ;;  %4029 = vst [vmem:[#allocation29_spill] sm:$0xff] %v3335_v33  ;;  %4030 = vst [vmem:[#allocation30_spill] sm:$0xff] %v3356_v7 }
  0x2e   :  { %2375 = vmatprep.subr.bf16.mxu1 %v3185_v38  ;;  %v3268_v38 = vpack.c.bf16 %v53_v62, %v44_v59  ;;  %4019 = vst [vmem:[#allocation19_spill] sm:$0xff] %v3273_v36  ;;  %928 = vmatprep.mubr.bf16.mxu0 %v160_v50  ;;  %v40_v50 = vld [vmem:[%s3959_s0 + $0x80] sm:$0xff] }
  0x30   :  { %2348 = vmatpush3.bf16.msra.mxu0 %v3191_v41  ;;  %4018 = vst [vmem:[#allocation18_spill] sm:$0xff] %v3268_v38  ;;  %v98_v31 = vunpack.c.l.bf16 %v3268_v38  ;;  %v107_v29 = vunpack.c.h.bf16 %v3268_v38 }
  0x31   :  { %2376 = vmatpush3.bf16.msra.mxu1 %v3196_v42  ;;  %2349 = vmatprep.subr.bf16.mxu0 %v3202_v43  ;;  %v105_v42 = vunpack.c.h.bf16 %v3251_v60 }
  0x32   :  { %2377 = vmatprep.subr.bf16.mxu1 %v3209_v44  ;;  %v96_v44 = vunpack.c.l.bf16 %v3251_v60  ;;  %v134_v53 = vsub.f32 %v44_v59, %v98_v31  ;;  %v3317_v31 = vld [vmem:[%s3958_s1 + $0x140] sm:$0xff]   ;;  %v38_v59 = vld [vmem:[%s3959_s0 + $0x70] sm:$0xff] }
  0x33   :  { %v141_v51 = vsub.f32 %v51_v58, %v105_v42  ;;  %v3299_v58 = vld [vmem:[%s3958_s1 + $0x1c8] sm:$0xff]   ;;  %4026 = vst [vmem:[#allocation26_spill] sm:$0xff] %v3317_v31 }
  0x34   :  { %2350 = vmatpush3.bf16.msra.mxu0 %v3215_v47  ;;  %v132_v45 = vsub.f32 %v42_v57, %v96_v44  ;;  %v3293_v44 = vld [vmem:[%s3958_s1 + $0x148] sm:$0xff]   ;;  %v143_v57 = vsub.f32 %v53_v62, %v107_v29  ;;  %4023 = vst [vmem:[#allocation23_spill] sm:$0xff] %v3299_v58  ;;  %v3344_v62 = vpack.c.bf16 %v38_v59, %v29_v55 }
  0x35   :  { %2378 = vmatpush3.bf16.msra.mxu1 %v3220_v48  ;;  %2351 = vmatprep.subr.bf16.mxu0 %v3263_v11  ;;  %4022 = vst [vmem:[#allocation22_spill] sm:$0xff] %v3293_v44  ;;  %v3310_v29 = vld [vmem:[%s3958_s1 + $0x188] sm:$0xff]  }
  0x36   :  { %2379 = vmatprep.subr.bf16.mxu1 %v3273_v36  ;;  %v159_v42 = vpack.c.bf16 %v141_v51, %v132_v45  ;;  %v161_v15 = vpack.c.bf16 %v143_v57, %v134_v53  ;;  %4025 = vst [vmem:[#allocation25_spill] sm:$0xff] %v3310_v29  ;;  %v3323_v45 = vld [vmem:[%s3958_s1 + $0x1c0] sm:$0xff]   ;;  %v83_v52 = vunpack.c.l.bf16 %v3344_v62  ;;  %v3363_v53 = vpack.c.bf16 %v40_v50, %v31_v5  ;;  %v3368_v57 = vld [vmem:[%s3958_s1 + $0x238] sm:$0xff]  }
  0x37   :  { %4027 = vst [vmem:[#allocation27_spill] sm:$0xff] %v3323_v45  ;;  %v3329_v51 = vld [vmem:[%s3958_s1 + $0x100] sm:$0xff]  }
  0x38   :  { %2352 = vmatpush3.bf16.msra.mxu0 %v3279_v61  ;;  %978 = vmatmul.mubr.bf16.gmra.mxu1 %v161_v15  ;;  %4028 = vst [vmem:[#allocation28_spill] sm:$0xff] %v3329_v51  ;;  %4031 = vst [vmem:[#allocation31_spill] sm:$0xff] %v3363_v53  ;;  %v30_v15 = vld [vmem:[%s3959_s0 + $0x30] sm:$0xff]  ;;  %v119_v36 = vsub.f32 %v29_v55, %v83_v52  ;;  %v85_v38 = vunpack.c.l.bf16 %v3363_v53 }
  0x39   :  { %929 = vmatmul.mubr.bf16.gmra.mxu0 %v159_v42  ;;  %2380 = vmatpush3.bf16.msra.mxu1 %v3288_v49  ;;  %v92_v42 = vunpack.c.h.bf16 %v3344_v62  ;;  %v46_v55 = vld [vmem:[%s3959_s0 + $0xb0] sm:$0xff] }
  0x3a   :  { %2353 = vmatprep.subr.bf16.mxu0 %v3293_v44  ;;  %2381 = vmatprep.subr.bf16.mxu1 %v3299_v58  ;;  %v91_v58 = vunpack.c.h.bf16 %v3356_v7  ;;  %v3402_v44 = vld [vmem:[%s3958_s1 + $0x230] sm:$0xff]  }
  0x3b   :  { %v128_v48 = vsub.f32 %v38_v59, %v92_v42 }
  0x3c   :  { %2354 = vmatpush3.bf16.msra.mxu0 %v3304_v9  ;;  %v127_v52 = vsub.f32 %v37_v1, %v91_v58  ;;  %v121_v9 = vsub.f32 %v31_v5, %v85_v38  ;;  %v49_v58 = vld [vmem:[%s3959_s0 + $0xc8] sm:$0xff] }
  0x3d   :  { %2355 = vmatprep.subr.bf16.mxu0 %v3317_v31  ;;  %2382 = vmatpush3.bf16.msra.mxu1 %v3310_v29  ;;  %v82_v29 = vunpack.c.l.bf16 %v3356_v7  ;;  %v56_v7 = vld [vmem:[%s3959_s0 + $0x100] sm:$0xff]  ;;  %v155_v31 = vpack.c.bf16 %v128_v48, %v119_v36 }
  0x3e   :  { %2383 = vmatprep.subr.bf16.mxu1 %v3323_v45  ;;  %v39_v45 = vld [vmem:[%s3959_s0 + $0x78] sm:$0xff]  ;;  %v48_v48 = vld [vmem:[%s3959_s0 + $0xc0] sm:$0xff] }
  0x3f   :  { %v3379_v49 = vpack.c.bf16 %v39_v45, %v30_v15  ;;  %v118_v59 = vsub.f32 %v28_v63, %v82_v29  ;;  %v58_v29 = vld [vmem:[%s3959_s0 + $0x110] sm:$0xff]  ;;  %1018 = vmatprep.mubr.bf16.mxu0 %v155_v31 }
  0x40   :  { %2356 = vmatpush3.bf16.msra.mxu0 %v3329_v51  ;;  %v94_v51 = vunpack.c.h.bf16 %v3363_v53  ;;  %v3422_v25 = vpack.c.bf16 %v58_v29, %v49_v58 }
  0x41   :  { %2384 = vmatpush3.bf16.msra.mxu1 %v3335_v33  ;;  %4032 = vst [vmem:[#allocation32_spill] sm:$0xff] %v3379_v49  ;;  %2651 = vmatprep.subr.bf16.mxu0 %v3368_v57  ;;  %v47_v33 = vld [vmem:[%s3959_s0 + $0xb8] sm:$0xff]  ;;  %v84_v42 = vunpack.c.l.bf16 %v3379_v49  ;;  %v93_v53 = vunpack.c.h.bf16 %v3379_v49  ;;  %v154_v63 = vpack.c.bf16 %v127_v52, %v118_v59 }
  0x42   :  { %2407 = vmatprep.subr.bf16.mxu1 %v2903_v0  ;;  %v55_v0 = vld [vmem:[%s3959_s0 + $0xf8] sm:$0xff]  ;;  %v130_v27 = vsub.f32 %v40_v50, %v94_v51  ;;  %v3404_v61 = vpack.c.bf16 %v56_v7, %v47_v33  ;;  %v57_v51 = vld [vmem:[%s3959_s0 + $0x108] sm:$0xff] }
  0x43   :  { %v120_v1 = vsub.f32 %v30_v15, %v84_v42  ;;  %v129_v36 = vsub.f32 %v39_v45, %v93_v53  ;;  %v3412_v38 = vpack.c.bf16 %v55_v0, %v46_v55  ;;  %1019 = vmatmul.mubr.bf16.vlgmr.msra.gmra.mxu0 %v154_v63  ;;  %v3426_v59 = vpack.c.bf16 %v57_v51, %v48_v48 }
  0x44   :  { %v157_v5 = vpack.c.bf16 %v130_v27, %v121_v9  ;;  %v101_v50 = vunpack.c.l.bf16 %v3404_v61  ;;  %v110_v49 = vunpack.c.h.bf16 %v3404_v61  ;;  %2652 = vmatpush3.bf16.msra.mxu0 %v3368_v57  ;;  %v103_v27 = vunpack.c.l.bf16 %v3422_v25 }
  0x45   :  { %v156_v45 = vpack.c.bf16 %v129_v36, %v120_v1  ;;  %v100_v53 = vunpack.c.l.bf16 %v3412_v38  ;;  %v109_v15 = vunpack.c.h.bf16 %v3412_v38  ;;  %v112_v9 = vunpack.c.h.bf16 %v3422_v25  ;;  %2653 = vmatprep.subr.bf16.mxu0 %v3402_v44  ;;  %v3435_v1 = vld [vmem:[%s3958_s1 + $0x228] sm:$0xff]  }
  0x46   :  { %1067 = vmatprep.mubr.bf16.mxu1 %v157_v5  ;;  %v137_v52 = vsub.f32 %v47_v33, %v101_v50  ;;  %v146_v31 = vsub.f32 %v56_v7, %v110_v49  ;;  %v102_v36 = vunpack.c.l.bf16 %v3426_v59  ;;  %v111_v5 = vunpack.c.h.bf16 %v3426_v59  ;;  %v32_v50 = vld [vmem:[%s3959_s0 + $0x40] sm:$0xff] }
  0x47   :  { %1068 = vmatmul.mubr.bf16.vlgmr.msra.gmra.mxu1 %v156_v45  ;;  %v136_v42 = vsub.f32 %v46_v55, %v100_v53  ;;  %v145_v63 = vsub.f32 %v55_v0, %v109_v15  ;;  %v139_v33 = vsub.f32 %v49_v58, %v103_v27  ;;  %v148_v7 = vsub.f32 %v58_v29, %v112_v9  ;;  %v41_v53 = vld [vmem:[%s3959_s0 + $0x88] sm:$0xff]  ;;  %v59_v27 = vld [vmem:[%s3959_s0 + $0x118] sm:$0xff] }
  0x48   :  { %2408 = vmatpush3.bf16.msra.mxu1 %v2912_v2  ;;  %v164_v49 = vpack.c.bf16 %v146_v31, %v137_v52  ;;  %v138_v0 = vsub.f32 %v48_v48, %v102_v36  ;;  %v147_v45 = vsub.f32 %v57_v51, %v111_v5  ;;  %2654 = vmatpush3.bf16.msra.mxu0 %v3402_v44  ;;  %v3465_v31 = vld [vmem:[%s3958_s1 + $0x218] sm:$0xff]   ;;  %v3492_v9 = vld [vmem:[%s3958_s1 + $0x208] sm:$0xff]   ;;  %v4046_v5 = vld [vmem:[#allocation30_spill] sm:$0xff] }
  0x49   :  { %2409 = vmatprep.subr.bf16.mxu1 %v2921_v4  ;;  %v163_v55 = vpack.c.bf16 %v145_v63, %v136_v42  ;;  %v166_v2 = vpack.c.bf16 %v148_v7, %v139_v33  ;;  %v3448_v15 = vpack.c.bf16 %v41_v53, %v32_v50  ;;  %2655 = vmatprep.subr.bf16.mxu0 %v3435_v1  ;;  %v3454_v4 = vld [vmem:[%s3958_s1 + $0x220] sm:$0xff]   ;;  %v2857_v36 = vld [vmem:[%s3958_s1 + $0xf8] sm:$0xff]   ;;  %v4049_v7 = vld [vmem:[#allocation11_spill] sm:$0xff] }
  0x4a   :  { %1026 = vmatprep.mubr.bf16.mxu0 %v164_v49  ;;  %v165_v58 = vpack.c.bf16 %v147_v45, %v138_v0  ;;  %v4047_v49 = vld [vmem:[#allocation9_spill] sm:$0xff]  ;;  %v4048_v33 = vld [vmem:[#allocation10_spill] sm:$0xff]  ;;  %v4052_v0 = vld [vmem:[#allocation31_spill] sm:$0xff] }
  0x4b   :  { %1075 = vmatprep.mubr.bf16.mxu1 %v166_v2  ;;  %v86_v29 = vunpack.c.l.bf16 %v3448_v15  ;;  %v95_v48 = vunpack.c.h.bf16 %v3448_v15  ;;  %1027 = vmatmul.mubr.bf16.gmra.mxu0 %v163_v55  ;;  %v4051_v55 = vld [vmem:[#allocation12_spill] sm:$0xff]  ;;  %v4054_v45 = vld [vmem:[#allocation14_spill] sm:$0xff]  ;;  %v4057_v2 = vld [vmem:[#allocation19_spill] sm:$0xff] }
  0x4c   :  { %2410 = vmatpush3.bf16.msra.mxu1 %v2930_v6  ;;  %2656 = vmatpush3.bf16.msra.mxu0 %v3435_v1 }
  0x4d   :  { %2411 = vmatprep.subr.bf16.mxu1 %v2939_v8  ;;  %v122_v51 = vsub.f32 %v32_v50, %v86_v29  ;;  %v131_v52 = vsub.f32 %v41_v53, %v95_v48  ;;  %2657 = vmatprep.subr.bf16.mxu0 %v3454_v4  ;;  %v50_v8 = vld [vmem:[%s3959_s0 + $0xd0] sm:$0xff]  ;;  %v4050_v50 = vld [vmem:[#allocation18_spill] sm:$0xff]  ;;  %v4060_v29 = vld [vmem:[#allocation25_spill] sm:$0xff] }
  0x4e   :  { %v4056_v53 = vld [vmem:[#allocation16_spill] sm:$0xff]  ;;  %v2783_v48 = vld [vmem:[%s3960_s2 + $0x78] sm:$0xff]  }
  0x4f   :  { %1076 = vmatmul.mubr.bf16.gmra.mxu1 %v165_v58  ;;  %v158_v6 = vpack.c.bf16 %v131_v52, %v122_v51  ;;  %v4059_v58 = vld [vmem:[#allocation23_spill] sm:$0xff]  ;;  %v2784_v51 = vld [vmem:[%s3960_s2 + $0xf8] sm:$0xff]  }
  0x50   :  { %2412 = vmatpush3.bf16.msra.mxu1 %v2948_v10  ;;  %1165 = vmatprep.mubr.bf16.mxu1 %v3077_v35  ;;  %v3481_v10 = vld [vmem:[%s3958_s1 + $0x210] sm:$0xff]   ;;  %v4062_v52 = vld [vmem:[#allocation29_spill] sm:$0xff] }
  0x51   :  { %2413 = vmatprep.subr.bf16.mxu1 %v2957_v12  ;;  %2658 = vmatpush3.bf16.msra.mxu0 %v3454_v4  ;;  %v3485_v12 = vpack.c.bf16 %v59_v27, %v50_v8 }
  0x52   :  { %2667 = vmatprep.mubr.bf16.mxu0 %v158_v6  ;;  %2659 = vmatprep.subr.bf16.mxu0 %v3465_v31  ;;  %v2787_v6 = vld [vmem:[%s3960_s2 + $0x70] sm:$0xff]  }
  0x53   :  { %v104_v42 = vunpack.c.l.bf16 %v3485_v12 }
  0x54   :  { %2414 = vmatpush3.bf16.msra.mxu1 %v2966_v14  ;;  %v113_v14 = vunpack.c.h.bf16 %v3485_v12 }
  0x55   :  { %2415 = vmatprep.subr.bf16.mxu1 %v2975_v16  ;;  %2660 = vmatpush3.bf16.msra.mxu0 %v3465_v31  ;;  %v3503_v16 = vld [vmem:[%s3958_s1 + $0x200] sm:$0xff]  }
  0x56   :  { %2661 = vmatprep.subr.bf16.mxu0 %v3481_v10  ;;  %v149_v63 = vsub.f32 %v59_v27, %v113_v14  ;;  %v4063_v27 = vld [vmem:[#allocation32_spill] sm:$0xff] }
  0x57   :  { %v2790_v14 = vld [vmem:[%s3960_s2 + $0xb0] sm:$0xff]  }
  0x58   :  { %2416 = vmatpush3.bf16.msra.mxu1 %v2986_v18  ;;  %v140_v18 = vsub.f32 %v50_v8, %v104_v42  ;;  %v2786_v8 = vld [vmem:[%s3960_s2 + $0xb8] sm:$0xff]   ;;  %v2791_v42 = vld [vmem:[%s3960_s2 + $0x68] sm:$0xff]  }
  0x59   :  { %2417 = vmatprep.subr.bf16.mxu1 %v2998_v20  ;;  %2662 = vmatpush3.bf16.msra.mxu0 %v3481_v10 }
  0x5a   :  { %2663 = vmatprep.subr.bf16.mxu0 %v3492_v9  ;;  %v167_v20 = vpack.c.bf16 %v149_v63, %v140_v18  ;;  %v2793_v18 = vld [vmem:[%s3960_s2 + $0x28] sm:$0xff]   ;;  %v2795_v63 = vld [vmem:[%s3960_s2 + $0x60] sm:$0xff]  }
  0x5c   :  { %2418 = vmatpush3.bf16.msra.mxu1 %v3010_v22  ;;  %v2858_v22 = vld [vmem:[%s3958_s1 + $0xb8] sm:$0xff]  }
  0x5d   :  { %2419 = vmatprep.subr.bf16.mxu1 %v3022_v24  ;;  %2664 = vmatpush3.bf16.msra.mxu0 %v3492_v9  ;;  %v2859_v24 = vld [vmem:[%s3958_s1 + $0xf0] sm:$0xff]  }
  0x5e   :  { %2665 = vmatprep.subr.bf16.mxu0 %v3503_v16 }
  0x60   :  { %2420 = vmatpush3.bf16.msra.mxu1 %v3034_v26  ;;  %v2860_v26 = vld [vmem:[%s3958_s1 + $0xb0] sm:$0xff]  }
  0x61   :  { %2421 = vmatprep.subr.bf16.mxu1 %v3046_v28  ;;  %2666 = vmatpush3.bf16.msra.mxu0 %v3503_v16  ;;  %v2861_v28 = vld [vmem:[%s3958_s1 + $0xe8] sm:$0xff]  }
  0x62   :  { %2435 = vmatprep.subr.bf16.mxu0 %v2857_v36  ;;  %v2797_v36 = vld [vmem:[%s3960_s2 + $0x20] sm:$0xff]  }
  0x64   :  { %2422 = vmatpush3.bf16.msra.mxu1 %v3058_v30  ;;  %2668 = vmatmul.mubr.bf16.vlgmr.msra.gmra.mxu0 %v167_v20  ;;  %v2862_v30 = vld [vmem:[%s3958_s1 + $0xa8] sm:$0xff]   ;;  %v2796_v20 = vld [vmem:[%s3960_s2 + $0xe0] sm:$0xff]  }
  0x65   :  { %2463 = vmatprep.subr.bf16.mxu1 %v3105_v46  ;;  %2436 = vmatpush3.bf16.msra.mxu0 %v2858_v22  ;;  %v2863_v46 = vld [vmem:[%s3958_s1 + $0xe0] sm:$0xff]   ;;  %v2799_v22 = vld [vmem:[%s3960_s2 + $0x58] sm:$0xff]  }
  0x66   :  { %1214 = vmatprep.mubr.bf16.mxu0 %v3088_v39  ;;  %2437 = vmatprep.subr.bf16.mxu0 %v2859_v24  ;;  %v2798_v24 = vld [vmem:[%s3960_s2 + $0xa0] sm:$0xff]  }
  0x67   :  { %1166 = vmatmul.mubr.bf16.vlgmr.msra.gmra.mxu1 %v3090_v40 }
  0x68   :  { %2464 = vmatpush3.bf16.msra.mxu1 %v3122_v56  ;;  %1173 = vmatprep.mubr.bf16.mxu1 %v3237_v54  ;;  %v2864_v56 = vld [vmem:[%s3958_s1 + $0xa0] sm:$0xff]  }
  0x69   :  { %2465 = vmatprep.subr.bf16.mxu1 %v3133_v3  ;;  %2438 = vmatpush3.bf16.msra.mxu0 %v2860_v26  ;;  %v4033_v3 = vld [vmem:[#allocation2_spill] sm:$0xff]  ;;  %v2800_v26 = vld [vmem:[%s3960_s2 + $0xd8] sm:$0xff]  }
  0x6a   :  { %2439 = vmatprep.subr.bf16.mxu0 %v2861_v28  ;;  %v2803_v28 = vld [vmem:[%s3960_s2 + $0x50] sm:$0xff]  }
  0x6c   :  { %2466 = vmatpush3.bf16.msra.mxu1 %v3143_v13  ;;  %v4034_v13 = vld [vmem:[#allocation20_spill] sm:$0xff] }
  0x6d   :  { %2467 = vmatprep.subr.bf16.mxu1 %v3154_v32  ;;  %2440 = vmatpush3.bf16.msra.mxu0 %v2862_v30  ;;  %v4035_v32 = vld [vmem:[#allocation22_spill] sm:$0xff]  ;;  %v2802_v30 = vld [vmem:[%s3960_s2 + $0x98] sm:$0xff]  }
  0x6e   :  { %2441 = vmatprep.subr.bf16.mxu0 %v2863_v46  ;;  %v2804_v46 = vld [vmem:[%s3960_s2 + $0xd0] sm:$0xff]  }
  0x6f   :  { %1174 = vmatmul.mubr.bf16.gmra.mxu1 %v3251_v60 }
  0x70   :  { %2468 = vmatpush3.bf16.msra.mxu1 %v3167_v34  ;;  %1263 = vmatprep.mubr.bf16.mxu1 %v3344_v62  ;;  %v4037_v34 = vld [vmem:[#allocation4_spill] sm:$0xff] }
  0x71   :  { %2469 = vmatprep.subr.bf16.mxu1 %v3178_v37  ;;  %2442 = vmatpush3.bf16.msra.mxu0 %v2864_v56  ;;  %v4038_v37 = vld [vmem:[#allocation24_spill] sm:$0xff] }
  0x72   :  { %2443 = vmatprep.subr.bf16.mxu0 %v2980_v17  ;;  %v4036_v17 = vld [vmem:[#allocation3_spill] sm:$0xff]  ;;  %v2805_v56 = vld [vmem:[%s3960_s2 + $0x10] sm:$0xff]  }
  0x74   :  { %2470 = vmatpush3.bf16.msra.mxu1 %v3191_v41  ;;  %v4041_v41 = vld [vmem:[#allocation7_spill] sm:$0xff] }
  0x75   :  { %2471 = vmatprep.subr.bf16.mxu1 %v3202_v43  ;;  %2444 = vmatpush3.bf16.msra.mxu0 %v2992_v19  ;;  %v4039_v19 = vld [vmem:[#allocation26_spill] sm:$0xff]  ;;  %v4042_v43 = vld [vmem:[#allocation28_spill] sm:$0xff] }
  0x76   :  { %2445 = vmatprep.subr.bf16.mxu0 %v3004_v21  ;;  %v4040_v21 = vld [vmem:[#allocation5_spill] sm:$0xff] }
  0x78   :  { %2472 = vmatpush3.bf16.msra.mxu1 %v3215_v47  ;;  %v4044_v47 = vld [vmem:[#allocation8_spill] sm:$0xff] }
  0x79   :  { %2473 = vmatprep.subr.bf16.mxu1 %v3263_v11  ;;  %2446 = vmatpush3.bf16.msra.mxu0 %v3016_v23  ;;  %v4043_v23 = vld [vmem:[#allocation6_spill] sm:$0xff]  ;;  %v4045_v11 = vld [vmem:[#allocation17_spill] sm:$0xff] }
  0x7a   :  { %2447 = vmatprep.subr.bf16.mxu0 %v4033_v3  ;;  %v2807_v3 = vld [vmem:[%s3960_s2 + $0x48] sm:$0xff]  }
  0x7c   :  { %2474 = vmatpush3.bf16.msra.mxu1 %v4034_v13  ;;  %v2806_v13 = vld [vmem:[%s3960_s2 + $0x90] sm:$0xff]  }
  0x7d   :  { %2475 = vmatprep.subr.bf16.mxu1 %v4035_v32  ;;  %2448 = vmatpush3.bf16.msra.mxu0 %v4036_v17  ;;  %v2808_v32 = vld [vmem:[%s3960_s2 + $0xc8] sm:$0xff]  }
  0x7e   :  { %2449 = vmatprep.subr.bf16.mxu0 %v4037_v34  ;;  %v2809_v17 = vld [vmem:[%s3960_s2 + $0x8] sm:$0xff]   ;;  %v2811_v34 = vld [vmem:[%s3960_s2 + $0x40] sm:$0xff]  }
  0x80   :  { %2476 = vmatpush3.bf16.msra.mxu1 %v4038_v37  ;;  %v2810_v37 = vld [vmem:[%s3960_s2 + $0x88] sm:$0xff]  }
  0x81   :  { %2477 = vmatprep.subr.bf16.mxu1 %v4039_v19  ;;  %2450 = vmatpush3.bf16.msra.mxu0 %v4040_v21  ;;  %v2812_v19 = vld [vmem:[%s3960_s2 + $0xc0] sm:$0xff]  }
  0x82   :  { %2491 = vmatprep.subr.bf16.mxu0 %v4041_v41  ;;  %v2813_v21 = vld [vmem:[%s3960_s2] sm:$0xff]   ;;  %v2815_v41 = vld [vmem:[%s3960_s2 + $0x178] sm:$0xff]  }
  0x84   :  { %2478 = vmatpush3.bf16.msra.mxu1 %v4042_v43  ;;  %1215 = vmatmul.mubr.bf16.vlgmr.msra.gmra.mxu0 %v4043_v23  ;;  %v2814_v43 = vld [vmem:[%s3960_s2 + $0x80] sm:$0xff]  }
  0x85   :  { %2671 = vmatprep.subr.bf16.mxu1 %v3368_v57  ;;  %2492 = vmatpush3.bf16.msra.mxu0 %v4044_v47  ;;  %v2817_v47 = vld [vmem:[%s3960_s2 + $0x1f8] sm:$0xff]  }
  0x86   :  { %1222 = vmatprep.mubr.bf16.mxu0 %v4045_v11  ;;  %2493 = vmatprep.subr.bf16.mxu0 %v4047_v49  ;;  %v2816_v49 = vld [vmem:[%s3960_s2 + $0x138] sm:$0xff]  }
  0x87   :  { %1264 = vmatmul.mubr.bf16.vlgmr.msra.gmra.mxu1 %v4046_v5 }
  0x88   :  { %2672 = vmatpush3.bf16.msra.mxu1 %v3368_v57  ;;  %1271 = vmatprep.mubr.bf16.mxu1 %v3404_v61  ;;  %v4053_v57 = vld [vmem:[#allocation13_spill] sm:$0xff] }
  0x89   :  { %2673 = vmatprep.subr.bf16.mxu1 %v3402_v44  ;;  %2494 = vmatpush3.bf16.msra.mxu0 %v4048_v33  ;;  %v2819_v33 = vld [vmem:[%s3960_s2 + $0x170] sm:$0xff]  }
  0x8a   :  { %2495 = vmatprep.subr.bf16.mxu0 %v4049_v7  ;;  %v2818_v7 = vld [vmem:[%s3960_s2 + $0x1b8] sm:$0xff]  }
  0x8c   :  { %2674 = vmatpush3.bf16.msra.mxu1 %v3402_v44  ;;  %1223 = vmatmul.mubr.bf16.gmra.mxu0 %v4050_v50  ;;  %v4055_v44 = vld [vmem:[#allocation15_spill] sm:$0xff] }
  0x8d   :  { %2675 = vmatprep.subr.bf16.mxu1 %v3435_v1  ;;  %2496 = vmatpush3.bf16.msra.mxu0 %v4051_v55  ;;  %v2821_v55 = vld [vmem:[%s3960_s2 + $0x1f0] sm:$0xff]  }
  0x8e   :  { %1312 = vmatprep.mubr.bf16.mxu0 %v4052_v0  ;;  %2497 = vmatprep.subr.bf16.mxu0 %v4053_v57  ;;  %v2820_v57 = vld [vmem:[%s3960_s2 + $0x130] sm:$0xff]  }
  0x8f   :  { %1272 = vmatmul.mubr.bf16.gmra.mxu1 %v3412_v38 }
  0x90   :  { %2676 = vmatpush3.bf16.msra.mxu1 %v3435_v1  ;;  %2687 = vmatprep.mubr.bf16.mxu1 %v3448_v15  ;;  %v4058_v1 = vld [vmem:[#allocation21_spill] sm:$0xff] }
  0x91   :  { %2677 = vmatprep.subr.bf16.mxu1 %v3454_v4  ;;  %2498 = vmatpush3.bf16.msra.mxu0 %v4054_v45  ;;  %v2823_v45 = vld [vmem:[%s3960_s2 + $0x168] sm:$0xff]  }
  0x92   :  { %2499 = vmatprep.subr.bf16.mxu0 %v4055_v44  ;;  %v2825_v44 = vld [vmem:[%s3960_s2 + $0x1e8] sm:$0xff]  }
  0x94   :  { %2678 = vmatpush3.bf16.msra.mxu1 %v3454_v4  ;;  %v4061_v4 = vld [vmem:[#allocation27_spill] sm:$0xff] }
  0x95   :  { %2679 = vmatprep.subr.bf16.mxu1 %v3465_v31  ;;  %2500 = vmatpush3.bf16.msra.mxu0 %v4056_v53  ;;  %v2829_v53 = vld [vmem:[%s3960_s2 + $0x1e0] sm:$0xff]  }
  0x96   :  { %2501 = vmatprep.subr.bf16.mxu0 %v4057_v2  ;;  %v2828_v2 = vld [vmem:[%s3960_s2 + $0x120] sm:$0xff]  }
  0x98   :  { %2680 = vmatpush3.bf16.msra.mxu1 %v3465_v31  ;;  %v2785_v31 = vld [vmem:[%s3960_s2 + $0x38] sm:$0xff]  }
  0x99   :  { %2681 = vmatprep.subr.bf16.mxu1 %v3481_v10  ;;  %2502 = vmatpush3.bf16.msra.mxu0 %v4058_v1  ;;  %v2831_v1 = vld [vmem:[%s3960_s2 + $0x158] sm:$0xff]  }
  0x9a   :  { %2503 = vmatprep.subr.bf16.mxu0 %v4059_v58  ;;  %v2830_v58 = vld [vmem:[%s3960_s2 + $0x1a0] sm:$0xff]  }
  0x9c   :  { %2682 = vmatpush3.bf16.msra.mxu1 %v3481_v10  ;;  %v2788_v10 = vld [vmem:[%s3960_s2 + $0xf0] sm:$0xff]  }
  0x9d   :  { %2683 = vmatprep.subr.bf16.mxu1 %v3492_v9  ;;  %2504 = vmatpush3.bf16.msra.mxu0 %v4060_v29  ;;  %v2837_v29 = vld [vmem:[%s3960_s2 + $0x1d0] sm:$0xff]  }
  0x9e   :  { %2505 = vmatprep.subr.bf16.mxu0 %v4061_v4  ;;  %v2836_v4 = vld [vmem:[%s3960_s2 + $0x110] sm:$0xff]  }
  0xa0   :  { %2684 = vmatpush3.bf16.msra.mxu1 %v3492_v9  ;;  %v2789_v9 = vld [vmem:[%s3960_s2 + $0x30] sm:$0xff]  }
  0xa1   :  { %2685 = vmatprep.subr.bf16.mxu1 %v3503_v16  ;;  %2506 = vmatpush3.bf16.msra.mxu0 %v4062_v52  ;;  %v2841_v52 = vld [vmem:[%s3960_s2 + $0x1c8] sm:$0xff]  }
  0xa2   :  { %2529 = vmatprep.subr.bf16.mxu0 %v2783_v48  ;;  %v2839_v48 = vld [vmem:[%s3960_s2 + $0x148] sm:$0xff]  }
  0xa4   :  { %2686 = vmatpush3.bf16.msra.mxu1 %v3503_v16  ;;  %1313 = vmatmul.mubr.bf16.vlgmr.msra.gmra.mxu0 %v4063_v27  ;;  %v2792_v16 = vld [vmem:[%s3960_s2 + $0xe8] sm:$0xff]  }
  0xa5   :  { %2557 = vmatprep.subr.bf16.mxu1 %v2784_v51  ;;  %2530 = vmatpush3.bf16.msra.mxu0 %v2785_v31  ;;  %v2838_v51 = vld [vmem:[%s3960_s2 + $0x190] sm:$0xff]   ;;  %v2840_v31 = vld [vmem:[%s3960_s2 + $0x108] sm:$0xff]  }
  0xa6   :  { %1320 = vmatprep.mubr.bf16.mxu0 %v3422_v25  ;;  %2531 = vmatprep.subr.bf16.mxu0 %v2787_v6  ;;  %v2843_v6 = vld [vmem:[%s3960_s2 + $0x140] sm:$0xff]  }
  0xa7   :  { %2688 = vmatmul.mubr.bf16.vlgmr.msra.gmra.mxu1 %v3485_v12 }
  0xa8   :  { %2558 = vmatpush3.bf16.msra.mxu1 %v2786_v8  ;;  %1891 = vmatprep.mubr.bf16.mxu1 %v3088_v39  ;;  %v2794_v39 = vld [vmem:[%s3960_s2 + $0xa8] sm:$0xff]  }
  0xa9   :  { %2559 = vmatprep.subr.bf16.mxu1 %v2788_v10  ;;  %2532 = vmatpush3.bf16.msra.mxu0 %v2789_v9  ;;  %v2842_v8 = vld [vmem:[%s3960_s2 + $0x188] sm:$0xff]   ;;  %v2845_v10 = vld [vmem:[%s3960_s2 + $0x1c0] sm:$0xff]  }
  0xaa   :  { %2533 = vmatprep.subr.bf16.mxu0 %v2791_v42  ;;  %v2844_v9 = vld [vmem:[%s3960_s2 + $0x100] sm:$0xff]   ;;  %v2847_v42 = vld [vmem:[%s3960_s2 + $0x238] sm:$0xff]  }
  0xac   :  { %2560 = vmatpush3.bf16.msra.mxu1 %v2790_v14  ;;  %1321 = vmatmul.mubr.bf16.gmra.mxu0 %v3426_v59  ;;  %v2846_v14 = vld [vmem:[%s3960_s2 + $0x180] sm:$0xff]  }
  0xad   :  { %2561 = vmatprep.subr.bf16.mxu1 %v2792_v16  ;;  %2534 = vmatpush3.bf16.msra.mxu0 %v2793_v18 }
  0xae   :  { %1842 = vmatprep.mubr.bf16.mxu0 %v3077_v35  ;;  %2535 = vmatprep.subr.bf16.mxu0 %v2795_v63  ;;  %v2801_v35 = vld [vmem:[%s3960_s2 + $0x18] sm:$0xff]  }
  0xb0   :  { %2562 = vmatpush3.bf16.msra.mxu1 %v2794_v39 }
  0xb1   :  { %2563 = vmatprep.subr.bf16.mxu1 %v2796_v20  ;;  %2536 = vmatpush3.bf16.msra.mxu0 %v2797_v36  ;;  %v2848_v36 = vld [vmem:[%s3960_s2 + $0x230] sm:$0xff]  }
  0xb2   :  { %2537 = vmatprep.subr.bf16.mxu0 %v2799_v22 }
  0xb4   :  { %2564 = vmatpush3.bf16.msra.mxu1 %v2798_v24 }
  0xb5   :  { %2565 = vmatprep.subr.bf16.mxu1 %v2800_v26  ;;  %2538 = vmatpush3.bf16.msra.mxu0 %v2801_v35 }
  0xb6   :  { %2539 = vmatprep.subr.bf16.mxu0 %v2803_v28 }
  0xb8   :  { %2566 = vmatpush3.bf16.msra.mxu1 %v2802_v30 }
  0xb9   :  { %2567 = vmatprep.subr.bf16.mxu1 %v2804_v46  ;;  %2540 = vmatpush3.bf16.msra.mxu0 %v2805_v56  ;;  %v2849_v56 = vld [vmem:[%s3960_s2 + $0x228] sm:$0xff]  }
  0xba   :  { %2541 = vmatprep.subr.bf16.mxu0 %v2807_v3 }
  0xbc   :  { %2568 = vmatpush3.bf16.msra.mxu1 %v2806_v13  ;;  %v2850_v13 = vld [vmem:[%s3960_s2 + $0x220] sm:$0xff]  }
  0xbd   :  { %2569 = vmatprep.subr.bf16.mxu1 %v2808_v32  ;;  %2542 = vmatpush3.bf16.msra.mxu0 %v2809_v17 }
  0xbe   :  { %2543 = vmatprep.subr.bf16.mxu0 %v2811_v34 }
  0xc0   :  { %2570 = vmatpush3.bf16.msra.mxu1 %v2810_v37  ;;  %v2854_v37 = vld [vmem:[%s3960_s2 + $0x200] sm:$0xff]  }
  0xc1   :  { %2571 = vmatprep.subr.bf16.mxu1 %v2812_v19  ;;  %2544 = vmatpush3.bf16.msra.mxu0 %v2813_v21 }
  0xc2   :  { %2585 = vmatprep.subr.bf16.mxu0 %v2815_v41 }
  0xc4   :  { %2572 = vmatpush3.bf16.msra.mxu1 %v2814_v43  ;;  %1843 = vmatmul.mubr.bf16.vlgmr.msra.gmra.mxu0 %v3090_v40  ;;  %v2822_v40 = vld [vmem:[%s3960_s2 + $0x1b0] sm:$0xff]  }
  0xc5   :  { %2613 = vmatprep.subr.bf16.mxu1 %v2817_v47  ;;  %2586 = vmatpush3.bf16.msra.mxu0 %v2816_v49 }
  0xc6   :  { %1850 = vmatprep.mubr.bf16.mxu0 %v3237_v54  ;;  %2587 = vmatprep.subr.bf16.mxu0 %v2819_v33  ;;  %v2824_v54 = vld [vmem:[%s3960_s2 + $0x128] sm:$0xff]  }
  0xc7   :  { %1892 = vmatmul.mubr.bf16.vlgmr.msra.gmra.mxu1 %v4043_v23  ;;  %v2827_v23 = vld [vmem:[%s3960_s2 + $0x160] sm:$0xff]  }
  0xc8   :  { %2614 = vmatpush3.bf16.msra.mxu1 %v2818_v7  ;;  %1899 = vmatprep.mubr.bf16.mxu1 %v4045_v11  ;;  %v2826_v11 = vld [vmem:[%s3960_s2 + $0x1a8] sm:$0xff]  }
  0xc9   :  { %2615 = vmatprep.subr.bf16.mxu1 %v2821_v55  ;;  %2588 = vmatpush3.bf16.msra.mxu0 %v2820_v57 }
  0xca   :  { %2589 = vmatprep.subr.bf16.mxu0 %v2823_v45 }
  0xcc   :  { %2616 = vmatpush3.bf16.msra.mxu1 %v2822_v40  ;;  %1851 = vmatmul.mubr.bf16.gmra.mxu0 %v3251_v60  ;;  %v2833_v60 = vld [vmem:[%s3960_s2 + $0x1d8] sm:$0xff]  }
  0xcd   :  { %2617 = vmatprep.subr.bf16.mxu1 %v2825_v44  ;;  %2590 = vmatpush3.bf16.msra.mxu0 %v2824_v54 }
  0xce   :  { %1940 = vmatprep.mubr.bf16.mxu0 %v3344_v62  ;;  %2591 = vmatprep.subr.bf16.mxu0 %v2827_v23  ;;  %v2832_v62 = vld [vmem:[%s3960_s2 + $0x118] sm:$0xff]  }
  0xcf   :  { %1900 = vmatmul.mubr.bf16.gmra.mxu1 %v4050_v50  ;;  %v2835_v50 = vld [vmem:[%s3960_s2 + $0x150] sm:$0xff]  }
  0xd0   :  { %2618 = vmatpush3.bf16.msra.mxu1 %v2826_v11  ;;  %1989 = vmatprep.mubr.bf16.mxu1 %v4052_v0  ;;  %v2834_v0 = vld [vmem:[%s3960_s2 + $0x198] sm:$0xff]  }
  0xd1   :  { %2619 = vmatprep.subr.bf16.mxu1 %v2829_v53  ;;  %2592 = vmatpush3.bf16.msra.mxu0 %v2828_v2 }
  0xd2   :  { %2593 = vmatprep.subr.bf16.mxu0 %v2831_v1 }
  0xd4   :  { %2620 = vmatpush3.bf16.msra.mxu1 %v2830_v58 }
  0xd5   :  { %2621 = vmatprep.subr.bf16.mxu1 %v2833_v60  ;;  %2594 = vmatpush3.bf16.msra.mxu0 %v2832_v62 }
  0xd6   :  { %2595 = vmatprep.subr.bf16.mxu0 %v2835_v50 }
  0xd8   :  { %2622 = vmatpush3.bf16.msra.mxu1 %v2834_v0 }
  0xd9   :  { %2623 = vmatprep.subr.bf16.mxu1 %v2837_v29  ;;  %2596 = vmatpush3.bf16.msra.mxu0 %v2836_v4 }
  0xda   :  { %2597 = vmatprep.subr.bf16.mxu0 %v2839_v48 }
  0xdc   :  { %2624 = vmatpush3.bf16.msra.mxu1 %v2838_v51 }
  0xdd   :  { %2625 = vmatprep.subr.bf16.mxu1 %v2841_v52  ;;  %2598 = vmatpush3.bf16.msra.mxu0 %v2840_v31 }
  0xde   :  { %2599 = vmatprep.subr.bf16.mxu0 %v2843_v6 }
  0xe0   :  { %2626 = vmatpush3.bf16.msra.mxu1 %v2842_v8 }
  0xe1   :  { %2627 = vmatprep.subr.bf16.mxu1 %v2845_v10  ;;  %2600 = vmatpush3.bf16.msra.mxu0 %v2844_v9 }
  0xe2   :  { %2691 = vmatprep.subr.bf16.mxu0 %v2847_v42 }
  0xe3   :  { %v2301_v16 = vpop.f32.mrf.mxu0 }
  0xe4   :  { %v2329_v18 = vpop.f32.mrf.mxu1  ;;  %2628 = vmatpush3.bf16.msra.mxu1 %v2846_v14  ;;  %1941 = vmatmul.mubr.bf16.vlgmr.msra.gmra.mxu0 %v4046_v5 }
  0xe5   :  { %v2302_v63 = vpop.f32.mrf.mxu0  ;;  %2692 = vmatpush3.bf16.msra.mxu0 %v2847_v42  ;;  %1948 = vmatprep.mubr.bf16.mxu0 %v3404_v61  ;;  %v2851_v61 = vld [vmem:[%s3960_s2 + $0x218] sm:$0xff]  }
  0xe6   :  { %v2303_v39 = vadd.f32 %v2302_v63, %v2301_v16  ;;  %v2330_v20 = vpop.f32.mrf.mxu1  ;;  %2693 = vmatprep.subr.bf16.mxu0 %v2848_v36 }
  0xe7   :  { %v2331_v22 = vadd.f32 %v2330_v20, %v2329_v18  ;;  %v2304_v24 = vpop.f32.mrf.mxu0  ;;  %1990 = vmatmul.mubr.bf16.vlgmr.msra.gmra.mxu1 %v4063_v27 }
  0xe8   :  { %v2332_v26 = vpop.f32.mrf.mxu1  ;;  %1997 = vmatprep.mubr.bf16.mxu1 %v3422_v25  ;;  %v2852_v25 = vld [vmem:[%s3960_s2 + $0x210] sm:$0xff]  }
  0xe9   :  { %v972_v35 = vadd.f32 %v2331_v22, %v2303_v39  ;;  %v2305_v28 = vpop.f32.mrf.mxu0  ;;  %2694 = vmatpush3.bf16.msra.mxu0 %v2848_v36 }
  0xea   :  { %v2306_v30 = vadd.f32 %v2305_v28, %v2304_v24  ;;  %v2333_v46 = vpop.f32.mrf.mxu1  ;;  %2695 = vmatprep.subr.bf16.mxu0 %v2849_v56 }
  0xeb   :  { %v2334_v3 = vadd.f32 %v2333_v46, %v2332_v26 }
  0xec   :  { %1949 = vmatmul.mubr.bf16.gmra.mxu0 %v3412_v38  ;;  %v2853_v38 = vld [vmem:[%s3960_s2 + $0x208] sm:$0xff]  }
  0xed   :  { %v975_v5 = vadd.f32 %v2334_v3, %v2306_v30  ;;  %2696 = vmatpush3.bf16.msra.mxu0 %v2849_v56  ;;  %2707 = vmatprep.mubr.bf16.mxu0 %v3448_v15 }
  0xee   :  { %2697 = vmatprep.subr.bf16.mxu0 %v2850_v13 }
  0xef   :  { %1998 = vmatmul.mubr.bf16.gmra.mxu1 %v3426_v59 }
  0xf1   :  { %2698 = vmatpush3.bf16.msra.mxu0 %v2850_v13 }
  0xf2   :  { %2699 = vmatprep.subr.bf16.mxu0 %v2851_v61 }
  0xf5   :  { %2700 = vmatpush3.bf16.msra.mxu0 %v2851_v61 }
  0xf6   :  { %2701 = vmatprep.subr.bf16.mxu0 %v2852_v25 }
  0xf8   :  { %v2335_v15 = vpop.f32.mrf.mxu1 }
  0xf9   :  { %v2307_v27 = vpop.f32.mrf.mxu0  ;;  %2702 = vmatpush3.bf16.msra.mxu0 %v2852_v25 }
  0xfa   :  { %v2336_v17 = vpop.f32.mrf.mxu1  ;;  %2703 = vmatprep.subr.bf16.mxu0 %v2853_v38 }
  0xfb   :  { %v2308_v59 = vpop.f32.mrf.mxu0  ;;  %v2337_v19 = vadd.f32 %v2336_v17, %v2335_v15 }
  0xfc   :  { %v2309_v32 = vadd.f32 %v2308_v59, %v2307_v27  ;;  %v2338_v21 = vpop.f32.mrf.mxu1 }
  0xfd   :  { %v2310_v34 = vpop.f32.mrf.mxu0  ;;  %2704 = vmatpush3.bf16.msra.mxu0 %v2853_v38 }
  0xfe   :  { %v980_v43 = vadd.f32 %v2337_v19, %v2309_v32  ;;  %v2339_v49 = vpop.f32.mrf.mxu1  ;;  %2705 = vmatprep.subr.bf16.mxu0 %v2854_v37 }
  0xff   :  { %v2311_v41 = vpop.f32.mrf.mxu0  ;;  %v2340_v33 = vadd.f32 %v2339_v49, %v2338_v21 }
 0x100   :  { %v2312_v47 = vadd.f32 %v2311_v41, %v2310_v34 }
 0x101   :  { %2706 = vmatpush3.bf16.msra.mxu0 %v2854_v37 }
 0x102   :  { %v983_v7 = vadd.f32 %v2340_v33, %v2312_v47 }
 0x103   :  { %v2357_v55 = vpop.f32.mrf.mxu0 }
 0x104   :  { %2708 = vmatmul.mubr.bf16.vlgmr.msra.gmra.mxu0 %v3485_v12 }
 0x105   :  { %v2358_v57 = vpop.f32.mrf.mxu0 }
 0x106   :  { %v2359_v40 = vadd.f32 %v2358_v57, %v2357_v55 }
 0x107   :  { %v2385_v45 = vpop.f32.mrf.mxu1  ;;  %v2360_v44 = vpop.f32.mrf.mxu0 }
 0x108   :  { %v1021_v23 = vadd.f32 %v2359_v40, %v972_v35 }
 0x109   :  { %v2386_v54 = vpop.f32.mrf.mxu1  ;;  %v2361_v53 = vpop.f32.mrf.mxu0 }
 0x10a   :  { %v2387_v11 = vadd.f32 %v2386_v54, %v2385_v45  ;;  %v2362_v1 = vadd.f32 %v2361_v53, %v2360_v44 }
 0x10b   :  { %v2388_v2 = vpop.f32.mrf.mxu1  ;;  %v2363_v60 = vpop.f32.mrf.mxu0 }
 0x10c   :  { %v1070_v58 = vadd.f32 %v2387_v11, %v1021_v23  ;;  %v1024_v50 = vadd.f32 %v2362_v1, %v975_v5 }
 0x10d   :  { %v2389_v62 = vpop.f32.mrf.mxu1  ;;  %v2364_v29 = vpop.f32.mrf.mxu0 }
 0x10e   :  { %v2390_v0 = vadd.f32 %v2389_v62, %v2388_v2  ;;  %v2365_v48 = vadd.f32 %v2364_v29, %v2363_v60 }
 0x10f   :  { %v2391_v4 = vpop.f32.mrf.mxu1  ;;  %v2366_v12 = vpop.f32.mrf.mxu0 }
 0x110   :  { %v3844_v51 = vadd.f32 %v2390_v0, %v1024_v50  ;;  %v1029_v31 = vadd.f32 %v2365_v48, %v980_v43 }
 0x111   :  { %v2392_v52 = vpop.f32.mrf.mxu1  ;;  %v2367_v8 = vpop.f32.mrf.mxu0 }
 0x112   :  { %v2393_v6 = vadd.f32 %v2392_v52, %v2391_v4  ;;  %v2368_v9 = vadd.f32 %v2367_v8, %v2366_v12 }
 0x113   :  { %v2394_v10 = vpop.f32.mrf.mxu1 }
 0x114   :  { %v1078_v42 = vadd.f32 %v2393_v6, %v1029_v31  ;;  %v1032_v16 = vadd.f32 %v2368_v9, %v983_v7 }
 0x115   :  { %v2395_v14 = vpop.f32.mrf.mxu1 }
 0x116   :  { %v2396_v18 = vadd.f32 %v2395_v14, %v2394_v10 }
 0x118   :  { %v1081_v63 = vadd.f32 %v2396_v18, %v1032_v16 }
 0x124   :  { %v2669_v39 = vpop.f32.mrf.mxu0 }
 0x125   :  { %v3846_v20 = vadd.f32 %v2669_v39, %v1078_v42 }
 0x126   :  { %v1118_v36 = vpop.f32.mrf.mxu0 }
 0x127   :  { %v3848_v22 = vadd.f32 %v1118_v36, %v1070_v58  ;;  %v2423_v35 = vpop.f32.mrf.mxu1 }
 0x128   :  { %v2670_v24 = vpop.f32.mrf.mxu0 }
 0x129   :  { %v3850_v26 = vadd.f32 %v2670_v24, %v1081_v63  ;;  %v2424_v28 = vpop.f32.mrf.mxu1 }
 0x12a   :  { %v3854_v46 = vpop.f32.mrf.mxu0 }
 0x12b   :  { %v3852_v30 = vpop.f32.mrf.mxu1 }
 0x12d   :  { %v3856_v56 = vpop.f32.mrf.mxu1 }
 0x12f   :  { %v3858_v5 = vpop.f32.mrf.mxu1 }
 0x131   :  { %v2430_v61 = vpop.f32.mrf.mxu1 }
 0x133   :  { %v2432_v27 = vpop.f32.mrf.mxu1 }
 0x135   :  { %v2433_v15 = vpop.f32.mrf.mxu1 }
 0x144   :  { %v2451_v3 = vpop.f32.mrf.mxu0 }
 0x146   :  { %v2452_v13 = vpop.f32.mrf.mxu0 }
 0x147   :  { %v2479_v32 = vpop.f32.mrf.mxu1 }
 0x148   :  { %v3860_v25 = vpop.f32.mrf.mxu0 }
 0x149   :  { %v2480_v34 = vpop.f32.mrf.mxu1 }
 0x14a   :  { %v3862_v38 = vpop.f32.mrf.mxu0 }
 0x14b   :  { %v3866_v19 = vpop.f32.mrf.mxu1 }
 0x14c   :  { %v3864_v59 = vpop.f32.mrf.mxu0 }
 0x14d   :  { %v3868_v41 = vpop.f32.mrf.mxu1 }
 0x14e   :  { %v2458_v17 = vpop.f32.mrf.mxu0 }
 0x14f   :  { %v3872_v47 = vpop.f32.mrf.mxu1 }
 0x150   :  { %v2460_v37 = vpop.f32.mrf.mxu0 }
 0x151   :  { %v3876_v33 = vpop.f32.mrf.mxu1 }
 0x152   :  { %v2461_v21 = vpop.f32.mrf.mxu0 }
 0x153   :  { %v3880_v55 = vpop.f32.mrf.mxu1 }
 0x154   :  { %4067 = vst [vmem:[#allocation3_spill] sm:$0xff] %v3880_v55 }
 0x155   :  { %v3884_v45 = vpop.f32.mrf.mxu1 }
 0x156   :  { %4069 = vst [vmem:[#allocation24_spill] sm:$0xff] %v3884_v45  ;;  %v2434_v45 = vadd.f32 %v2433_v15, %v2432_v27 }
 0x164   :  { %v3870_v43 = vpop.f32.mrf.mxu0 }
 0x165   :  { %4064 = vst [vmem:[#allocation2_spill] sm:$0xff] %v3870_v43 }
 0x166   :  { %v3874_v49 = vpop.f32.mrf.mxu0 }
 0x167   :  { %4065 = vst [vmem:[#allocation20_spill] sm:$0xff] %v3874_v49  ;;  %v3888_v44 = vpop.f32.mrf.mxu1 }
 0x168   :  { %v3878_v7 = vpop.f32.mrf.mxu0  ;;  %4071 = vst [vmem:[#allocation5_spill] sm:$0xff] %v3888_v44  ;;  %v2425_v44 = vadd.f32 %v2424_v28, %v2423_v35  ;;  %v2456_v35 = vadd.f32 %v3862_v38, %v3860_v25  ;;  %v2459_v28 = vadd.f32 %v2458_v17, %v3864_v59  ;;  %v2484_v25 = vadd.f32 %v3868_v41, %v3866_v19 }
 0x169   :  { %4066 = vst [vmem:[#allocation22_spill] sm:$0xff] %v3878_v7  ;;  %v3892_v23 = vpop.f32.mrf.mxu1  ;;  %v1122_v7 = vadd.f32 %v3854_v46, %v3844_v51  ;;  %v2487_v17 = vadd.f32 %v3876_v33, %v3872_v47 }
 0x16a   :  { %v3882_v57 = vpop.f32.mrf.mxu0  ;;  %4073 = vst [vmem:[#allocation28_spill] sm:$0xff] %v3892_v23  ;;  %v2453_v23 = vadd.f32 %v2452_v13, %v2451_v3 }
 0x16b   :  { %4068 = vst [vmem:[#allocation4_spill] sm:$0xff] %v3882_v57  ;;  %v3896_v53 = vpop.f32.mrf.mxu1  ;;  %v1168_v57 = vadd.f32 %v2425_v44, %v3848_v22  ;;  %v2462_v22 = vadd.f32 %v2461_v21, %v2460_v37 }
 0x16c   :  { %v3886_v40 = vpop.f32.mrf.mxu0  ;;  %4075 = vst [vmem:[#allocation8_spill] sm:$0xff] %v3896_v53  ;;  %v4079_v37 = vld [vmem:[#allocation2_spill] sm:$0xff] }
 0x16d   :  { %4070 = vst [vmem:[#allocation26_spill] sm:$0xff] %v3886_v40  ;;  %v3900_v1 = vpop.f32.mrf.mxu1  ;;  %v2431_v40 = vadd.f32 %v2430_v61, %v3858_v5  ;;  %v1217_v55 = vadd.f32 %v2453_v23, %v1168_v57  ;;  %v4081_v23 = vld [vmem:[#allocation3_spill] sm:$0xff] }
 0x16e   :  { %v3890_v54 = vpop.f32.mrf.mxu0  ;;  %4077 = vst [vmem:[#allocation30_spill] sm:$0xff] %v3900_v1 }
 0x16f   :  { %4072 = vst [vmem:[#allocation7_spill] sm:$0xff] %v3890_v54  ;;  %v2428_v54 = vadd.f32 %v3856_v56, %v3852_v30  ;;  %v1176_v51 = vadd.f32 %v2431_v40, %v3846_v20  ;;  %v1179_v30 = vadd.f32 %v2434_v45, %v3850_v26  ;;  %v4080_v26 = vld [vmem:[#allocation20_spill] sm:$0xff] }
 0x170   :  { %v3894_v11 = vpop.f32.mrf.mxu0  ;;  %v2509_v21 = vadd.f32 %v4080_v26, %v4079_v37 }
 0x171   :  { %4074 = vst [vmem:[#allocation6_spill] sm:$0xff] %v3894_v11  ;;  %v1171_v3 = vadd.f32 %v2428_v54, %v1122_v7  ;;  %v1225_v38 = vadd.f32 %v2459_v28, %v1176_v51  ;;  %v1228_v20 = vadd.f32 %v2462_v22, %v1179_v30 }
 0x172   :  { %v3898_v2 = vpop.f32.mrf.mxu0 }
 0x173   :  { %4076 = vst [vmem:[#allocation17_spill] sm:$0xff] %v3898_v2  ;;  %v1220_v57 = vadd.f32 %v2456_v35, %v1171_v3 }
 0x184   :  { %v2545_v58 = vpop.f32.mrf.mxu0 }
 0x186   :  { %v2546_v62 = vpop.f32.mrf.mxu0 }
 0x187   :  { %v2573_v60 = vpop.f32.mrf.mxu1  ;;  %v2547_v13 = vadd.f32 %v2546_v62, %v2545_v58  ;;  %v4082_v58 = vld [vmem:[#allocation24_spill] sm:$0xff]  ;;  %v4083_v62 = vld [vmem:[#allocation26_spill] sm:$0xff] }
 0x188   :  { %v2548_v0 = vpop.f32.mrf.mxu0 }
 0x189   :  { %v2574_v50 = vpop.f32.mrf.mxu1 }
 0x18a   :  { %v2549_v4 = vpop.f32.mrf.mxu0  ;;  %v2575_v44 = vadd.f32 %v2574_v50, %v2573_v60  ;;  %v2490_v60 = vadd.f32 %v4082_v58, %v4081_v23  ;;  %v4084_v50 = vld [vmem:[#allocation7_spill] sm:$0xff] }
 0x18b   :  { %v2576_v29 = vpop.f32.mrf.mxu1  ;;  %v2515_v19 = vadd.f32 %v4084_v50, %v4083_v62 }
 0x18c   :  { %v2551_v12 = vpop.f32.mrf.mxu0  ;;  %v1894_v7 = vadd.f32 %v2575_v44, %v2547_v13 }
 0x18d   :  { %v2577_v48 = vpop.f32.mrf.mxu1 }
 0x18e   :  { %v2552_v31 = vpop.f32.mrf.mxu0  ;;  %v2578_v45 = vadd.f32 %v2577_v48, %v2576_v29 }
 0x18f   :  { %v2579_v52 = vpop.f32.mrf.mxu1  ;;  %v2553_v46 = vadd.f32 %v2552_v31, %v2551_v12  ;;  %v1274_v31 = vadd.f32 %v2487_v17, %v1225_v38  ;;  %v2282_v17 = vld [vmem:[%s3961_s3] ss:$0 sm:$0xff] }
 0x190   :  { %v2554_v8 = vpop.f32.mrf.mxu0 }
 0x191   :  { %v2580_v6 = vpop.f32.mrf.mxu1 }
 0x192   :  { %v2555_v9 = vpop.f32.mrf.mxu0  ;;  %v2581_v56 = vadd.f32 %v2580_v6, %v2579_v52  ;;  %v4085_v6 = vld [vmem:[#allocation22_spill] sm:$0xff] }
 0x193   :  { %v2582_v10 = vpop.f32.mrf.mxu1  ;;  %v2556_v61 = vadd.f32 %v2555_v9, %v2554_v8  ;;  %v4086_v8 = vld [vmem:[#allocation4_spill] sm:$0xff] }
 0x194   :  { %v1902_v40 = vadd.f32 %v2581_v56, %v2553_v46  ;;  %v4091_v56 = vld [vmem:[#allocation5_spill] sm:$0xff] }
 0x195   :  { %v2583_v42 = vpop.f32.mrf.mxu1 }
 0x196   :  { %v2584_v27 = vadd.f32 %v2583_v42, %v2582_v10 }
 0x198   :  { %v1905_v41 = vadd.f32 %v2584_v27, %v2556_v61 }
 0x1a4   :  { %v2601_v14 = vpop.f32.mrf.mxu0 }
 0x1a6   :  { %v2602_v16 = vpop.f32.mrf.mxu0 }
 0x1a7   :  { %v2629_v18 = vpop.f32.mrf.mxu1  ;;  %v2603_v15 = vadd.f32 %v2602_v16, %v2601_v14  ;;  %v1269_v14 = vadd.f32 %v2484_v25, %v1220_v57  ;;  %v1277_v16 = vadd.f32 %v2490_v60, %v1228_v20  ;;  %v4093_v25 = vld [vmem:[#allocation8_spill] sm:$0xff] }
 0x1a8   :  { %v2604_v63 = vpop.f32.mrf.mxu0 }
 0x1a9   :  { %v2630_v39 = vpop.f32.mrf.mxu1 }
 0x1aa   :  { %v2605_v36 = vpop.f32.mrf.mxu0  ;;  %v2631_v12 = vadd.f32 %v2630_v39, %v2629_v18  ;;  %v4090_v39 = vld [vmem:[#allocation28_spill] sm:$0xff] }
 0x1ab   :  { %v3902_v24 = vpop.f32.mrf.mxu1  ;;  %v2606_v47 = vadd.f32 %v2605_v36, %v2604_v63 }
 0x1ac   :  { %4078 = vst [vmem:[#allocation9_spill] sm:$0xff] %v3902_v24  ;;  %v2607_v53 = vpop.f32.mrf.mxu0  ;;  %v2481_v24 = vadd.f32 %v2480_v34, %v2479_v32 }
 0x1ad   :  { %v3904_v1 = vpop.f32.mrf.mxu1 }
 0x1ae   :  { %v2608_v2 = vpop.f32.mrf.mxu0  ;;  %v1266_v5 = vadd.f32 %v2481_v24, %v1217_v55  ;;  %v2550_v55 = vadd.f32 %v2549_v4, %v2548_v0  ;;  %v2512_v0 = vadd.f32 %v4086_v8, %v4085_v6  ;;  %v4087_v4 = vld [vmem:[#allocation6_spill] sm:$0xff]  ;;  %v1323_v24 = vadd.f32 %v2515_v19, %v1274_v31 }
 0x1af   :  { %v2635_v11 = vpop.f32.mrf.mxu1  ;;  %v2609_v59 = vadd.f32 %v2608_v2, %v2607_v53  ;;  %v1943_v53 = vadd.f32 %v2603_v15, %v1894_v7 }
 0x1b0   :  { %v2610_v49 = vpop.f32.mrf.mxu0  ;;  %v1315_v29 = vadd.f32 %v2509_v21, %v1266_v5  ;;  %v1897_v10 = vadd.f32 %v2578_v45, %v2550_v55  ;;  %v1318_v3 = vadd.f32 %v2512_v0, %v1269_v14  ;;  %v1372_v5 = vadd.f32 %v4091_v56, %v1323_v24 }
 0x1b1   :  { %v2636_v43 = vpop.f32.mrf.mxu1  ;;  %v1951_v33 = vadd.f32 %v2609_v59, %v1902_v40 }
 0x1b2   :  { %v2611_v32 = vpop.f32.mrf.mxu0  ;;  %v2637_v52 = vadd.f32 %v2636_v43, %v2635_v11  ;;  %v1946_v28 = vadd.f32 %v2606_v47, %v1897_v10  ;;  %v1992_v11 = vadd.f32 %v2631_v12, %v1943_v53  ;;  %v1364_v36 = vadd.f32 %v4090_v39, %v1315_v29 }
 0x1b3   :  { %v2638_v34 = vpop.f32.mrf.mxu1  ;;  %v2612_v54 = vadd.f32 %v2611_v32, %v2610_v49  ;;  %v4088_v49 = vld [vmem:[#allocation17_spill] sm:$0xff] }
 0x1b4   :  { %v2518_v48 = vadd.f32 %v4088_v49, %v4087_v4  ;;  %v4089_v18 = vld [vmem:[#allocation9_spill] sm:$0xff]  ;;  %v2000_v43 = vadd.f32 %v2637_v52, %v1951_v33 }
 0x1b5   :  { %v2639_v2 = vpop.f32.mrf.mxu1  ;;  %v1954_v9 = vadd.f32 %v2612_v54, %v1905_v41  ;;  %v2634_v63 = vadd.f32 %v3904_v1, %v4089_v18 }
 0x1b6   :  { %v2640_v42 = vadd.f32 %v2639_v2, %v2638_v34  ;;  %v1326_v13 = vadd.f32 %v2518_v48, %v1277_v16  ;;  %v4092_v34 = vld [vmem:[#allocation30_spill] sm:$0xff] }
 0x1b7   :  { %v1995_v15 = vadd.f32 %v2634_v63, %v1946_v28  ;;  %v1367_v57 = vadd.f32 %v4092_v34, %v1318_v3 }
 0x1b8   :  { %v2003_v30 = vadd.f32 %v2640_v42, %v1954_v9  ;;  %v1375_v38 = vadd.f32 %v4093_v25, %v1326_v13 }
 0x1c4   :  { %v2709_v35 = vpop.f32.mrf.mxu0 }
 0x1c5   :  { %v2049_v44 = vadd.f32 %v2709_v35, %v2000_v43  ;;  %v2283_v43 = vld [vmem:[%s3962_s4] ss:$0 sm:$0xff] }
 0x1c6   :  { %v2040_v22 = vpop.f32.mrf.mxu0 }
 0x1c7   :  { %v2041_v51 = vadd.f32 %v2040_v22, %v1992_v11  ;;  %v2057_v1 = vadd.f32 %v2049_v44, %v1372_v5  ;;  %v2284_v22 = vld [vmem:[%s3963_s5] ss:$0 sm:$0xff] }
 0x1c8   :  { %v2710_v46 = vpop.f32.mrf.mxu0 }
 0x1c9   :  { %v2055_v61 = vadd.f32 %v2041_v51, %v1364_v36  ;;  %v2052_v27 = vadd.f32 %v2710_v46, %v2003_v30  ;;  %v2068_v21 = vadd.f32 %v2282_v17, %v2057_v1 }
 0x1ca   :  { %v2043_v32 = vpop.f32.mrf.mxu0 }
 0x1cb   :  { %v2044_v59 = vadd.f32 %v2043_v32, %v1995_v15  ;;  %v2066_v20 = vadd.f32 %v2282_v17, %v2055_v61  ;;  %v2058_v37 = vadd.f32 %v2052_v27, %v1375_v38  ;;  %v2072_v54 = vmax.f32 %v2068_v21, 0.0 }
 0x1cd   :  { %v2056_v26 = vadd.f32 %v2044_v59, %v1367_v57  ;;  %v2070_v55 = vmax.f32 %v2066_v20, 0.0  ;;  %v2069_v45 = vadd.f32 %v2282_v17, %v2058_v37 }
 0x1cf   :  { %v2067_v7 = vadd.f32 %v2282_v17, %v2056_v26  ;;  %v2073_v58 = vmax.f32 %v2069_v45, 0.0 }
 0x1d1   :  { %v2071_v40 = vmax.f32 %v2067_v7, 0.0 }
 0x1d3   :  { %v2074_v23 = vadd.f32 %v2071_v40, %v2070_v55 }
 0x1d5   :  { %v2075_v60 = vadd.f32 %v2074_v23, %v2072_v54 }
 0x1d7   :  { %v2076_v62 = vadd.f32 %v2075_v60, %v2073_v58 }
 0x1d9   :  { %v2077_v50 = vrot.slane %v2076_v62, 4 }
 0x1db   :  { %v2078_v19 = vadd.f32 %v2077_v50, %v2076_v62 }
 0x1dd   :  { %v2079_v41 = vrot.slane %v2078_v19, 2 }
 0x1df   :  { %v2080_v53 = vadd.f32 %v2079_v41, %v2078_v19 }
 0x1e1   :  { %v2081_v2 = vrot.slane %v2080_v53, 1 }
 0x1e3   :  { %v2082_v12 = vadd.f32 %v2081_v2, %v2080_v53 }
 0x1e5   :  { %v2083_v47 = vmul.f32 0.03125, %v2082_v12 }
 0x1e7   :  { %v2084_v33 = vsub.f32 %v2070_v55, %v2083_v47  ;;  %v2085_v52 = vsub.f32 %v2071_v40, %v2083_v47  ;;  %v2086_v31 = vsub.f32 %v2072_v54, %v2083_v47  ;;  %v2087_v6 = vsub.f32 %v2073_v58, %v2083_v47 }
 0x1e9   :  { %v2088_v8 = vmul.f32 %v2084_v33, %v2084_v33  ;;  %v2089_v0 = vmul.f32 %v2085_v52, %v2085_v52  ;;  %v2090_v29 = vmul.f32 %v2086_v31, %v2086_v31  ;;  %v2091_v49 = vmul.f32 %v2087_v6, %v2087_v6 }
 0x1eb   :  { %v2092_v4 = vadd.f32 %v2089_v0, %v2088_v8 }
 0x1ed   :  { %v2093_v48 = vadd.f32 %v2092_v4, %v2090_v29 }
 0x1ef   :  { %v2094_v10 = vadd.f32 %v2093_v48, %v2091_v49 }
 0x1f1   :  { %v2095_v9 = vrot.slane %v2094_v10, 4 }
 0x1f3   :  { %v2096_v42 = vadd.f32 %v2095_v9, %v2094_v10 }
 0x1f5   :  { %v2097_v14 = vrot.slane %v2096_v42, 2 }
 0x1f7   :  { %v2098_v16 = vadd.f32 %v2097_v14, %v2096_v42 }
 0x1f9   :  { %v2099_v24 = vrot.slane %v2098_v16, 1 }
 0x1fb   :  { %v2100_v35 = vadd.f32 %v2099_v24, %v2098_v16 }
 0x1fd   :  { %v2101_v28 = vmul.f32 0.03125, %v2100_v35 }
 0x1ff   :  { %v2102_v18 = vadd.f32 1e-05, %v2101_v28 }
 0x201   :  { %2855 = vrsqrt.f32 %v2102_v18 }
 0x20e   :  { %v2856_v63 = vpop.eup %2855 }
 0x20f   :  { %v2104_v11 = vmul.f32 %v2856_v63, %v2084_v33  ;;  %v2105_v39 = vmul.f32 %v2856_v63, %v2085_v52  ;;  %v2106_v36 = vmul.f32 %v2856_v63, %v2086_v31  ;;  %v2107_v3 = vmul.f32 %v2856_v63, %v2087_v6 }
 0x211   :  { %v2115_v13 = vmul.f32 %v2283_v43, %v2104_v11  ;;  %v2116_v44 = vmul.f32 %v2283_v43, %v2105_v39  ;;  %v2117_v51 = vmul.f32 %v2283_v43, %v2106_v36  ;;  %v2118_v30 = vmul.f32 %v2283_v43, %v2107_v3 }
 0x213   :  { %v2126_v46 = vadd.f32 %v2284_v22, %v2115_v13  ;;  %v2127_v56 = vadd.f32 %v2284_v22, %v2116_v44  ;;  %v2128_v5 = vadd.f32 %v2284_v22, %v2117_v51  ;;  %v2129_v61 = vadd.f32 %v2284_v22, %v2118_v30 }
 0x215   :  { %2130 = vst [vmem:[%s3964_s6] sm:$0xff] %v2126_v46  ;;  %2131 = vst [vmem:[%s3964_s6 + $0x8] sm:$0xff] %v2127_v56 }
 0x216   :  { %2132 = vst [vmem:[%s3964_s6 + $0x10] sm:$0xff] %v2128_v5  ;;  %2133 = vst [vmem:[%s3964_s6 + $0x18] sm:$0xff] %v2129_v61 }

// kernel: film_layer_forward.7
= control target key start
LH: loop header
LB: loop body
LE: loop exit
PB: predicated region body
PF: predicated region fallthrough
CT: control target
= control target key end

     0   :  { %vm2518_vm0 = vmmov 0   ;;  %s3388_s1 = inlined_call_operand.vmem [shape: bf16[1152,128], index: 1, kind: input, shape index: {}]   ;;  %s3389_s0 = inlined_call_operand.vmem [shape: f32[8,1152], index: 0, kind: input, shape index: {}]   ;;  %s3390_s2 = inlined_call_operand.vmem [shape: bf16[1152,128], index: 2, kind: input, shape index: {}]   ;;  %s3391_s3 = inlined_call_operand.vmem [shape: f32[1,128], index: 3, kind: input, shape index: {}]   ;;  %s3392_s4 = inlined_call_operand.vmem [shape: f32[1,128], index: 4, kind: input, shape index: {}]   ;;  %s3393_s5 = inlined_call_operand.vmem [shape: f32[1,128], index: 5, kind: input, shape index: {}]   ;;  %s3394_s6 = inlined_call_operand.vmem [shape: f32[8,128], index: 6, kind: output, shape index: {}]  }
   0x1   :  { %v2557_v0 = vld [vmem:[%s3388_s1 + $0x78] sm:$0xff]   ;;  %v2580_v4 = vld [vmem:[%s3388_s1 + $0x70] sm:$0xff]   ;;  %v2604_v8 = vld [vmem:[%s3388_s1 + $0x68] sm:$0xff]  }
   0x2   :  { %v2562_v1 = vld [vmem:[%s3388_s1 + $0xf8] sm:$0xff]   ;;  %2018 = vmatprep.subr.bf16.mxu0 %v2557_v0  ;;  %v2586_v5 = vld [vmem:[%s3388_s1 + $0xf0] sm:$0xff]   ;;  %v2610_v9 = vld [vmem:[%s3388_s1 + $0xe8] sm:$0xff]  }
   0x3   :  { %v2568_v2 = vld [vmem:[%s3388_s1 + $0x38] sm:$0xff]   ;;  %2040 = vmatprep.subr.bf16.mxu1 %v2562_v1  ;;  %v2592_v6 = vld [vmem:[%s3388_s1 + $0x30] sm:$0xff]   ;;  %v2616_v10 = vld [vmem:[%s3388_s1 + $0x28] sm:$0xff]  }
   0x4   :  { %v2574_v3 = vld [vmem:[%s3388_s1 + $0xb8] sm:$0xff]   ;;  %2019 = vmatpush3.bf16.msra.mxu0 %v2568_v2  ;;  %v2598_v7 = vld [vmem:[%s3388_s1 + $0xb0] sm:$0xff]   ;;  %v2622_v11 = vld [vmem:[%s3388_s1 + $0xa8] sm:$0xff]  }
   0x5   :  { %2041 = vmatpush3.bf16.msra.mxu1 %v2574_v3  ;;  %2020 = vmatprep.subr.bf16.mxu0 %v2580_v4  ;;  %v2628_v12 = vld [vmem:[%s3388_s1 + $0x60] sm:$0xff]   ;;  %v2652_v16 = vld [vmem:[%s3388_s1 + $0x58] sm:$0xff]   ;;  %v2676_v20 = vld [vmem:[%s3388_s1 + $0x50] sm:$0xff]  }
   0x6   :  { %2042 = vmatprep.subr.bf16.mxu1 %v2586_v5  ;;  %v2634_v13 = vld [vmem:[%s3388_s1 + $0xe0] sm:$0xff]   ;;  %v2658_v17 = vld [vmem:[%s3388_s1 + $0xd8] sm:$0xff]   ;;  %v2682_v21 = vld [vmem:[%s3388_s1 + $0xd0] sm:$0xff]  }
   0x7   :  { %v2640_v14 = vld [vmem:[%s3388_s1 + $0x20] sm:$0xff]   ;;  %v2664_v18 = vld [vmem:[%s3388_s1 + $0x18] sm:$0xff]   ;;  %v2688_v22 = vld [vmem:[%s3388_s1 + $0x10] sm:$0xff]  }
   0x8   :  { %2021 = vmatpush3.bf16.msra.mxu0 %v2592_v6  ;;  %v2646_v15 = vld [vmem:[%s3388_s1 + $0xa0] sm:$0xff]   ;;  %v2670_v19 = vld [vmem:[%s3388_s1 + $0x98] sm:$0xff]   ;;  %v2694_v23 = vld [vmem:[%s3388_s1 + $0x90] sm:$0xff]  }
   0x9   :  { %2043 = vmatpush3.bf16.msra.mxu1 %v2598_v7  ;;  %2022 = vmatprep.subr.bf16.mxu0 %v2604_v8  ;;  %v2700_v24 = vld [vmem:[%s3388_s1 + $0x48] sm:$0xff]   ;;  %v2724_v28 = vld [vmem:[%s3388_s1 + $0x40] sm:$0xff]   ;;  %v27_v33 = vld [vmem:[%s3389_s0 + $0x18] sm:$0xff] }
   0xa   :  { %2044 = vmatprep.subr.bf16.mxu1 %v2610_v9  ;;  %v2706_v25 = vld [vmem:[%s3388_s1 + $0xc8] sm:$0xff]   ;;  %v2730_v29 = vld [vmem:[%s3388_s1 + $0xc0] sm:$0xff]   ;;  %v2757_v36 = vpack.c.bf16 %v27_v33, %v27_v33  ;;  %v26_v38 = vld [vmem:[%s3389_s0 + $0x10] sm:$0xff] }
   0xb   :  { %3420 = vst [vmem:[#allocation2_spill] sm:$0xff] %v2706_v25  ;;  %v2712_v26 = vld [vmem:[%s3388_s1 + $0x8] sm:$0xff]   ;;  %3422 = vst [vmem:[#allocation4_spill] sm:$0xff] %v2730_v29  ;;  %v2736_v30 = vld [vmem:[%s3388_s1] sm:$0xff]   ;;  %v2764_v39 = vpack.c.bf16 %v26_v38, %v26_v38 }
   0xc   :  { %2023 = vmatpush3.bf16.msra.mxu0 %v2616_v10  ;;  %v2718_v27 = vld [vmem:[%s3388_s1 + $0x88] sm:$0xff]   ;;  %v2742_v31 = vld [vmem:[%s3388_s1 + $0x80] sm:$0xff]   ;;  %v2769_v40 = vld [vmem:[%s3388_s1 + $0x178] sm:$0xff]   ;;  %v45_v42 = vunpack.c.l.bf16 %v2757_v36 }
   0xd   :  { %2045 = vmatpush3.bf16.msra.mxu1 %v2622_v11  ;;  %2024 = vmatprep.subr.bf16.mxu0 %v2628_v12  ;;  %3421 = vst [vmem:[#allocation3_spill] sm:$0xff] %v2718_v27  ;;  %3423 = vst [vmem:[#allocation5_spill] sm:$0xff] %v2742_v31  ;;  %v25_v32 = vld [vmem:[%s3389_s0 + $0x8] sm:$0xff]  ;;  %v24_v34 = vld [vmem:[%s3389_s0] sm:$0xff]  ;;  %v44_v45 = vunpack.c.l.bf16 %v2764_v39 }
   0xe   :  { %2046 = vmatprep.subr.bf16.mxu1 %v2634_v13  ;;  %v2755_v35 = vpack.c.bf16 %v25_v32, %v25_v32  ;;  %v2759_v37 = vpack.c.bf16 %v24_v34, %v24_v34  ;;  %3424 = vst [vmem:[#allocation6_spill] sm:$0xff] %v2764_v39  ;;  %v2777_v44 = vld [vmem:[%s3388_s1 + $0x1f8] sm:$0xff]   ;;  %v54_v47 = vsub.f32 %v27_v33, %v45_v42  ;;  %v2795_v55 = vld [vmem:[%s3388_s1 + $0x170] sm:$0xff]   ;;  %v2817_v60 = vld [vmem:[%s3388_s1 + $0x168] sm:$0xff]  }
   0xf   :  { %3425 = vst [vmem:[#allocation7_spill] sm:$0xff] %v2777_v44  ;;  %v2785_v49 = vld [vmem:[%s3388_s1 + $0x138] sm:$0xff]   ;;  %v53_v50 = vsub.f32 %v26_v38, %v44_v45  ;;  %v2800_v57 = vld [vmem:[%s3388_s1 + $0x1f0] sm:$0xff]   ;;  %v2824_v61 = vld [vmem:[%s3388_s1 + $0x1e8] sm:$0xff]  }
  0x10   :  { %2025 = vmatpush3.bf16.msra.mxu0 %v2640_v14  ;;  %v43_v41 = vunpack.c.l.bf16 %v2755_v35  ;;  %v42_v43 = vunpack.c.l.bf16 %v2759_v37  ;;  %v2790_v51 = vld [vmem:[%s3388_s1 + $0x1b8] sm:$0xff]   ;;  %v63_v53 = vpack.c.bf16 %v54_v47, %v54_v47  ;;  %3427 = vst [vmem:[#allocation9_spill] sm:$0xff] %v2800_v57  ;;  %v2805_v58 = vld [vmem:[%s3388_s1 + $0x130] sm:$0xff]   ;;  %3429 = vst [vmem:[#allocation11_spill] sm:$0xff] %v2824_v61 }
  0x11   :  { %2047 = vmatpush3.bf16.msra.mxu1 %v2646_v15  ;;  %2026 = vmatprep.subr.bf16.mxu0 %v2652_v16  ;;  %3426 = vst [vmem:[#allocation8_spill] sm:$0xff] %v2790_v51  ;;  %v62_v56 = vpack.c.bf16 %v53_v50, %v53_v50  ;;  %v2810_v59 = vld [vmem:[%s3388_s1 + $0x1b0] sm:$0xff]   ;;  %v2829_v62 = vld [vmem:[%s3388_s1 + $0x128] sm:$0xff]   ;;  %v2848_v33 = vld [vmem:[%s3388_s1 + $0x1e0] sm:$0xff]  }
  0x12   :  { %2048 = vmatprep.subr.bf16.mxu1 %v2658_v17  ;;  %v52_v46 = vsub.f32 %v25_v32, %v43_v41  ;;  %v51_v48 = vsub.f32 %v24_v34, %v42_v43  ;;  %861 = vmatprep.mubr.bf16.mxu1 %v63_v53  ;;  %3428 = vst [vmem:[#allocation10_spill] sm:$0xff] %v2810_v59  ;;  %v2834_v63 = vld [vmem:[%s3388_s1 + $0x1a8] sm:$0xff]   ;;  %v2841_v32 = vld [vmem:[%s3388_s1 + $0x160] sm:$0xff]   ;;  %3431 = vst [vmem:[#allocation13_spill] sm:$0xff] %v2848_v33 }
  0x13   :  { %3430 = vst [vmem:[#allocation12_spill] sm:$0xff] %v2834_v63  ;;  %v2853_v34 = vld [vmem:[%s3388_s1 + $0x120] sm:$0xff]   ;;  %v2865_v41 = vld [vmem:[%s3388_s1 + $0x158] sm:$0xff]   ;;  %v2896_v47 = vld [vmem:[%s3388_s1 + $0x1d0] sm:$0xff]  }
  0x14   :  { %2027 = vmatpush3.bf16.msra.mxu0 %v2664_v18  ;;  %v61_v52 = vpack.c.bf16 %v52_v46, %v52_v46  ;;  %v60_v54 = vpack.c.bf16 %v51_v48, %v51_v48  ;;  %v2858_v38 = vld [vmem:[%s3388_s1 + $0x1a0] sm:$0xff]   ;;  %v2872_v42 = vld [vmem:[%s3388_s1 + $0x1d8] sm:$0xff]   ;;  %v2889_v46 = vld [vmem:[%s3388_s1 + $0x150] sm:$0xff]   ;;  %3435 = vst [vmem:[#allocation17_spill] sm:$0xff] %v2896_v47 }
  0x15   :  { %2049 = vmatpush3.bf16.msra.mxu1 %v2670_v19  ;;  %2028 = vmatprep.subr.bf16.mxu0 %v2676_v20  ;;  %3432 = vst [vmem:[#allocation14_spill] sm:$0xff] %v2858_v38  ;;  %3433 = vst [vmem:[#allocation15_spill] sm:$0xff] %v2872_v42  ;;  %v2877_v43 = vld [vmem:[%s3388_s1 + $0x118] sm:$0xff]   ;;  %v2901_v48 = vld [vmem:[%s3388_s1 + $0x110] sm:$0xff]  }
  0x16   :  { %2050 = vmatprep.subr.bf16.mxu1 %v2682_v21  ;;  %821 = vmatprep.mubr.bf16.mxu0 %v61_v52  ;;  %v2882_v45 = vld [vmem:[%s3388_s1 + $0x198] sm:$0xff]   ;;  %3436 = vst [vmem:[#allocation18_spill] sm:$0xff] %v2901_v48  ;;  %v2906_v50 = vld [vmem:[%s3388_s1 + $0x190] sm:$0xff]   ;;  %v2913_v52 = vld [vmem:[%s3388_s1 + $0x148] sm:$0xff]  }
  0x17   :  { %3434 = vst [vmem:[#allocation16_spill] sm:$0xff] %v2882_v45  ;;  %3437 = vst [vmem:[#allocation19_spill] sm:$0xff] %v2906_v50  ;;  %v2920_v53 = vld [vmem:[%s3388_s1 + $0x1c8] sm:$0xff]  }
  0x18   :  { %2029 = vmatpush3.bf16.msra.mxu0 %v2688_v22  ;;  %3438 = vst [vmem:[#allocation20_spill] sm:$0xff] %v2913_v52  ;;  %3439 = vst [vmem:[#allocation21_spill] sm:$0xff] %v2920_v53 }
  0x19   :  { %2051 = vmatpush3.bf16.msra.mxu1 %v2694_v23  ;;  %2030 = vmatprep.subr.bf16.mxu0 %v2700_v24 }
  0x1a   :  { %2052 = vmatprep.subr.bf16.mxu1 %v2706_v25 }
  0x1c   :  { %2031 = vmatpush3.bf16.msra.mxu0 %v2712_v26 }
  0x1d   :  { %2053 = vmatpush3.bf16.msra.mxu1 %v2718_v27  ;;  %2032 = vmatprep.subr.bf16.mxu0 %v2724_v28 }
  0x1e   :  { %2054 = vmatprep.subr.bf16.mxu1 %v2730_v29 }
  0x20   :  { %2033 = vmatpush3.bf16.msra.mxu0 %v2736_v30 }
  0x21   :  { %2055 = vmatpush3.bf16.msra.mxu1 %v2742_v31  ;;  %2062 = vmatprep.subr.bf16.mxu0 %v2769_v40 }
  0x22   :  { %2084 = vmatprep.subr.bf16.mxu1 %v2777_v44 }
  0x23   :  { %822 = vmatmul.mubr.bf16.vlgmr.msra.gmra.mxu0 %v60_v54  ;;  %v2925_v54 = vld [vmem:[%s3388_s1 + $0x108] sm:$0xff]  }
  0x24   :  { %862 = vmatmul.mubr.bf16.vlgmr.msra.gmra.mxu1 %v62_v56  ;;  %2063 = vmatpush3.bf16.msra.mxu0 %v2785_v49  ;;  %3440 = vst [vmem:[#allocation22_spill] sm:$0xff] %v2925_v54  ;;  %v2930_v56 = vld [vmem:[%s3388_s1 + $0x188] sm:$0xff]  }
  0x25   :  { %2085 = vmatpush3.bf16.msra.mxu1 %v2790_v51  ;;  %2064 = vmatprep.subr.bf16.mxu0 %v2795_v55  ;;  %3441 = vst [vmem:[#allocation23_spill] sm:$0xff] %v2930_v56 }
  0x26   :  { %2086 = vmatprep.subr.bf16.mxu1 %v2800_v57 }
  0x28   :  { %2065 = vmatpush3.bf16.msra.mxu0 %v2805_v58 }
  0x29   :  { %2087 = vmatpush3.bf16.msra.mxu1 %v2810_v59  ;;  %2066 = vmatprep.subr.bf16.mxu0 %v2817_v60  ;;  %v2972_v59 = vld [vmem:[%s3388_s1 + $0x180] sm:$0xff]  }
  0x2a   :  { %2088 = vmatprep.subr.bf16.mxu1 %v2824_v61  ;;  %v30_v61 = vld [vmem:[%s3389_s0 + $0x30] sm:$0xff] }
  0x2b   :  { %v2976_v51 = vpack.c.bf16 %v30_v61, %v30_v61 }
  0x2c   :  { %2067 = vmatpush3.bf16.msra.mxu0 %v2829_v62 }
  0x2d   :  { %2089 = vmatpush3.bf16.msra.mxu1 %v2834_v63  ;;  %2068 = vmatprep.subr.bf16.mxu0 %v2841_v32  ;;  %v31_v63 = vld [vmem:[%s3389_s0 + $0x38] sm:$0xff] }
  0x2e   :  { %2090 = vmatprep.subr.bf16.mxu1 %v2848_v33  ;;  %v2974_v57 = vpack.c.bf16 %v31_v63, %v31_v63 }
  0x30   :  { %2069 = vmatpush3.bf16.msra.mxu0 %v2853_v34  ;;  %v49_v31 = vunpack.c.l.bf16 %v2974_v57 }
  0x31   :  { %2091 = vmatpush3.bf16.msra.mxu1 %v2858_v38  ;;  %2070 = vmatprep.subr.bf16.mxu0 %v2865_v41  ;;  %v28_v38 = vld [vmem:[%s3389_s0 + $0x20] sm:$0xff] }
  0x32   :  { %2092 = vmatprep.subr.bf16.mxu1 %v2872_v42  ;;  %v2949_v42 = vld [vmem:[%s3388_s1 + $0x100] sm:$0xff]   ;;  %v58_v27 = vsub.f32 %v31_v63, %v49_v31  ;;  %v3463_v31 = vld [vmem:[#allocation17_spill] sm:$0xff] }
  0x33   :  { %v2446_v63 = vld [vmem:[%s3390_s2 + $0xb8] sm:$0xff]  }
  0x34   :  { %2071 = vmatpush3.bf16.msra.mxu0 %v2877_v43 }
  0x35   :  { %2093 = vmatpush3.bf16.msra.mxu1 %v2882_v45  ;;  %2072 = vmatprep.subr.bf16.mxu0 %v2889_v46  ;;  %v2944_v45 = vld [vmem:[%s3388_s1 + $0x1c0] sm:$0xff]  }
  0x36   :  { %2094 = vmatprep.subr.bf16.mxu1 %v2896_v47  ;;  %v2937_v47 = vld [vmem:[%s3388_s1 + $0x140] sm:$0xff]   ;;  %3443 = vst [vmem:[#allocation25_spill] sm:$0xff] %v2944_v45 }
  0x37   :  { %3442 = vst [vmem:[#allocation24_spill] sm:$0xff] %v2937_v47 }
  0x38   :  { %2073 = vmatpush3.bf16.msra.mxu0 %v2901_v48  ;;  %v2517_v48 = vmov 0.0  }
  0x39   :  { %2095 = vmatpush3.bf16.msra.mxu1 %v2906_v50  ;;  %2074 = vmatprep.subr.bf16.mxu0 %v2913_v52  ;;  %v29_v50 = vld [vmem:[%s3389_s0 + $0x28] sm:$0xff] }
  0x3a   :  { %2096 = vmatprep.subr.bf16.mxu1 %v2920_v53  ;;  %v2957_v33 = vpack.c.bf16 %v29_v50, %v29_v50  ;;  %v2959_v53 = vpack.c.bf16 %v28_v38, %v28_v38 }
  0x3c   :  { %2075 = vmatpush3.bf16.msra.mxu0 %v2925_v54  ;;  %v47_v39 = vunpack.c.l.bf16 %v2957_v33  ;;  %v46_v44 = vunpack.c.l.bf16 %v2959_v53 }
  0x3d   :  { %2097 = vmatpush3.bf16.msra.mxu1 %v2930_v56  ;;  %2076 = vmatprep.subr.bf16.mxu0 %v2937_v47  ;;  %v48_v56 = vunpack.c.l.bf16 %v2976_v51 }
  0x3e   :  { %2098 = vmatprep.subr.bf16.mxu1 %v2944_v45  ;;  %v56_v29 = vsub.f32 %v29_v50, %v47_v39  ;;  %v55_v54 = vsub.f32 %v28_v38, %v46_v44  ;;  %v2991_v45 = vld [vmem:[%s3388_s1 + $0x238] sm:$0xff]   ;;  %v67_v39 = vpack.c.bf16 %v58_v27, %v58_v27  ;;  %v3460_v27 = vld [vmem:[#allocation14_spill] sm:$0xff]  ;;  %v2450_v38 = vld [vmem:[%s3390_s2 + $0xb0] sm:$0xff]  }
  0x3f   :  { %v57_v52 = vsub.f32 %v30_v61, %v48_v56  ;;  %v2444_v61 = vld [vmem:[%s3390_s2 + $0xf8] sm:$0xff]  }
  0x40   :  { %2077 = vmatpush3.bf16.msra.mxu0 %v2949_v42  ;;  %v65_v25 = vpack.c.bf16 %v56_v29, %v56_v29  ;;  %v64_v47 = vpack.c.bf16 %v55_v54, %v55_v54  ;;  %941 = vmatprep.mubr.bf16.mxu1 %v67_v39  ;;  %v2997_v29 = vld [vmem:[%s3388_s1 + $0x230] sm:$0xff]   ;;  %v2459_v50 = vld [vmem:[%s3390_s2 + $0x58] sm:$0xff]  }
  0x41   :  { %2099 = vmatpush3.bf16.msra.mxu1 %v2972_v59  ;;  %2309 = vmatprep.subr.bf16.mxu0 %v2517_v48  ;;  %v66_v44 = vpack.c.bf16 %v57_v52, %v57_v52  ;;  %v2460_v52 = vld [vmem:[%s3390_s2 + $0xd8] sm:$0xff]   ;;  %v2463_v39 = vld [vmem:[%s3390_s2 + $0x50] sm:$0xff]  }
  0x42   :  { %2115 = vmatprep.subr.bf16.mxu1 %v2557_v0  ;;  %901 = vmatprep.mubr.bf16.mxu0 %v65_v25  ;;  %v3009_v0 = vld [vmem:[%s3388_s1 + $0x228] sm:$0xff]   ;;  %v3458_v25 = vld [vmem:[#allocation12_spill] sm:$0xff]  ;;  %v2461_v54 = vld [vmem:[%s3390_s2 + $0x18] sm:$0xff]  }
  0x43   :  { %902 = vmatmul.mubr.bf16.vlgmr.msra.gmra.mxu0 %v64_v47  ;;  %v2458_v47 = vld [vmem:[%s3390_s2 + $0xa0] sm:$0xff]   ;;  %v2462_v56 = vld [vmem:[%s3390_s2 + $0x98] sm:$0xff]  }
  0x44   :  { %942 = vmatmul.mubr.bf16.vlgmr.msra.gmra.mxu1 %v66_v44  ;;  %2310 = vmatpush3.bf16.msra.mxu0 %v2991_v45  ;;  %v2464_v44 = vld [vmem:[%s3390_s2 + $0xd0] sm:$0xff]  }
  0x45   :  { %2116 = vmatpush3.bf16.msra.mxu1 %v2568_v2  ;;  %2311 = vmatprep.subr.bf16.mxu0 %v2517_v48  ;;  %v3018_v2 = vld [vmem:[%s3388_s1 + $0x220] sm:$0xff]  }
  0x46   :  { %2117 = vmatprep.subr.bf16.mxu1 %v2580_v4  ;;  %2325 = vmatprep.mubr.msk.bf16.mxu0 %vm2518_vm0, %v2517_v48  ;;  %v3026_v4 = vld [vmem:[%s3388_s1 + $0x218] sm:$0xff]  }
  0x47   :  { %1021 = vmatprep.mubr.bf16.mxu1 %v2755_v35 }
  0x48   :  { %2312 = vmatpush3.bf16.msra.mxu0 %v2997_v29 }
  0x49   :  { %2118 = vmatpush3.bf16.msra.mxu1 %v2592_v6  ;;  %2313 = vmatprep.subr.bf16.mxu0 %v2517_v48  ;;  %v32_v6 = vld [vmem:[%s3389_s0 + $0x40] sm:$0xff] }
  0x4a   :  { %2119 = vmatprep.subr.bf16.mxu1 %v2604_v8  ;;  %v3035_v8 = vpack.c.bf16 %v32_v6, %v32_v6 }
  0x4c   :  { %2314 = vmatpush3.bf16.msra.mxu0 %v3009_v0 }
  0x4d   :  { %2120 = vmatpush3.bf16.msra.mxu1 %v2616_v10  ;;  %2315 = vmatprep.subr.bf16.mxu0 %v2517_v48  ;;  %v3041_v10 = vld [vmem:[%s3388_s1 + $0x210] sm:$0xff]  }
  0x4e   :  { %2121 = vmatprep.subr.bf16.mxu1 %v2628_v12  ;;  %v50_v12 = vunpack.c.l.bf16 %v3035_v8 }
  0x50   :  { %2316 = vmatpush3.bf16.msra.mxu0 %v3018_v2 }
  0x51   :  { %2122 = vmatpush3.bf16.msra.mxu1 %v2640_v14  ;;  %2317 = vmatprep.subr.bf16.mxu0 %v2517_v48  ;;  %v3051_v14 = vld [vmem:[%s3388_s1 + $0x208] sm:$0xff]  }
  0x52   :  { %2123 = vmatprep.subr.bf16.mxu1 %v2652_v16  ;;  %v59_v16 = vsub.f32 %v32_v6, %v50_v12  ;;  %v2469_v6 = vld [vmem:[%s3390_s2 + $0x8] sm:$0xff]   ;;  %v2471_v12 = vld [vmem:[%s3390_s2 + $0x40] sm:$0xff]  }
  0x54   :  { %2318 = vmatpush3.bf16.msra.mxu0 %v3026_v4 }
  0x55   :  { %2124 = vmatpush3.bf16.msra.mxu1 %v2664_v18  ;;  %2319 = vmatprep.subr.bf16.mxu0 %v2517_v48  ;;  %v3060_v18 = vld [vmem:[%s3388_s1 + $0x200] sm:$0xff]  }
  0x56   :  { %2125 = vmatprep.subr.bf16.mxu1 %v2676_v20  ;;  %v68_v20 = vpack.c.bf16 %v59_v16, %v59_v16  ;;  %v2473_v16 = vld [vmem:[%s3390_s2] sm:$0xff]  }
  0x58   :  { %2320 = vmatpush3.bf16.msra.mxu0 %v3041_v10 }
  0x59   :  { %2126 = vmatpush3.bf16.msra.mxu1 %v2688_v22  ;;  %2321 = vmatprep.subr.bf16.mxu0 %v2517_v48  ;;  %v3455_v22 = vld [vmem:[#allocation9_spill] sm:$0xff] }
  0x5a   :  { %2127 = vmatprep.subr.bf16.mxu1 %v2700_v24  ;;  %v3457_v24 = vld [vmem:[#allocation11_spill] sm:$0xff] }
  0x5c   :  { %2322 = vmatpush3.bf16.msra.mxu0 %v3051_v14 }
  0x5d   :  { %2128 = vmatpush3.bf16.msra.mxu1 %v2712_v26  ;;  %2323 = vmatprep.subr.bf16.mxu0 %v2517_v48  ;;  %v3459_v26 = vld [vmem:[#allocation13_spill] sm:$0xff] }
  0x5e   :  { %2129 = vmatprep.subr.bf16.mxu1 %v2724_v28  ;;  %v3461_v28 = vld [vmem:[#allocation15_spill] sm:$0xff] }
  0x60   :  { %2324 = vmatpush3.bf16.msra.mxu0 %v3060_v18 }
  0x61   :  { %2130 = vmatpush3.bf16.msra.mxu1 %v2736_v30  ;;  %2137 = vmatprep.subr.bf16.mxu0 %v2562_v1  ;;  %v3444_v1 = vld [vmem:[#allocation18_spill] sm:$0xff]  ;;  %v3462_v30 = vld [vmem:[#allocation16_spill] sm:$0xff] }
  0x62   :  { %2159 = vmatprep.subr.bf16.mxu1 %v2769_v40  ;;  %v3464_v40 = vld [vmem:[#allocation19_spill] sm:$0xff] }
  0x63   :  { %2326 = vmatmul.mubr.bf16.vlgmr.msra.gmra.mxu0 %v68_v20  ;;  %v2475_v20 = vld [vmem:[%s3390_s2 + $0x178] sm:$0xff]  }
  0x64   :  { %1022 = vmatmul.mubr.bf16.vlgmr.msra.gmra.mxu1 %v2759_v37  ;;  %2138 = vmatpush3.bf16.msra.mxu0 %v2574_v3  ;;  %v3445_v3 = vld [vmem:[#allocation2_spill] sm:$0xff] }
  0x65   :  { %2160 = vmatpush3.bf16.msra.mxu1 %v2785_v49  ;;  %2139 = vmatprep.subr.bf16.mxu0 %v2586_v5  ;;  %v3446_v5 = vld [vmem:[#allocation20_spill] sm:$0xff]  ;;  %v3465_v49 = vld [vmem:[#allocation21_spill] sm:$0xff] }
  0x66   :  { %2161 = vmatprep.subr.bf16.mxu1 %v2795_v55  ;;  %1061 = vmatprep.mubr.bf16.mxu0 %v2757_v36  ;;  %v3466_v55 = vld [vmem:[#allocation23_spill] sm:$0xff] }
  0x67   :  { %1101 = vmatprep.mubr.bf16.mxu1 %v2957_v33 }
  0x68   :  { %2140 = vmatpush3.bf16.msra.mxu0 %v2598_v7  ;;  %v3447_v7 = vld [vmem:[#allocation3_spill] sm:$0xff] }
  0x69   :  { %2162 = vmatpush3.bf16.msra.mxu1 %v2805_v58  ;;  %2141 = vmatprep.subr.bf16.mxu0 %v2610_v9  ;;  %v3448_v9 = vld [vmem:[#allocation22_spill] sm:$0xff]  ;;  %v3467_v58 = vld [vmem:[#allocation25_spill] sm:$0xff] }
  0x6a   :  { %2163 = vmatprep.subr.bf16.mxu1 %v2817_v60  ;;  %v2443_v60 = vld [vmem:[%s3390_s2 + $0x78] sm:$0xff]  }
  0x6c   :  { %2142 = vmatpush3.bf16.msra.mxu0 %v2622_v11  ;;  %v3449_v11 = vld [vmem:[#allocation4_spill] sm:$0xff] }
  0x6d   :  { %2164 = vmatpush3.bf16.msra.mxu1 %v2829_v62  ;;  %2143 = vmatprep.subr.bf16.mxu0 %v2634_v13  ;;  %v3450_v13 = vld [vmem:[#allocation24_spill] sm:$0xff]  ;;  %v2445_v62 = vld [vmem:[%s3390_s2 + $0x38] sm:$0xff]  }
  0x6e   :  { %2165 = vmatprep.subr.bf16.mxu1 %v2841_v32  ;;  %v2447_v32 = vld [vmem:[%s3390_s2 + $0x70] sm:$0xff]  }
  0x70   :  { %2144 = vmatpush3.bf16.msra.mxu0 %v2646_v15  ;;  %v3451_v15 = vld [vmem:[#allocation5_spill] sm:$0xff] }
  0x71   :  { %2166 = vmatpush3.bf16.msra.mxu1 %v2853_v34  ;;  %2145 = vmatprep.subr.bf16.mxu0 %v2658_v17  ;;  %v3452_v17 = vld [vmem:[#allocation7_spill] sm:$0xff]  ;;  %v2449_v34 = vld [vmem:[%s3390_s2 + $0x30] sm:$0xff]  }
  0x72   :  { %2167 = vmatprep.subr.bf16.mxu1 %v2865_v41  ;;  %v2451_v41 = vld [vmem:[%s3390_s2 + $0x68] sm:$0xff]  }
  0x74   :  { %2146 = vmatpush3.bf16.msra.mxu0 %v2670_v19  ;;  %v3453_v19 = vld [vmem:[#allocation6_spill] sm:$0xff] }
  0x75   :  { %2168 = vmatpush3.bf16.msra.mxu1 %v2877_v43  ;;  %2147 = vmatprep.subr.bf16.mxu0 %v2682_v21  ;;  %v3454_v21 = vld [vmem:[#allocation8_spill] sm:$0xff]  ;;  %v2453_v43 = vld [vmem:[%s3390_s2 + $0x28] sm:$0xff]  }
  0x76   :  { %2169 = vmatprep.subr.bf16.mxu1 %v2889_v46  ;;  %v2455_v46 = vld [vmem:[%s3390_s2 + $0x60] sm:$0xff]  }
  0x78   :  { %2148 = vmatpush3.bf16.msra.mxu0 %v2694_v23  ;;  %v3456_v23 = vld [vmem:[#allocation10_spill] sm:$0xff] }
  0x79   :  { %2170 = vmatpush3.bf16.msra.mxu1 %v3444_v1  ;;  %2149 = vmatprep.subr.bf16.mxu0 %v3445_v3  ;;  %v2477_v1 = vld [vmem:[%s3390_s2 + $0x1f8] sm:$0xff]  }
  0x7a   :  { %2171 = vmatprep.subr.bf16.mxu1 %v3446_v5  ;;  %v2476_v3 = vld [vmem:[%s3390_s2 + $0x138] sm:$0xff]  }
  0x7b   :  { %v2478_v5 = vld [vmem:[%s3390_s2 + $0x1b8] sm:$0xff]  }
  0x7c   :  { %2150 = vmatpush3.bf16.msra.mxu0 %v3447_v7  ;;  %v2479_v7 = vld [vmem:[%s3390_s2 + $0x170] sm:$0xff]  }
  0x7d   :  { %2172 = vmatpush3.bf16.msra.mxu1 %v3448_v9  ;;  %2151 = vmatprep.subr.bf16.mxu0 %v3449_v11  ;;  %v2481_v9 = vld [vmem:[%s3390_s2 + $0x1f0] sm:$0xff]  }
  0x7e   :  { %2173 = vmatprep.subr.bf16.mxu1 %v3450_v13  ;;  %v2480_v11 = vld [vmem:[%s3390_s2 + $0x130] sm:$0xff]  }
  0x7f   :  { %v2482_v13 = vld [vmem:[%s3390_s2 + $0x1b0] sm:$0xff]  }
  0x80   :  { %2152 = vmatpush3.bf16.msra.mxu0 %v3451_v15  ;;  %v2483_v15 = vld [vmem:[%s3390_s2 + $0x168] sm:$0xff]  }
  0x81   :  { %2174 = vmatpush3.bf16.msra.mxu1 %v2949_v42  ;;  %2181 = vmatprep.subr.bf16.mxu0 %v3452_v17  ;;  %v2452_v42 = vld [vmem:[%s3390_s2 + $0xe8] sm:$0xff]  }
  0x82   :  { %2329 = vmatprep.subr.bf16.mxu1 %v2517_v48  ;;  %v2484_v17 = vld [vmem:[%s3390_s2 + $0x128] sm:$0xff]  }
  0x83   :  { %1062 = vmatmul.mubr.bf16.vlgmr.msra.gmra.mxu0 %v3453_v19 }
  0x84   :  { %1102 = vmatmul.mubr.bf16.vlgmr.msra.gmra.mxu1 %v2959_v53  ;;  %2182 = vmatpush3.bf16.msra.mxu0 %v3454_v21  ;;  %v2487_v21 = vld [vmem:[%s3390_s2 + $0x160] sm:$0xff]  }
  0x85   :  { %2330 = vmatpush3.bf16.msra.mxu1 %v2991_v45  ;;  %2183 = vmatprep.subr.bf16.mxu0 %v3455_v22  ;;  %v2454_v45 = vld [vmem:[%s3390_s2 + $0xa8] sm:$0xff]   ;;  %v2490_v22 = vld [vmem:[%s3390_s2 + $0x1a0] sm:$0xff]  }
  0x86   :  { %2331 = vmatprep.subr.bf16.mxu1 %v2517_v48  ;;  %1141 = vmatprep.mubr.bf16.mxu0 %v2974_v57 }
  0x87   :  { %2345 = vmatprep.mubr.msk.bf16.mxu1 %vm2518_vm0, %v2517_v48 }
  0x88   :  { %2184 = vmatpush3.bf16.msra.mxu0 %v3456_v23  ;;  %v2491_v23 = vld [vmem:[%s3390_s2 + $0x158] sm:$0xff]  }
  0x89   :  { %2332 = vmatpush3.bf16.msra.mxu1 %v2997_v29  ;;  %2185 = vmatprep.subr.bf16.mxu0 %v3457_v24  ;;  %v2465_v29 = vld [vmem:[%s3390_s2 + $0x10] sm:$0xff]   ;;  %v2493_v24 = vld [vmem:[%s3390_s2 + $0x1d8] sm:$0xff]  }
  0x8a   :  { %2333 = vmatprep.subr.bf16.mxu1 %v2517_v48 }
  0x8c   :  { %2186 = vmatpush3.bf16.msra.mxu0 %v3458_v25  ;;  %v2492_v25 = vld [vmem:[%s3390_s2 + $0x118] sm:$0xff]  }
  0x8d   :  { %2334 = vmatpush3.bf16.msra.mxu1 %v3009_v0  ;;  %2187 = vmatprep.subr.bf16.mxu0 %v3459_v26  ;;  %v2466_v0 = vld [vmem:[%s3390_s2 + $0x90] sm:$0xff]   ;;  %v2494_v26 = vld [vmem:[%s3390_s2 + $0x198] sm:$0xff]  }
  0x8e   :  { %2335 = vmatprep.subr.bf16.mxu1 %v2517_v48 }
  0x90   :  { %2188 = vmatpush3.bf16.msra.mxu0 %v3460_v27  ;;  %v2495_v27 = vld [vmem:[%s3390_s2 + $0x150] sm:$0xff]  }
  0x91   :  { %2336 = vmatpush3.bf16.msra.mxu1 %v3018_v2  ;;  %2189 = vmatprep.subr.bf16.mxu0 %v3461_v28  ;;  %v2467_v2 = vld [vmem:[%s3390_s2 + $0x48] sm:$0xff]   ;;  %v2497_v28 = vld [vmem:[%s3390_s2 + $0x1d0] sm:$0xff]  }
  0x92   :  { %2337 = vmatprep.subr.bf16.mxu1 %v2517_v48 }
  0x94   :  { %2190 = vmatpush3.bf16.msra.mxu0 %v3462_v30  ;;  %v2496_v30 = vld [vmem:[%s3390_s2 + $0x110] sm:$0xff]  }
  0x95   :  { %2338 = vmatpush3.bf16.msra.mxu1 %v3026_v4  ;;  %2191 = vmatprep.subr.bf16.mxu0 %v3463_v31  ;;  %v2468_v4 = vld [vmem:[%s3390_s2 + $0xc8] sm:$0xff]   ;;  %v2498_v31 = vld [vmem:[%s3390_s2 + $0x190] sm:$0xff]  }
  0x96   :  { %2339 = vmatprep.subr.bf16.mxu1 %v2517_v48 }
  0x98   :  { %2192 = vmatpush3.bf16.msra.mxu0 %v3464_v40  ;;  %v2499_v40 = vld [vmem:[%s3390_s2 + $0x148] sm:$0xff]  }
  0x99   :  { %2340 = vmatpush3.bf16.msra.mxu1 %v3041_v10  ;;  %2193 = vmatprep.subr.bf16.mxu0 %v3465_v49  ;;  %v2470_v10 = vld [vmem:[%s3390_s2 + $0x88] sm:$0xff]  }
  0x9a   :  { %2341 = vmatprep.subr.bf16.mxu1 %v2517_v48  ;;  %v2501_v49 = vld [vmem:[%s3390_s2 + $0x1c8] sm:$0xff]  }
  0x9c   :  { %2194 = vmatpush3.bf16.msra.mxu0 %v3466_v55  ;;  %v2500_v55 = vld [vmem:[%s3390_s2 + $0x108] sm:$0xff]  }
  0x9d   :  { %2342 = vmatpush3.bf16.msra.mxu1 %v3051_v14  ;;  %2195 = vmatprep.subr.bf16.mxu0 %v3467_v58  ;;  %v2472_v14 = vld [vmem:[%s3390_s2 + $0xc0] sm:$0xff]   ;;  %v2502_v58 = vld [vmem:[%s3390_s2 + $0x188] sm:$0xff]  }
  0x9e   :  { %2343 = vmatprep.subr.bf16.mxu1 %v2517_v48 }
  0xa0   :  { %2196 = vmatpush3.bf16.msra.mxu0 %v2972_v59  ;;  %v2448_v59 = vld [vmem:[%s3390_s2 + $0xf0] sm:$0xff]  }
  0xa1   :  { %2344 = vmatpush3.bf16.msra.mxu1 %v3060_v18  ;;  %2212 = vmatprep.subr.bf16.mxu0 %v2443_v60  ;;  %v2474_v18 = vld [vmem:[%s3390_s2 + $0x80] sm:$0xff]  }
  0xa2   :  { %2234 = vmatprep.subr.bf16.mxu1 %v2444_v61  ;;  %v2503_v60 = vld [vmem:[%s3390_s2 + $0x140] sm:$0xff]  }
  0xa3   :  { %1142 = vmatmul.mubr.bf16.vlgmr.msra.gmra.mxu0 %v2976_v51  ;;  %v2505_v61 = vld [vmem:[%s3390_s2 + $0x1c0] sm:$0xff]  }
  0xa4   :  { %2346 = vmatmul.mubr.bf16.vlgmr.msra.gmra.mxu1 %v3035_v8  ;;  %2213 = vmatpush3.bf16.msra.mxu0 %v2445_v62  ;;  %v2504_v62 = vld [vmem:[%s3390_s2 + $0x100] sm:$0xff]  }
  0xa5   :  { %2235 = vmatpush3.bf16.msra.mxu1 %v2446_v63  ;;  %2214 = vmatprep.subr.bf16.mxu0 %v2447_v32  ;;  %v2506_v63 = vld [vmem:[%s3390_s2 + $0x180] sm:$0xff]   ;;  %v2507_v32 = vld [vmem:[%s3390_s2 + $0x238] sm:$0xff]  }
  0xa6   :  { %2236 = vmatprep.subr.bf16.mxu1 %v2448_v59  ;;  %1653 = vmatprep.mubr.bf16.mxu0 %v2755_v35  ;;  %v2456_v35 = vld [vmem:[%s3390_s2 + $0xe0] sm:$0xff]  }
  0xa7   :  { %1693 = vmatprep.mubr.bf16.mxu1 %v2757_v36  ;;  %v2457_v36 = vld [vmem:[%s3390_s2 + $0x20] sm:$0xff]  }
  0xa8   :  { %2215 = vmatpush3.bf16.msra.mxu0 %v2449_v34 }
  0xa9   :  { %2237 = vmatpush3.bf16.msra.mxu1 %v2450_v38  ;;  %2216 = vmatprep.subr.bf16.mxu0 %v2451_v41 }
  0xaa   :  { %2238 = vmatprep.subr.bf16.mxu1 %v2452_v42  ;;  %v2508_v42 = vld [vmem:[%s3390_s2 + $0x230] sm:$0xff]  }
  0xac   :  { %2217 = vmatpush3.bf16.msra.mxu0 %v2453_v43 }
  0xad   :  { %2239 = vmatpush3.bf16.msra.mxu1 %v2454_v45  ;;  %2218 = vmatprep.subr.bf16.mxu0 %v2455_v46 }
  0xae   :  { %2240 = vmatprep.subr.bf16.mxu1 %v2456_v35 }
  0xb0   :  { %2219 = vmatpush3.bf16.msra.mxu0 %v2457_v36 }
  0xb1   :  { %2241 = vmatpush3.bf16.msra.mxu1 %v2458_v47  ;;  %2220 = vmatprep.subr.bf16.mxu0 %v2459_v50  ;;  %v2510_v50 = vld [vmem:[%s3390_s2 + $0x220] sm:$0xff]  }
  0xb2   :  { %2242 = vmatprep.subr.bf16.mxu1 %v2460_v52  ;;  %v2511_v52 = vld [vmem:[%s3390_s2 + $0x218] sm:$0xff]  }
  0xb4   :  { %2221 = vmatpush3.bf16.msra.mxu0 %v2461_v54  ;;  %v2512_v54 = vld [vmem:[%s3390_s2 + $0x210] sm:$0xff]  }
  0xb5   :  { %2243 = vmatpush3.bf16.msra.mxu1 %v2462_v56  ;;  %2222 = vmatprep.subr.bf16.mxu0 %v2463_v39  ;;  %v2513_v56 = vld [vmem:[%s3390_s2 + $0x208] sm:$0xff]   ;;  %v2514_v39 = vld [vmem:[%s3390_s2 + $0x200] sm:$0xff]  }
  0xb6   :  { %2244 = vmatprep.subr.bf16.mxu1 %v2464_v44 }
  0xb8   :  { %2223 = vmatpush3.bf16.msra.mxu0 %v2465_v29 }
  0xb9   :  { %2245 = vmatpush3.bf16.msra.mxu1 %v2466_v0  ;;  %2224 = vmatprep.subr.bf16.mxu0 %v2467_v2 }
  0xba   :  { %2246 = vmatprep.subr.bf16.mxu1 %v2468_v4 }
  0xbc   :  { %2225 = vmatpush3.bf16.msra.mxu0 %v2469_v6 }
  0xbd   :  { %2247 = vmatpush3.bf16.msra.mxu1 %v2470_v10  ;;  %2226 = vmatprep.subr.bf16.mxu0 %v2471_v12 }
  0xbe   :  { %2248 = vmatprep.subr.bf16.mxu1 %v2472_v14 }
  0xc0   :  { %2227 = vmatpush3.bf16.msra.mxu0 %v2473_v16 }
  0xc1   :  { %2249 = vmatpush3.bf16.msra.mxu1 %v2474_v18  ;;  %2256 = vmatprep.subr.bf16.mxu0 %v2475_v20 }
  0xc2   :  { %2278 = vmatprep.subr.bf16.mxu1 %v2477_v1 }
  0xc3   :  { %1654 = vmatmul.mubr.bf16.vlgmr.msra.gmra.mxu0 %v2759_v37  ;;  %v2485_v37 = vld [vmem:[%s3390_s2 + $0x1e8] sm:$0xff]  }
  0xc4   :  { %1694 = vmatmul.mubr.bf16.vlgmr.msra.gmra.mxu1 %v3453_v19  ;;  %2257 = vmatpush3.bf16.msra.mxu0 %v2476_v3  ;;  %v2486_v19 = vld [vmem:[%s3390_s2 + $0x1a8] sm:$0xff]  }
  0xc5   :  { %2279 = vmatpush3.bf16.msra.mxu1 %v2478_v5  ;;  %2258 = vmatprep.subr.bf16.mxu0 %v2479_v7 }
  0xc6   :  { %2280 = vmatprep.subr.bf16.mxu1 %v2481_v9  ;;  %1733 = vmatprep.mubr.bf16.mxu0 %v2957_v33  ;;  %v2488_v33 = vld [vmem:[%s3390_s2 + $0x120] sm:$0xff]  }
  0xc7   :  { %1773 = vmatprep.mubr.bf16.mxu1 %v2974_v57  ;;  %v2489_v57 = vld [vmem:[%s3390_s2 + $0x1e0] sm:$0xff]  }
  0xc8   :  { %2259 = vmatpush3.bf16.msra.mxu0 %v2480_v11 }
  0xc9   :  { %2281 = vmatpush3.bf16.msra.mxu1 %v2482_v13  ;;  %2260 = vmatprep.subr.bf16.mxu0 %v2483_v15 }
  0xca   :  { %2282 = vmatprep.subr.bf16.mxu1 %v2485_v37 }
  0xcc   :  { %2261 = vmatpush3.bf16.msra.mxu0 %v2484_v17 }
  0xcd   :  { %2283 = vmatpush3.bf16.msra.mxu1 %v2486_v19  ;;  %2262 = vmatprep.subr.bf16.mxu0 %v2487_v21 }
  0xce   :  { %2284 = vmatprep.subr.bf16.mxu1 %v2489_v57 }
  0xd0   :  { %2263 = vmatpush3.bf16.msra.mxu0 %v2488_v33 }
  0xd1   :  { %2285 = vmatpush3.bf16.msra.mxu1 %v2490_v22  ;;  %2264 = vmatprep.subr.bf16.mxu0 %v2491_v23 }
  0xd2   :  { %2286 = vmatprep.subr.bf16.mxu1 %v2493_v24 }
  0xd4   :  { %2265 = vmatpush3.bf16.msra.mxu0 %v2492_v25 }
  0xd5   :  { %2287 = vmatpush3.bf16.msra.mxu1 %v2494_v26  ;;  %2266 = vmatprep.subr.bf16.mxu0 %v2495_v27 }
  0xd6   :  { %2288 = vmatprep.subr.bf16.mxu1 %v2497_v28 }
  0xd8   :  { %2267 = vmatpush3.bf16.msra.mxu0 %v2496_v30 }
  0xd9   :  { %2289 = vmatpush3.bf16.msra.mxu1 %v2498_v31  ;;  %2268 = vmatprep.subr.bf16.mxu0 %v2499_v40 }
  0xda   :  { %2290 = vmatprep.subr.bf16.mxu1 %v2501_v49 }
  0xdc   :  { %2269 = vmatpush3.bf16.msra.mxu0 %v2500_v55 }
  0xdd   :  { %2291 = vmatpush3.bf16.msra.mxu1 %v2502_v58  ;;  %2270 = vmatprep.subr.bf16.mxu0 %v2503_v60 }
  0xde   :  { %2292 = vmatprep.subr.bf16.mxu1 %v2505_v61 }
  0xe0   :  { %2271 = vmatpush3.bf16.msra.mxu0 %v2504_v62 }
  0xe1   :  { %2293 = vmatpush3.bf16.msra.mxu1 %v2506_v63  ;;  %2349 = vmatprep.subr.bf16.mxu0 %v2517_v48 }
  0xe3   :  { %v2034_v59 = vpop.f32.mrf.mxu0  ;;  %1734 = vmatmul.mubr.bf16.vlgmr.msra.gmra.mxu0 %v2959_v53 }
  0xe4   :  { %v2056_v34 = vpop.f32.mrf.mxu1  ;;  %2350 = vmatpush3.bf16.msra.mxu0 %v2507_v32  ;;  %1774 = vmatmul.mubr.bf16.vlgmr.msra.gmra.mxu1 %v2976_v51  ;;  %v2509_v51 = vld [vmem:[%s3390_s2 + $0x228] sm:$0xff]  }
  0xe5   :  { %v2035_v38 = vpop.f32.mrf.mxu0  ;;  %2351 = vmatprep.subr.bf16.mxu0 %v2517_v48  ;;  %2365 = vmatprep.mubr.msk.bf16.mxu0 %vm2518_vm0, %v2517_v48 }
  0xe6   :  { %v2057_v41 = vpop.f32.mrf.mxu1  ;;  %v2036_v43 = vadd.f32 %v2035_v38, %v2034_v59 }
  0xe7   :  { %v2058_v45 = vadd.f32 %v2057_v41, %v2056_v34  ;;  %v2037_v46 = vpop.f32.mrf.mxu0 }
  0xe8   :  { %v2059_v35 = vpop.f32.mrf.mxu1  ;;  %2352 = vmatpush3.bf16.msra.mxu0 %v2508_v42 }
  0xe9   :  { %v864_v36 = vadd.f32 %v2058_v45, %v2036_v43  ;;  %v2038_v53 = vpop.f32.mrf.mxu0  ;;  %2353 = vmatprep.subr.bf16.mxu0 %v2517_v48 }
  0xea   :  { %v2060_v47 = vpop.f32.mrf.mxu1 }
  0xec   :  { %2354 = vmatpush3.bf16.msra.mxu0 %v2509_v51 }
  0xed   :  { %2355 = vmatprep.subr.bf16.mxu0 %v2517_v48 }
  0xf0   :  { %2356 = vmatpush3.bf16.msra.mxu0 %v2510_v50 }
  0xf1   :  { %2357 = vmatprep.subr.bf16.mxu0 %v2517_v48 }
  0xf4   :  { %2358 = vmatpush3.bf16.msra.mxu0 %v2511_v52 }
  0xf5   :  { %2359 = vmatprep.subr.bf16.mxu0 %v2517_v48 }
  0xf8   :  { %2360 = vmatpush3.bf16.msra.mxu0 %v2512_v54 }
  0xf9   :  { %2361 = vmatprep.subr.bf16.mxu0 %v2517_v48 }
  0xfc   :  { %2362 = vmatpush3.bf16.msra.mxu0 %v2513_v56 }
  0xfd   :  { %2363 = vmatprep.subr.bf16.mxu0 %v2517_v48 }
 0x100   :  { %2364 = vmatpush3.bf16.msra.mxu0 %v2514_v39 }
 0x103   :  { %v2078_v44 = vpop.f32.mrf.mxu0  ;;  %2366 = vmatmul.mubr.bf16.vlgmr.msra.gmra.mxu0 %v3035_v8 }
 0x104   :  { %v2100_v29 = vpop.f32.mrf.mxu1 }
 0x105   :  { %v2079_v0 = vpop.f32.mrf.mxu0 }
 0x106   :  { %v2080_v2 = vadd.f32 %v2079_v0, %v2078_v44  ;;  %v2101_v4 = vpop.f32.mrf.mxu1 }
 0x107   :  { %v2081_v6 = vpop.f32.mrf.mxu0  ;;  %v2102_v10 = vadd.f32 %v2101_v4, %v2100_v29 }
 0x108   :  { %v904_v12 = vadd.f32 %v2080_v2, %v864_v36  ;;  %v2103_v14 = vpop.f32.mrf.mxu1 }
 0x109   :  { %v2082_v16 = vpop.f32.mrf.mxu0 }
 0x10a   :  { %v2104_v18 = vpop.f32.mrf.mxu1  ;;  %v944_v20 = vadd.f32 %v2102_v10, %v904_v12  ;;  %v2015_v12 = vld [vmem:[%s3391_s3] ss:$0 sm:$0xff] }
 0x123   :  { %v983_v1 = vpop.f32.mrf.mxu0 }
 0x124   :  { %v984_v3 = vadd.f32 %v983_v1, %v944_v20  ;;  %v2131_v5 = vpop.f32.mrf.mxu1 }
 0x125   :  { %v2327_v7 = vpop.f32.mrf.mxu0 }
 0x126   :  { %v2132_v48 = vpop.f32.mrf.mxu1 }
 0x127   :  { %v2133_v9 = vadd.f32 %v2132_v48, %v2131_v5  ;;  %v986_v11 = vpop.f32.mrf.mxu0 }
 0x128   :  { %v2134_v13 = vpop.f32.mrf.mxu1 }
 0x129   :  { %v1024_v8 = vadd.f32 %v2133_v9, %v984_v3  ;;  %v2328_v15 = vpop.f32.mrf.mxu0 }
 0x12a   :  { %v2135_v37 = vpop.f32.mrf.mxu1 }
 0x143   :  { %v2153_v17 = vpop.f32.mrf.mxu0 }
 0x144   :  { %v2175_v19 = vpop.f32.mrf.mxu1 }
 0x145   :  { %v2154_v21 = vpop.f32.mrf.mxu0 }
 0x146   :  { %v2155_v57 = vadd.f32 %v2154_v21, %v2153_v17  ;;  %v2176_v33 = vpop.f32.mrf.mxu1 }
 0x147   :  { %v2156_v22 = vpop.f32.mrf.mxu0  ;;  %v2177_v23 = vadd.f32 %v2176_v33, %v2175_v19 }
 0x148   :  { %v1064_v24 = vadd.f32 %v2155_v57, %v1024_v8  ;;  %v2178_v25 = vpop.f32.mrf.mxu1 }
 0x149   :  { %v2157_v26 = vpop.f32.mrf.mxu0 }
 0x14a   :  { %v1104_v27 = vadd.f32 %v2177_v23, %v1064_v24  ;;  %v2179_v28 = vpop.f32.mrf.mxu1  ;;  %v2016_v26 = vld [vmem:[%s3392_s4] ss:$0 sm:$0xff] }
 0x14b   :  { %v2017_v28 = vld [vmem:[%s3393_s5] ss:$0 sm:$0xff] }
 0x163   :  { %v2197_v30 = vpop.f32.mrf.mxu0 }
 0x164   :  { %v1183_v31 = vpop.f32.mrf.mxu1 }
 0x165   :  { %v2198_v40 = vpop.f32.mrf.mxu0 }
 0x166   :  { %v2199_v49 = vadd.f32 %v2198_v40, %v2197_v30  ;;  %v2347_v55 = vpop.f32.mrf.mxu1 }
 0x167   :  { %v2200_v58 = vpop.f32.mrf.mxu0 }
 0x168   :  { %v1144_v60 = vadd.f32 %v2199_v49, %v1104_v27  ;;  %v1186_v61 = vpop.f32.mrf.mxu1 }
 0x169   :  { %v2201_v62 = vpop.f32.mrf.mxu0 }
 0x16a   :  { %v1184_v63 = vadd.f32 %v1183_v31, %v1144_v60  ;;  %v2348_v32 = vpop.f32.mrf.mxu1 }
 0x183   :  { %v2228_v59 = vpop.f32.mrf.mxu0 }
 0x184   :  { %v2250_v34 = vpop.f32.mrf.mxu1 }
 0x185   :  { %v2229_v38 = vpop.f32.mrf.mxu0 }
 0x186   :  { %v2251_v41 = vpop.f32.mrf.mxu1  ;;  %v2230_v56 = vadd.f32 %v2229_v38, %v2228_v59 }
 0x187   :  { %v2231_v42 = vpop.f32.mrf.mxu0  ;;  %v2252_v39 = vadd.f32 %v2251_v41, %v2250_v34 }
 0x188   :  { %v2253_v43 = vpop.f32.mrf.mxu1 }
 0x189   :  { %v2232_v45 = vpop.f32.mrf.mxu0  ;;  %v1696_v29 = vadd.f32 %v2252_v39, %v2230_v56 }
 0x18a   :  { %v2254_v46 = vpop.f32.mrf.mxu1 }
 0x1a3   :  { %v2272_v35 = vpop.f32.mrf.mxu0 }
 0x1a4   :  { %v2294_v36 = vpop.f32.mrf.mxu1 }
 0x1a5   :  { %v2273_v53 = vpop.f32.mrf.mxu0 }
 0x1a6   :  { %v2295_v51 = vpop.f32.mrf.mxu1  ;;  %v2274_v44 = vadd.f32 %v2273_v53, %v2272_v35 }
 0x1a7   :  { %v2275_v47 = vpop.f32.mrf.mxu0  ;;  %v2296_v2 = vadd.f32 %v2295_v51, %v2294_v36 }
 0x1a8   :  { %v2297_v50 = vpop.f32.mrf.mxu1  ;;  %v1736_v0 = vadd.f32 %v2274_v44, %v1696_v29 }
 0x1a9   :  { %v2276_v52 = vpop.f32.mrf.mxu0 }
 0x1aa   :  { %v2298_v54 = vpop.f32.mrf.mxu1  ;;  %v1776_v4 = vadd.f32 %v2296_v2, %v1736_v0 }
 0x1c3   :  { %v1815_v6 = vpop.f32.mrf.mxu0 }
 0x1c4   :  { %v1816_v10 = vadd.f32 %v1815_v6, %v1776_v4 }
 0x1c5   :  { %v2367_v14 = vpop.f32.mrf.mxu0 }
 0x1c6   :  { %v1821_v16 = vadd.f32 %v1816_v10, %v1184_v63 }
 0x1c7   :  { %v1818_v18 = vpop.f32.mrf.mxu0 }
 0x1c8   :  { %v1829_v20 = vadd.f32 %v2015_v12, %v1821_v16 }
 0x1c9   :  { %v2368_v1 = vpop.f32.mrf.mxu0 }
 0x1ca   :  { %v1830_v3 = vmax.f32 %v1829_v20, 0.0 }
 0x1cc   :  { %v1831_v5 = vrot.slane %v1830_v3, 4 }
 0x1ce   :  { %v1832_v7 = vadd.f32 %v1831_v5, %v1830_v3 }
 0x1d0   :  { %v1833_v48 = vrot.slane %v1832_v7, 2 }
 0x1d2   :  { %v1834_v9 = vadd.f32 %v1833_v48, %v1832_v7 }
 0x1d4   :  { %v1835_v11 = vrot.slane %v1834_v9, 1 }
 0x1d6   :  { %v1836_v13 = vadd.f32 %v1835_v11, %v1834_v9 }
 0x1d8   :  { %v1837_v8 = vmul.f32 0.125, %v1836_v13 }
 0x1da   :  { %v1838_v15 = vsub.f32 %v1830_v3, %v1837_v8 }
 0x1dc   :  { %v1839_v37 = vmul.f32 %v1838_v15, %v1838_v15 }
 0x1de   :  { %v1840_v17 = vrot.slane %v1839_v37, 4 }
 0x1e0   :  { %v1841_v19 = vadd.f32 %v1840_v17, %v1839_v37 }
 0x1e2   :  { %v1842_v21 = vrot.slane %v1841_v19, 2 }
 0x1e4   :  { %v1843_v57 = vadd.f32 %v1842_v21, %v1841_v19 }
 0x1e6   :  { %v1844_v33 = vrot.slane %v1843_v57, 1 }
 0x1e8   :  { %v1845_v22 = vadd.f32 %v1844_v33, %v1843_v57 }
 0x1ea   :  { %v1846_v23 = vmul.f32 0.125, %v1845_v22 }
 0x1ec   :  { %v1847_v24 = vadd.f32 1e-05, %v1846_v23 }
 0x1ee   :  { %2515 = vrsqrt.f32 %v1847_v24 }
 0x1fb   :  { %v2516_v25 = vpop.eup %2515 }
 0x1fc   :  { %v1849_v27 = vmul.f32 %v2516_v25, %v1838_v15 }
 0x1fe   :  { %v1857_v30 = vmul.f32 %v2016_v26, %v1849_v27 }
 0x200   :  { %v1865_v31 = vadd.f32 %v2017_v28, %v1857_v30 }
 0x202   :  { %1866 = vst [vmem:[%s3394_s6] sm:$0xff] %v1865_v31 }

// kernel: film_layer_forward.8
= control target key start
LH: loop header
LB: loop body
LE: loop exit
PB: predicated region body
PF: predicated region fallthrough
CT: control target
= control target key end

     0   :  { %v2670_v22 = vmov 1983009808   ;;  %v34_v24 = vlaneseq  ;;  %vm2672_vm0 = vmmov 0   ;;  %vm1978_vm1 = vcmask 1041408   ;;  %s3545_s1 = inlined_call_operand.vmem [shape: bf16[1152,128], index: 1, kind: input, shape index: {}]   ;;  %s3546_s0 = inlined_call_operand.vmem [shape: f32[2,1152], index: 0, kind: input, shape index: {}]   ;;  %s3547_s2 = inlined_call_operand.vmem [shape: bf16[1152,128], index: 2, kind: input, shape index: {}]   ;;  %s3548_s3 = inlined_call_operand.vmem [shape: f32[1,128], index: 3, kind: input, shape index: {}]   ;;  %s3549_s4 = inlined_call_operand.vmem [shape: f32[1,128], index: 4, kind: input, shape index: {}]   ;;  %s3550_s5 = inlined_call_operand.vmem [shape: f32[1,128], index: 5, kind: input, shape index: {}]   ;;  %s3551_s6 = inlined_call_operand.vmem [shape: f32[2,128], index: 6, kind: output, shape index: {}]  }
   0x1   :  { %v2711_v0 = vld [vmem:[%s3545_s1 + $0x78] sm:$0xff]   ;;  %v2734_v4 = vld [vmem:[%s3545_s1 + $0x70] sm:$0xff]   ;;  %v2758_v8 = vld [vmem:[%s3545_s1 + $0x68] sm:$0xff]   ;;  %v32_v23 = vunpack.c.l.s4 %v2670_v22 }
   0x2   :  { %v2716_v1 = vld [vmem:[%s3545_s1 + $0xf8] sm:$0xff]   ;;  %2168 = vmatprep.subr.bf16.mxu0 %v2711_v0  ;;  %v2740_v5 = vld [vmem:[%s3545_s1 + $0xf0] sm:$0xff]   ;;  %v2764_v9 = vld [vmem:[%s3545_s1 + $0xe8] sm:$0xff]   ;;  %v35_v30 = vshrl.u32 %v34_v24, 7 }
   0x3   :  { %v2722_v2 = vld [vmem:[%s3545_s1 + $0x38] sm:$0xff]   ;;  %2190 = vmatprep.subr.bf16.mxu1 %v2716_v1  ;;  %v2746_v6 = vld [vmem:[%s3545_s1 + $0x30] sm:$0xff]   ;;  %v2770_v10 = vld [vmem:[%s3545_s1 + $0x28] sm:$0xff]   ;;  %v33_v29 = vunpack.c.0.s8 %v32_v23 }
   0x4   :  { %v2728_v3 = vld [vmem:[%s3545_s1 + $0xb8] sm:$0xff]   ;;  %2169 = vmatpush3.bf16.msra.mxu0 %v2722_v2  ;;  %v2752_v7 = vld [vmem:[%s3545_s1 + $0xb0] sm:$0xff]   ;;  %v2776_v11 = vld [vmem:[%s3545_s1 + $0xa8] sm:$0xff]  }
   0x5   :  { %2191 = vmatpush3.bf16.msra.mxu1 %v2728_v3  ;;  %2170 = vmatprep.subr.bf16.mxu0 %v2734_v4  ;;  %v2782_v12 = vld [vmem:[%s3545_s1 + $0x60] sm:$0xff]   ;;  %v2806_v16 = vld [vmem:[%s3545_s1 + $0x58] sm:$0xff]   ;;  %v2830_v20 = vld [vmem:[%s3545_s1 + $0x50] sm:$0xff]   ;;  %v2886_v35 = vsub.s32 %v33_v29, %v35_v30 }
   0x6   :  { %2192 = vmatprep.subr.bf16.mxu1 %v2740_v5  ;;  %v2788_v13 = vld [vmem:[%s3545_s1 + $0xe0] sm:$0xff]   ;;  %v2812_v17 = vld [vmem:[%s3545_s1 + $0xd8] sm:$0xff]   ;;  %v2836_v21 = vld [vmem:[%s3545_s1 + $0xd0] sm:$0xff]  }
   0x7   :  { %v2794_v14 = vld [vmem:[%s3545_s1 + $0x20] sm:$0xff]   ;;  %v2818_v18 = vld [vmem:[%s3545_s1 + $0x18] sm:$0xff]   ;;  %v2842_v25 = vld [vmem:[%s3545_s1 + $0x10] sm:$0xff]  }
   0x8   :  { %2171 = vmatpush3.bf16.msra.mxu0 %v2746_v6  ;;  %v2800_v15 = vld [vmem:[%s3545_s1 + $0xa0] sm:$0xff]   ;;  %v2824_v19 = vld [vmem:[%s3545_s1 + $0x98] sm:$0xff]   ;;  %v2848_v26 = vld [vmem:[%s3545_s1 + $0x90] sm:$0xff]  }
   0x9   :  { %2193 = vmatpush3.bf16.msra.mxu1 %v2752_v7  ;;  %2172 = vmatprep.subr.bf16.mxu0 %v2758_v8  ;;  %v2854_v27 = vld [vmem:[%s3545_s1 + $0x48] sm:$0xff]   ;;  %v2878_v33 = vld [vmem:[%s3545_s1 + $0x40] sm:$0xff]   ;;  %v2909_v41 = vld [vmem:[%s3545_s1 + $0x178] sm:$0xff]  }
   0xa   :  { %2194 = vmatprep.subr.bf16.mxu1 %v2764_v9  ;;  %v2860_v28 = vld [vmem:[%s3545_s1 + $0xc8] sm:$0xff]   ;;  %v2884_v34 = vld [vmem:[%s3545_s1 + $0xc0] sm:$0xff]   ;;  %v2914_v42 = vld [vmem:[%s3545_s1 + $0x1f8] sm:$0xff]  }
   0xb   :  { %v2866_v31 = vld [vmem:[%s3545_s1 + $0x8] sm:$0xff]   ;;  %v2892_v36 = vld [vmem:[%s3545_s1] sm:$0xff]   ;;  %3579 = vst [vmem:[#allocation3_spill] sm:$0xff] %v2914_v42  ;;  %v2938_v29 = vld [vmem:[%s3545_s1 + $0x138] sm:$0xff]  }
   0xc   :  { %2173 = vmatpush3.bf16.msra.mxu0 %v2770_v10  ;;  %v2872_v32 = vld [vmem:[%s3545_s1 + $0x88] sm:$0xff]   ;;  %v2898_v37 = vld [vmem:[%s3545_s1 + $0x80] sm:$0xff]  }
   0xd   :  { %2195 = vmatpush3.bf16.msra.mxu1 %v2776_v11  ;;  %2174 = vmatprep.subr.bf16.mxu0 %v2782_v12  ;;  %3578 = vst [vmem:[#allocation2_spill] sm:$0xff] %v2898_v37  ;;  %v24_v38 = vld [vmem:[%s3546_s0] sm:$0xff] }
   0xe   :  { %2196 = vmatprep.subr.bf16.mxu1 %v2788_v13  ;;  %v30_v39 = vcombine.high %v24_v38, %v24_v38  ;;  %v37_v40 = vrot.slane %v24_v38, %v2886_v35 }
  0x10   :  { %2175 = vmatpush3.bf16.msra.mxu0 %v2794_v14  ;;  %v44_v43 = vrot.slane %v30_v39, %v2886_v35  ;;  %v45_v44 = vcombine.high %v37_v40, %v37_v40  ;;  %v2917_v45 = vpack.c.bf16 %v37_v40, %v37_v40  ;;  %v2943_v39 = vld [vmem:[%s3545_s1 + $0x170] sm:$0xff]   ;;  %v2948_v40 = vld [vmem:[%s3545_s1 + $0x1b8] sm:$0xff]  }
  0x11   :  { %2197 = vmatpush3.bf16.msra.mxu1 %v2800_v15  ;;  %2176 = vmatprep.subr.bf16.mxu0 %v2806_v16  ;;  %3581 = vst [vmem:[#allocation5_spill] sm:$0xff] %v2948_v40 }
  0x12   :  { %2198 = vmatprep.subr.bf16.mxu1 %v2812_v17  ;;  %v46_v46 = vcombine.high %v44_v43, %v44_v43  ;;  %v2921_v47 = vpack.c.bf16 %v45_v44, %v45_v44  ;;  %v2923_v48 = vpack.c.bf16 %v44_v43, %v44_v43  ;;  %v89_v49 = vunpack.c.l.bf16 %v2917_v45  ;;  %v2953_v43 = vld [vmem:[%s3545_s1 + $0x1f0] sm:$0xff]  }
  0x13   :  { %3582 = vst [vmem:[#allocation6_spill] sm:$0xff] %v2953_v43  ;;  %v2959_v44 = vld [vmem:[%s3545_s1 + $0x130] sm:$0xff]  }
  0x14   :  { %2177 = vmatpush3.bf16.msra.mxu0 %v2818_v18  ;;  %3580 = vst [vmem:[#allocation4_spill] sm:$0xff] %v2923_v48  ;;  %v2926_v50 = vpack.c.bf16 %v46_v46, %v46_v46  ;;  %v90_v51 = vunpack.c.l.bf16 %v2921_v47  ;;  %v91_v52 = vunpack.c.l.bf16 %v2923_v48  ;;  %v2965_v46 = vld [vmem:[%s3545_s1 + $0x168] sm:$0xff]  }
  0x15   :  { %2199 = vmatpush3.bf16.msra.mxu1 %v2824_v19  ;;  %2178 = vmatprep.subr.bf16.mxu0 %v2830_v20 }
  0x16   :  { %2200 = vmatprep.subr.bf16.mxu1 %v2836_v21  ;;  %v92_v53 = vunpack.c.l.bf16 %v2926_v50  ;;  %v107_v54 = vcombine.low %v89_v49, %v90_v51  ;;  %v2971_v49 = vld [vmem:[%s3545_s1 + $0x1b0] sm:$0xff]   ;;  %v2977_v51 = vld [vmem:[%s3545_s1 + $0x1e8] sm:$0xff]  }
  0x17   :  { %3583 = vst [vmem:[#allocation7_spill] sm:$0xff] %v2971_v49  ;;  %3584 = vst [vmem:[#allocation8_spill] sm:$0xff] %v2977_v51 }
  0x18   :  { %2179 = vmatpush3.bf16.msra.mxu0 %v2842_v25  ;;  %v108_v55 = vcombine.low %v91_v52, %v92_v53  ;;  %v115_v56 = vrot.slane %v107_v54, %v2886_v35  ;;  %v2983_v52 = vld [vmem:[%s3545_s1 + $0x128] sm:$0xff]   ;;  %v2989_v53 = vld [vmem:[%s3545_s1 + $0x160] sm:$0xff]  }
  0x19   :  { %2201 = vmatpush3.bf16.msra.mxu1 %v2848_v26  ;;  %2180 = vmatprep.subr.bf16.mxu0 %v2854_v27  ;;  %v25_v54 = vld [vmem:[%s3546_s0 + $0x8] sm:$0xff] }
  0x1a   :  { %2202 = vmatprep.subr.bf16.mxu1 %v2860_v28  ;;  %v122_v57 = vrot.slane %v108_v55, %v2886_v35  ;;  %v2998_v55 = vld [vmem:[%s3545_s1 + $0x1a8] sm:$0xff]  }
  0x1b   :  { %3585 = vst [vmem:[#allocation9_spill] sm:$0xff] %v2998_v55 }
  0x1c   :  { %2181 = vmatpush3.bf16.msra.mxu0 %v2866_v31  ;;  %v123_v58 = vcombine.low %v115_v56, %v122_v57  ;;  %v47_v56 = vcombine.high %v25_v54, %v25_v54  ;;  %v54_v57 = vrot.slane %v25_v54, %v2886_v35 }
  0x1d   :  { %2203 = vmatpush3.bf16.msra.mxu1 %v2872_v32  ;;  %2182 = vmatprep.subr.bf16.mxu0 %v2878_v33 }
  0x1e   :  { %2204 = vmatprep.subr.bf16.mxu1 %v2884_v34  ;;  %v151_v59 = vsub.f32 %v24_v38, %v123_v58  ;;  %v3005_v58 = vld [vmem:[%s3545_s1 + $0x1e0] sm:$0xff]  }
  0x1f   :  { %3586 = vst [vmem:[#allocation10_spill] sm:$0xff] %v3005_v58 }
  0x20   :  { %2183 = vmatpush3.bf16.msra.mxu0 %v2892_v36  ;;  %v164_v60 = vrot.slane %v151_v59, %v2886_v35  ;;  %v157_v61 = vcombine.high %v151_v59, %v151_v59  ;;  %v3011_v59 = vld [vmem:[%s3545_s1 + $0x120] sm:$0xff]  }
  0x21   :  { %2205 = vmatpush3.bf16.msra.mxu1 %v2898_v37  ;;  %2212 = vmatprep.subr.bf16.mxu0 %v2909_v41  ;;  %v3149_v37 = vld [vmem:[%s3545_s1 + $0x238] sm:$0xff]  }
  0x22   :  { %2234 = vmatprep.subr.bf16.mxu1 %v2914_v42  ;;  %v172_v62 = vcombine.high %v164_v60, %v164_v60  ;;  %v171_v63 = vrot.slane %v157_v61, %v2886_v35  ;;  %v207_v22 = vpack.c.bf16 %v164_v60, %v164_v60  ;;  %v61_v60 = vrot.slane %v47_v56, %v2886_v35  ;;  %v3037_v56 = vld [vmem:[%s3545_s1 + $0x1d8] sm:$0xff]  }
  0x23   :  { %v62_v61 = vcombine.high %v54_v57, %v54_v57  ;;  %3590 = vst [vmem:[#allocation14_spill] sm:$0xff] %v3037_v56 }
  0x24   :  { %v208_v23 = vpack.c.bf16 %v172_v62, %v172_v62  ;;  %v173_v24 = vcombine.high %v171_v63, %v171_v63  ;;  %v209_v30 = vpack.c.bf16 %v171_v63, %v171_v63  ;;  %v3014_v62 = vpack.c.bf16 %v54_v57, %v54_v57  ;;  %v3020_v63 = vld [vmem:[%s3545_s1 + $0x158] sm:$0xff]  }
  0x25   :  { %v3043_v57 = vld [vmem:[%s3545_s1 + $0x118] sm:$0xff]  }
  0x26   :  { %968 = vmatprep.mubr.bf16.mxu0 %v208_v23  ;;  %v210_v38 = vpack.c.bf16 %v173_v24, %v173_v24  ;;  %3587 = vst [vmem:[#allocation11_spill] sm:$0xff] %v3014_v62  ;;  %v63_v23 = vcombine.high %v61_v60, %v61_v60  ;;  %v3028_v24 = vpack.c.bf16 %v62_v61, %v62_v61 }
  0x27   :  { %969 = vmatmul.mubr.bf16.vlgmr.msra.gmra.mxu0 %v207_v22  ;;  %v3026_v22 = vld [vmem:[%s3545_s1 + $0x1a0] sm:$0xff]  }
  0x28   :  { %1008 = vmatprep.mubr.bf16.mxu1 %v210_v38  ;;  %2213 = vmatpush3.bf16.msra.mxu0 %v2938_v29  ;;  %3588 = vst [vmem:[#allocation12_spill] sm:$0xff] %v3026_v22  ;;  %v93_v38 = vunpack.c.l.bf16 %v3014_v62  ;;  %v3045_v61 = vpack.c.bf16 %v63_v23, %v63_v23  ;;  %v3062_v23 = vld [vmem:[%s3545_s1 + $0x198] sm:$0xff]   ;;  %v3070_v62 = vld [vmem:[%s3545_s1 + $0x1d0] sm:$0xff]  }
  0x29   :  { %1009 = vmatmul.mubr.bf16.vlgmr.msra.gmra.mxu1 %v209_v30  ;;  %2214 = vmatprep.subr.bf16.mxu0 %v2943_v39  ;;  %v3030_v30 = vpack.c.bf16 %v61_v60, %v61_v60  ;;  %v94_v60 = vunpack.c.l.bf16 %v3028_v24  ;;  %3592 = vst [vmem:[#allocation16_spill] sm:$0xff] %v3062_v23  ;;  %3593 = vst [vmem:[#allocation17_spill] sm:$0xff] %v3070_v62 }
  0x2a   :  { %2235 = vmatpush3.bf16.msra.mxu1 %v2948_v40  ;;  %3591 = vst [vmem:[#allocation15_spill] sm:$0xff] %v3045_v61 }
  0x2b   :  { %2236 = vmatprep.subr.bf16.mxu1 %v2953_v43  ;;  %3589 = vst [vmem:[#allocation13_spill] sm:$0xff] %v3030_v30 }
  0x2c   :  { %2215 = vmatpush3.bf16.msra.mxu0 %v2959_v44 }
  0x2d   :  { %2216 = vmatprep.subr.bf16.mxu0 %v2965_v46 }
  0x2e   :  { %2237 = vmatpush3.bf16.msra.mxu1 %v2971_v49  ;;  %v124_v49 = vcombine.low %v93_v38, %v94_v60  ;;  %v3085_v60 = vld [vmem:[%s3545_s1 + $0x148] sm:$0xff]  }
  0x2f   :  { %2238 = vmatprep.subr.bf16.mxu1 %v2977_v51  ;;  %v26_v51 = vld [vmem:[%s3546_s0 + $0x10] sm:$0x3] }
  0x30   :  { %2217 = vmatpush3.bf16.msra.mxu0 %v2983_v52  ;;  %v70_v43 = vrot.slane %v26_v51, %v2886_v35 }
  0x31   :  { %2218 = vmatprep.subr.bf16.mxu0 %v2989_v53 }
  0x32   :  { %2239 = vmatpush3.bf16.msra.mxu1 %v2998_v55  ;;  %v95_v55 = vunpack.c.l.bf16 %v3030_v30  ;;  %v96_v30 = vunpack.c.l.bf16 %v3045_v61  ;;  %v132_v61 = vrot.slane %v124_v49, %v2886_v35  ;;  %v3079_v38 = vpack.c.bf16 %v70_v43, %v70_v43  ;;  %v3099_v43 = vld [vmem:[%s3545_s1 + $0x1c8] sm:$0xff]  }
  0x33   :  { %2240 = vmatprep.subr.bf16.mxu1 %v3005_v58  ;;  %v3053_v58 = vld [vmem:[%s3545_s1 + $0x150] sm:$0xff]   ;;  %3596 = vst [vmem:[#allocation20_spill] sm:$0xff] %v3099_v43 }
  0x34   :  { %2219 = vmatpush3.bf16.msra.mxu0 %v3011_v59  ;;  %v125_v40 = vcombine.low %v95_v55, %v96_v30  ;;  %3594 = vst [vmem:[#allocation18_spill] sm:$0xff] %v3079_v38  ;;  %v97_v49 = vunpack.c.l.bf16 %v3079_v38  ;;  %v3105_v30 = vld [vmem:[%s3545_s1 + $0x108] sm:$0xff]  }
  0x35   :  { %2220 = vmatprep.subr.bf16.mxu0 %v3020_v63  ;;  %v3118_v38 = vld [vmem:[%s3545_s1 + $0x188] sm:$0xff]  }
  0x36   :  { %2241 = vmatpush3.bf16.msra.mxu1 %v3026_v22  ;;  %v3076_v22 = vld [vmem:[%s3545_s1 + $0x110] sm:$0xff]   ;;  %v139_v55 = vrot.slane %v125_v40, %v2886_v35  ;;  %v147_v48 = vrot.slane %v97_v49, %v2886_v35  ;;  %v3112_v40 = vld [vmem:[%s3545_s1 + $0x140] sm:$0xff]   ;;  %3598 = vst [vmem:[#allocation22_spill] sm:$0xff] %v3118_v38 }
  0x37   :  { %2242 = vmatprep.subr.bf16.mxu1 %v3037_v56  ;;  %v3091_v56 = vld [vmem:[%s3545_s1 + $0x190] sm:$0xff]   ;;  %3597 = vst [vmem:[#allocation21_spill] sm:$0xff] %v3112_v40 }
  0x38   :  { %2221 = vmatpush3.bf16.msra.mxu0 %v3043_v57  ;;  %3595 = vst [vmem:[#allocation19_spill] sm:$0xff] %v3091_v56  ;;  %v153_v42 = vsub.f32 %v26_v51, %v147_v48  ;;  %v3141_v48 = vld [vmem:[%s3545_s1 + $0x180] sm:$0xff]  }
  0x39   :  { %2222 = vmatprep.subr.bf16.mxu0 %v3053_v58 }
  0x3a   :  { %2243 = vmatpush3.bf16.msra.mxu1 %v3062_v23  ;;  %v140_v23 = vcombine.low %v132_v61, %v139_v55  ;;  %v3124_v61 = vld [vmem:[%s3545_s1 + $0x1c0] sm:$0xff]  }
  0x3b   :  { %2244 = vmatprep.subr.bf16.mxu1 %v3070_v62  ;;  %v3130_v55 = vld [vmem:[%s3545_s1 + $0x100] sm:$0xff]  }
  0x3c   :  { %2223 = vmatpush3.bf16.msra.mxu0 %v3076_v22  ;;  %v152_v62 = vsub.f32 %v25_v54, %v140_v23  ;;  %v3134_v54 = vrot.slane %v153_v42, %v2886_v35 }
  0x3d   :  { %2224 = vmatprep.subr.bf16.mxu0 %v3085_v60 }
  0x3e   :  { %2245 = vmatpush3.bf16.msra.mxu1 %v3091_v56  ;;  %v181_v49 = vrot.slane %v152_v62, %v2886_v35  ;;  %v174_v56 = vcombine.high %v152_v62, %v152_v62 }
  0x3f   :  { %2246 = vmatprep.subr.bf16.mxu1 %v3099_v43 }
  0x40   :  { %2225 = vmatpush3.bf16.msra.mxu0 %v3105_v30  ;;  %v189_v51 = vcombine.high %v181_v49, %v181_v49  ;;  %v188_v23 = vrot.slane %v174_v56, %v2886_v35  ;;  %v211_v43 = vpack.c.bf16 %v181_v49, %v181_v49  ;;  %v3158_v56 = vld [vmem:[%s3545_s1 + $0x230] sm:$0xff]  }
  0x41   :  { %2226 = vmatprep.subr.bf16.mxu0 %v3112_v40  ;;  %v2619_v49 = vld [vmem:[%s3547_s2 + $0x90] sm:$0xff]  }
  0x42   :  { %2247 = vmatpush3.bf16.msra.mxu1 %v3118_v38  ;;  %v212_v62 = vpack.c.bf16 %v189_v51, %v189_v51  ;;  %v190_v42 = vcombine.high %v188_v23, %v188_v23  ;;  %v2671_v38 = vmov 0.0   ;;  %v213_v40 = vpack.c.bf16 %v188_v23, %v188_v23  ;;  %v2624_v51 = vld [vmem:[%s3547_s2 + $0x40] sm:$0xff]   ;;  %v2623_v23 = vld [vmem:[%s3547_s2 + $0x88] sm:$0xff]  }
  0x43   :  { %2248 = vmatprep.subr.bf16.mxu1 %v3124_v61 }
  0x44   :  { %2227 = vmatpush3.bf16.msra.mxu0 %v3130_v55  ;;  %1048 = vmatprep.mubr.bf16.mxu0 %v212_v62  ;;  %v214_v35 = vpack.c.bf16 %v190_v42, %v190_v42  ;;  %v2625_v62 = vld [vmem:[%s3547_s2 + $0xc0] sm:$0xff]  }
  0x45   :  { %2459 = vmatprep.subr.bf16.mxu0 %v2671_v38  ;;  %v2626_v42 = vld [vmem:[%s3547_s2] sm:$0xff]  }
  0x46   :  { %2249 = vmatpush3.bf16.msra.mxu1 %v3141_v48  ;;  %1088 = vmatprep.mubr.bf16.mxu1 %v214_v35  ;;  %v2628_v35 = vld [vmem:[%s3547_s2 + $0x178] sm:$0xff]  }
  0x47   :  { %1049 = vmatmul.mubr.bf16.vlgmr.msra.gmra.mxu0 %v211_v43  ;;  %2265 = vmatprep.subr.bf16.mxu1 %v2711_v0  ;;  %v3170_v0 = vld [vmem:[%s3545_s1 + $0x228] sm:$0xff]   ;;  %v2616_v43 = vld [vmem:[%s3547_s2 + $0x50] sm:$0xff]  }
  0x48   :  { %2460 = vmatpush3.bf16.msra.mxu0 %v3149_v37  ;;  %2475 = vmatprep.mubr.msk.bf16.mxu0 %vm2672_vm0, %v2671_v38 }
  0x49   :  { %1089 = vmatmul.mubr.bf16.vlgmr.msra.gmra.mxu1 %v213_v40  ;;  %2461 = vmatprep.subr.bf16.mxu0 %v2671_v38  ;;  %v2617_v40 = vld [vmem:[%s3547_s2 + $0xd0] sm:$0xff]  }
  0x4a   :  { %2266 = vmatpush3.bf16.msra.mxu1 %v2722_v2  ;;  %1168 = vmatprep.mubr.bf16.mxu1 %v2921_v47  ;;  %v3179_v2 = vld [vmem:[%s3545_s1 + $0x220] sm:$0xff]  }
  0x4b   :  { %2267 = vmatprep.subr.bf16.mxu1 %v2734_v4  ;;  %v3188_v4 = vld [vmem:[%s3545_s1 + $0x218] sm:$0xff]  }
  0x4c   :  { %2462 = vmatpush3.bf16.msra.mxu0 %v3158_v56 }
  0x4d   :  { %2463 = vmatprep.subr.bf16.mxu0 %v2671_v38 }
  0x4e   :  { %2268 = vmatpush3.bf16.msra.mxu1 %v2746_v6  ;;  %v3197_v6 = vld [vmem:[%s3545_s1 + $0x210] sm:$0xff]  }
  0x4f   :  { %2269 = vmatprep.subr.bf16.mxu1 %v2758_v8  ;;  %v3206_v8 = vld [vmem:[%s3545_s1 + $0x208] sm:$0xff]  }
  0x50   :  { %2464 = vmatpush3.bf16.msra.mxu0 %v3170_v0 }
  0x51   :  { %2465 = vmatprep.subr.bf16.mxu0 %v2671_v38 }
  0x52   :  { %2270 = vmatpush3.bf16.msra.mxu1 %v2770_v10  ;;  %v3215_v10 = vld [vmem:[%s3545_s1 + $0x200] sm:$0xff]  }
  0x53   :  { %2271 = vmatprep.subr.bf16.mxu1 %v2782_v12  ;;  %v215_v12 = vpack.c.bf16 %v3134_v54, %v3134_v54  ;;  %v2621_v54 = vld [vmem:[%s3547_s2 + $0xc8] sm:$0xff]  }
  0x54   :  { %2466 = vmatpush3.bf16.msra.mxu0 %v3179_v2 }
  0x55   :  { %2467 = vmatprep.subr.bf16.mxu0 %v2671_v38 }
  0x56   :  { %2272 = vmatpush3.bf16.msra.mxu1 %v2794_v14  ;;  %v3606_v14 = vld [vmem:[#allocation6_spill] sm:$0xff] }
  0x57   :  { %2273 = vmatprep.subr.bf16.mxu1 %v2806_v16  ;;  %v3608_v16 = vld [vmem:[#allocation8_spill] sm:$0xff] }
  0x58   :  { %2468 = vmatpush3.bf16.msra.mxu0 %v3188_v4 }
  0x59   :  { %2469 = vmatprep.subr.bf16.mxu0 %v2671_v38 }
  0x5a   :  { %2274 = vmatpush3.bf16.msra.mxu1 %v2818_v18  ;;  %v3610_v18 = vld [vmem:[#allocation10_spill] sm:$0xff] }
  0x5b   :  { %2275 = vmatprep.subr.bf16.mxu1 %v2830_v20  ;;  %v3612_v20 = vld [vmem:[#allocation14_spill] sm:$0xff] }
  0x5c   :  { %2470 = vmatpush3.bf16.msra.mxu0 %v3197_v6 }
  0x5d   :  { %2471 = vmatprep.subr.bf16.mxu0 %v2671_v38 }
  0x5e   :  { %2276 = vmatpush3.bf16.msra.mxu1 %v2842_v25  ;;  %v3614_v25 = vld [vmem:[#allocation17_spill] sm:$0xff] }
  0x5f   :  { %2277 = vmatprep.subr.bf16.mxu1 %v2854_v27  ;;  %v3616_v27 = vld [vmem:[#allocation20_spill] sm:$0xff] }
  0x60   :  { %2472 = vmatpush3.bf16.msra.mxu0 %v3206_v8 }
  0x61   :  { %2473 = vmatprep.subr.bf16.mxu0 %v2671_v38 }
  0x62   :  { %2278 = vmatpush3.bf16.msra.mxu1 %v2866_v31  ;;  %v2596_v31 = vld [vmem:[%s3547_s2 + $0x78] sm:$0xff]  }
  0x63   :  { %2279 = vmatprep.subr.bf16.mxu1 %v2878_v33  ;;  %v2598_v33 = vld [vmem:[%s3547_s2 + $0x38] sm:$0xff]  }
  0x64   :  { %2474 = vmatpush3.bf16.msra.mxu0 %v3215_v10 }
  0x65   :  { %2287 = vmatprep.subr.bf16.mxu0 %v2716_v1  ;;  %v3599_v1 = vld [vmem:[#allocation21_spill] sm:$0xff] }
  0x66   :  { %2280 = vmatpush3.bf16.msra.mxu1 %v2892_v36  ;;  %v2599_v36 = vld [vmem:[%s3547_s2 + $0xb8] sm:$0xff]  }
  0x67   :  { %2476 = vmatmul.mubr.bf16.vlgmr.msra.gmra.mxu0 %v215_v12  ;;  %2309 = vmatprep.subr.bf16.mxu1 %v2909_v41  ;;  %v2601_v41 = vld [vmem:[%s3547_s2 + $0xf0] sm:$0xff]   ;;  %v2636_v12 = vld [vmem:[%s3547_s2 + $0x168] sm:$0xff]  }
  0x68   :  { %2288 = vmatpush3.bf16.msra.mxu0 %v2728_v3  ;;  %1208 = vmatprep.mubr.bf16.mxu0 %v2926_v50  ;;  %v3600_v3 = vld [vmem:[#allocation2_spill] sm:$0xff] }
  0x69   :  { %1169 = vmatmul.mubr.bf16.vlgmr.msra.gmra.mxu1 %v2917_v45  ;;  %2289 = vmatprep.subr.bf16.mxu0 %v2740_v5  ;;  %v3601_v5 = vld [vmem:[#allocation3_spill] sm:$0xff] }
  0x6a   :  { %2310 = vmatpush3.bf16.msra.mxu1 %v2938_v29  ;;  %1248 = vmatprep.mubr.bf16.mxu1 %v3028_v24  ;;  %v2602_v29 = vld [vmem:[%s3547_s2 + $0x30] sm:$0xff]  }
  0x6b   :  { %2311 = vmatprep.subr.bf16.mxu1 %v2943_v39  ;;  %v3619_v39 = vld [vmem:[#allocation18_spill] sm:$0xff] }
  0x6c   :  { %2290 = vmatpush3.bf16.msra.mxu0 %v2752_v7  ;;  %v3602_v7 = vld [vmem:[#allocation4_spill] sm:$0xff] }
  0x6d   :  { %2291 = vmatprep.subr.bf16.mxu0 %v2764_v9  ;;  %v3603_v9 = vld [vmem:[#allocation5_spill] sm:$0xff] }
  0x6e   :  { %2312 = vmatpush3.bf16.msra.mxu1 %v2959_v44  ;;  %v2604_v44 = vld [vmem:[%s3547_s2 + $0x68] sm:$0xff]  }
  0x6f   :  { %2313 = vmatprep.subr.bf16.mxu1 %v2965_v46  ;;  %v2603_v46 = vld [vmem:[%s3547_s2 + $0xb0] sm:$0xff]  }
  0x70   :  { %2292 = vmatpush3.bf16.msra.mxu0 %v2776_v11  ;;  %v3604_v11 = vld [vmem:[#allocation15_spill] sm:$0xff] }
  0x71   :  { %2293 = vmatprep.subr.bf16.mxu0 %v2788_v13  ;;  %v3605_v13 = vld [vmem:[#allocation11_spill] sm:$0xff] }
  0x72   :  { %2314 = vmatpush3.bf16.msra.mxu1 %v2983_v52  ;;  %v2605_v52 = vld [vmem:[%s3547_s2 + $0xe8] sm:$0xff]  }
  0x73   :  { %2315 = vmatprep.subr.bf16.mxu1 %v2989_v53  ;;  %v2608_v53 = vld [vmem:[%s3547_s2 + $0x60] sm:$0xff]  }
  0x74   :  { %2294 = vmatpush3.bf16.msra.mxu0 %v2800_v15  ;;  %v3607_v15 = vld [vmem:[#allocation7_spill] sm:$0xff] }
  0x75   :  { %2295 = vmatprep.subr.bf16.mxu0 %v2812_v17  ;;  %v3609_v17 = vld [vmem:[#allocation9_spill] sm:$0xff] }
  0x76   :  { %2316 = vmatpush3.bf16.msra.mxu1 %v3011_v59  ;;  %v2610_v59 = vld [vmem:[%s3547_s2 + $0x20] sm:$0xff]  }
  0x77   :  { %2317 = vmatprep.subr.bf16.mxu1 %v3020_v63  ;;  %v2612_v63 = vld [vmem:[%s3547_s2 + $0x58] sm:$0xff]  }
  0x78   :  { %2296 = vmatpush3.bf16.msra.mxu0 %v2824_v19  ;;  %v3611_v19 = vld [vmem:[#allocation12_spill] sm:$0xff] }
  0x79   :  { %2297 = vmatprep.subr.bf16.mxu0 %v2836_v21  ;;  %v3613_v21 = vld [vmem:[#allocation16_spill] sm:$0xff] }
  0x7a   :  { %2318 = vmatpush3.bf16.msra.mxu1 %v3043_v57  ;;  %v2613_v57 = vld [vmem:[%s3547_s2 + $0xd8] sm:$0xff]  }
  0x7b   :  { %2319 = vmatprep.subr.bf16.mxu1 %v3053_v58  ;;  %v2609_v58 = vld [vmem:[%s3547_s2 + $0xe0] sm:$0xff]  }
  0x7c   :  { %2298 = vmatpush3.bf16.msra.mxu0 %v2848_v26  ;;  %v3615_v26 = vld [vmem:[#allocation19_spill] sm:$0xff] }
  0x7d   :  { %2299 = vmatprep.subr.bf16.mxu0 %v2860_v28  ;;  %v3617_v28 = vld [vmem:[#allocation22_spill] sm:$0xff] }
  0x7e   :  { %2320 = vmatpush3.bf16.msra.mxu1 %v3076_v22  ;;  %v2611_v22 = vld [vmem:[%s3547_s2 + $0xa0] sm:$0xff]  }
  0x7f   :  { %2321 = vmatprep.subr.bf16.mxu1 %v3085_v60  ;;  %v2614_v60 = vld [vmem:[%s3547_s2 + $0x18] sm:$0xff]  }
  0x80   :  { %2300 = vmatpush3.bf16.msra.mxu0 %v2872_v32  ;;  %v2597_v32 = vld [vmem:[%s3547_s2 + $0xf8] sm:$0xff]  }
  0x81   :  { %2301 = vmatprep.subr.bf16.mxu0 %v2884_v34  ;;  %v2600_v34 = vld [vmem:[%s3547_s2 + $0x70] sm:$0xff]  }
  0x82   :  { %2322 = vmatpush3.bf16.msra.mxu1 %v3105_v30  ;;  %v2615_v30 = vld [vmem:[%s3547_s2 + $0x98] sm:$0xff]  }
  0x83   :  { %2323 = vmatprep.subr.bf16.mxu1 %v3599_v1  ;;  %v2638_v1 = vld [vmem:[%s3547_s2 + $0x1e8] sm:$0xff]  }
  0x84   :  { %2302 = vmatpush3.bf16.msra.mxu0 %v3600_v3  ;;  %v2640_v3 = vld [vmem:[%s3547_s2 + $0x160] sm:$0xff]  }
  0x85   :  { %2331 = vmatprep.subr.bf16.mxu0 %v3601_v5  ;;  %v2639_v5 = vld [vmem:[%s3547_s2 + $0x1a8] sm:$0xff]  }
  0x86   :  { %2324 = vmatpush3.bf16.msra.mxu1 %v3130_v55  ;;  %v2620_v55 = vld [vmem:[%s3547_s2 + $0x48] sm:$0xff]  }
  0x87   :  { %1209 = vmatmul.mubr.bf16.vlgmr.msra.gmra.mxu0 %v3602_v7  ;;  %2479 = vmatprep.subr.bf16.mxu1 %v2671_v38 }
  0x88   :  { %2332 = vmatpush3.bf16.msra.mxu0 %v3603_v9  ;;  %1288 = vmatprep.mubr.bf16.mxu0 %v3604_v11  ;;  %v2641_v9 = vld [vmem:[%s3547_s2 + $0x120] sm:$0xff]  }
  0x89   :  { %1249 = vmatmul.mubr.bf16.vlgmr.msra.gmra.mxu1 %v3605_v13  ;;  %2333 = vmatprep.subr.bf16.mxu0 %v3606_v14  ;;  %v2643_v14 = vld [vmem:[%s3547_s2 + $0x1a0] sm:$0xff]  }
  0x8a   :  { %2480 = vmatpush3.bf16.msra.mxu1 %v3149_v37  ;;  %2495 = vmatprep.mubr.msk.bf16.mxu1 %vm2672_vm0, %v2671_v38  ;;  %v3618_v37 = vld [vmem:[#allocation13_spill] sm:$0xff] }
  0x8b   :  { %2481 = vmatprep.subr.bf16.mxu1 %v2671_v38 }
  0x8c   :  { %2334 = vmatpush3.bf16.msra.mxu0 %v3607_v15  ;;  %v2646_v15 = vld [vmem:[%s3547_s2 + $0x1d8] sm:$0xff]  }
  0x8d   :  { %2335 = vmatprep.subr.bf16.mxu0 %v3608_v16  ;;  %v2645_v16 = vld [vmem:[%s3547_s2 + $0x118] sm:$0xff]  }
  0x8e   :  { %2482 = vmatpush3.bf16.msra.mxu1 %v3158_v56  ;;  %v2627_v56 = vld [vmem:[%s3547_s2 + $0x80] sm:$0xff]  }
  0x8f   :  { %2483 = vmatprep.subr.bf16.mxu1 %v2671_v38 }
  0x90   :  { %2336 = vmatpush3.bf16.msra.mxu0 %v3609_v17  ;;  %v2648_v17 = vld [vmem:[%s3547_s2 + $0x150] sm:$0xff]  }
  0x91   :  { %2337 = vmatprep.subr.bf16.mxu0 %v3610_v18  ;;  %v2647_v18 = vld [vmem:[%s3547_s2 + $0x198] sm:$0xff]  }
  0x92   :  { %2484 = vmatpush3.bf16.msra.mxu1 %v3170_v0  ;;  %v2630_v0 = vld [vmem:[%s3547_s2 + $0x1f8] sm:$0xff]  }
  0x93   :  { %2485 = vmatprep.subr.bf16.mxu1 %v2671_v38 }
  0x94   :  { %2338 = vmatpush3.bf16.msra.mxu0 %v3611_v19  ;;  %v2650_v19 = vld [vmem:[%s3547_s2 + $0x1d0] sm:$0xff]  }
  0x95   :  { %2339 = vmatprep.subr.bf16.mxu0 %v3612_v20  ;;  %v2649_v20 = vld [vmem:[%s3547_s2 + $0x110] sm:$0xff]  }
  0x96   :  { %2486 = vmatpush3.bf16.msra.mxu1 %v3179_v2  ;;  %v2629_v2 = vld [vmem:[%s3547_s2 + $0x138] sm:$0xff]  }
  0x97   :  { %2487 = vmatprep.subr.bf16.mxu1 %v2671_v38 }
  0x98   :  { %2340 = vmatpush3.bf16.msra.mxu0 %v3613_v21  ;;  %v2652_v21 = vld [vmem:[%s3547_s2 + $0x148] sm:$0xff]  }
  0x99   :  { %2341 = vmatprep.subr.bf16.mxu0 %v3614_v25  ;;  %v2651_v25 = vld [vmem:[%s3547_s2 + $0x190] sm:$0xff]  }
  0x9a   :  { %2488 = vmatpush3.bf16.msra.mxu1 %v3188_v4  ;;  %v2632_v4 = vld [vmem:[%s3547_s2 + $0x170] sm:$0xff]  }
  0x9b   :  { %2489 = vmatprep.subr.bf16.mxu1 %v2671_v38 }
  0x9c   :  { %2342 = vmatpush3.bf16.msra.mxu0 %v3615_v26  ;;  %v2654_v26 = vld [vmem:[%s3547_s2 + $0x1c8] sm:$0xff]  }
  0x9d   :  { %2343 = vmatprep.subr.bf16.mxu0 %v3616_v27  ;;  %v2653_v27 = vld [vmem:[%s3547_s2 + $0x108] sm:$0xff]  }
  0x9e   :  { %2490 = vmatpush3.bf16.msra.mxu1 %v3197_v6  ;;  %v2631_v6 = vld [vmem:[%s3547_s2 + $0x1b8] sm:$0xff]  }
  0x9f   :  { %2491 = vmatprep.subr.bf16.mxu1 %v2671_v38 }
  0xa0   :  { %2344 = vmatpush3.bf16.msra.mxu0 %v3617_v28  ;;  %v2656_v28 = vld [vmem:[%s3547_s2 + $0x140] sm:$0xff]  }
  0xa1   :  { %2345 = vmatprep.subr.bf16.mxu0 %v3124_v61  ;;  %v2618_v61 = vld [vmem:[%s3547_s2 + $0x10] sm:$0xff]  }
  0xa2   :  { %2492 = vmatpush3.bf16.msra.mxu1 %v3206_v8  ;;  %v2634_v8 = vld [vmem:[%s3547_s2 + $0x1f0] sm:$0xff]  }
  0xa3   :  { %2493 = vmatprep.subr.bf16.mxu1 %v2671_v38 }
  0xa4   :  { %2346 = vmatpush3.bf16.msra.mxu0 %v3141_v48  ;;  %v2622_v48 = vld [vmem:[%s3547_s2 + $0x8] sm:$0xff]  }
  0xa5   :  { %2362 = vmatprep.subr.bf16.mxu0 %v2596_v31  ;;  %v2655_v31 = vld [vmem:[%s3547_s2 + $0x188] sm:$0xff]  }
  0xa6   :  { %2494 = vmatpush3.bf16.msra.mxu1 %v3215_v10  ;;  %v2633_v10 = vld [vmem:[%s3547_s2 + $0x130] sm:$0xff]  }
  0xa7   :  { %1289 = vmatmul.mubr.bf16.vlgmr.msra.gmra.mxu0 %v3618_v37  ;;  %2384 = vmatprep.subr.bf16.mxu1 %v2597_v32  ;;  %v2658_v32 = vld [vmem:[%s3547_s2 + $0x1c0] sm:$0xff]  }
  0xa8   :  { %2363 = vmatpush3.bf16.msra.mxu0 %v2598_v33  ;;  %1800 = vmatprep.mubr.bf16.mxu0 %v2921_v47  ;;  %v2606_v47 = vld [vmem:[%s3547_s2 + $0x28] sm:$0xff]   ;;  %v2657_v33 = vld [vmem:[%s3547_s2 + $0x100] sm:$0xff]  }
  0xa9   :  { %2496 = vmatmul.mubr.bf16.vlgmr.msra.gmra.mxu1 %v3619_v39  ;;  %2364 = vmatprep.subr.bf16.mxu0 %v2600_v34  ;;  %v2659_v34 = vld [vmem:[%s3547_s2 + $0x180] sm:$0xff]  }
  0xaa   :  { %2385 = vmatpush3.bf16.msra.mxu1 %v2599_v36  ;;  %1840 = vmatprep.mubr.bf16.mxu1 %v2926_v50  ;;  %v2607_v50 = vld [vmem:[%s3547_s2 + $0xa8] sm:$0xff]   ;;  %v2660_v36 = vld [vmem:[%s3547_s2 + $0x238] sm:$0xff]  }
  0xab   :  { %2386 = vmatprep.subr.bf16.mxu1 %v2601_v41 }
  0xac   :  { %2365 = vmatpush3.bf16.msra.mxu0 %v2602_v29  ;;  %v2661_v29 = vld [vmem:[%s3547_s2 + $0x230] sm:$0xff]  }
  0xad   :  { %2366 = vmatprep.subr.bf16.mxu0 %v2604_v44 }
  0xae   :  { %2387 = vmatpush3.bf16.msra.mxu1 %v2603_v46 }
  0xaf   :  { %2388 = vmatprep.subr.bf16.mxu1 %v2605_v52 }
  0xb0   :  { %2367 = vmatpush3.bf16.msra.mxu0 %v2606_v47 }
  0xb1   :  { %2368 = vmatprep.subr.bf16.mxu0 %v2608_v53 }
  0xb2   :  { %2389 = vmatpush3.bf16.msra.mxu1 %v2607_v50 }
  0xb3   :  { %2390 = vmatprep.subr.bf16.mxu1 %v2609_v58 }
  0xb4   :  { %2369 = vmatpush3.bf16.msra.mxu0 %v2610_v59 }
  0xb5   :  { %2370 = vmatprep.subr.bf16.mxu0 %v2612_v63 }
  0xb6   :  { %2391 = vmatpush3.bf16.msra.mxu1 %v2611_v22 }
  0xb7   :  { %2392 = vmatprep.subr.bf16.mxu1 %v2613_v57  ;;  %v2664_v57 = vld [vmem:[%s3547_s2 + $0x218] sm:$0xff]  }
  0xb8   :  { %2371 = vmatpush3.bf16.msra.mxu0 %v2614_v60  ;;  %v2665_v60 = vld [vmem:[%s3547_s2 + $0x210] sm:$0xff]  }
  0xb9   :  { %2372 = vmatprep.subr.bf16.mxu0 %v2616_v43  ;;  %v2666_v43 = vld [vmem:[%s3547_s2 + $0x208] sm:$0xff]  }
  0xba   :  { %2393 = vmatpush3.bf16.msra.mxu1 %v2615_v30  ;;  %v2667_v30 = vld [vmem:[%s3547_s2 + $0x200] sm:$0xff]  }
  0xbb   :  { %2394 = vmatprep.subr.bf16.mxu1 %v2617_v40 }
  0xbc   :  { %2373 = vmatpush3.bf16.msra.mxu0 %v2618_v61 }
  0xbd   :  { %2374 = vmatprep.subr.bf16.mxu0 %v2620_v55 }
  0xbe   :  { %2395 = vmatpush3.bf16.msra.mxu1 %v2619_v49 }
  0xbf   :  { %2396 = vmatprep.subr.bf16.mxu1 %v2621_v54 }
  0xc0   :  { %2375 = vmatpush3.bf16.msra.mxu0 %v2622_v48 }
  0xc1   :  { %2376 = vmatprep.subr.bf16.mxu0 %v2624_v51 }
  0xc2   :  { %2397 = vmatpush3.bf16.msra.mxu1 %v2623_v23 }
  0xc3   :  { %2398 = vmatprep.subr.bf16.mxu1 %v2625_v62 }
  0xc4   :  { %2377 = vmatpush3.bf16.msra.mxu0 %v2626_v42 }
  0xc5   :  { %2406 = vmatprep.subr.bf16.mxu0 %v2628_v35 }
  0xc6   :  { %2399 = vmatpush3.bf16.msra.mxu1 %v2627_v56 }
  0xc7   :  { %1801 = vmatmul.mubr.bf16.vlgmr.msra.gmra.mxu0 %v2917_v45  ;;  %2428 = vmatprep.subr.bf16.mxu1 %v2630_v0  ;;  %v2635_v45 = vld [vmem:[%s3547_s2 + $0x1b0] sm:$0xff]  }
  0xc8   :  { %2407 = vmatpush3.bf16.msra.mxu0 %v2629_v2  ;;  %1880 = vmatprep.mubr.bf16.mxu0 %v3028_v24  ;;  %v2637_v24 = vld [vmem:[%s3547_s2 + $0x128] sm:$0xff]  }
  0xc9   :  { %1841 = vmatmul.mubr.bf16.vlgmr.msra.gmra.mxu1 %v3602_v7  ;;  %2408 = vmatprep.subr.bf16.mxu0 %v2632_v4  ;;  %v2642_v7 = vld [vmem:[%s3547_s2 + $0x1e0] sm:$0xff]  }
  0xca   :  { %2429 = vmatpush3.bf16.msra.mxu1 %v2631_v6  ;;  %1920 = vmatprep.mubr.bf16.mxu1 %v3604_v11  ;;  %v2644_v11 = vld [vmem:[%s3547_s2 + $0x158] sm:$0xff]  }
  0xcb   :  { %2430 = vmatprep.subr.bf16.mxu1 %v2634_v8 }
  0xcc   :  { %2409 = vmatpush3.bf16.msra.mxu0 %v2633_v10 }
  0xcd   :  { %2410 = vmatprep.subr.bf16.mxu0 %v2636_v12 }
  0xce   :  { %2431 = vmatpush3.bf16.msra.mxu1 %v2635_v45 }
  0xcf   :  { %2432 = vmatprep.subr.bf16.mxu1 %v2638_v1 }
  0xd0   :  { %2411 = vmatpush3.bf16.msra.mxu0 %v2637_v24 }
  0xd1   :  { %2412 = vmatprep.subr.bf16.mxu0 %v2640_v3 }
  0xd2   :  { %2433 = vmatpush3.bf16.msra.mxu1 %v2639_v5 }
  0xd3   :  { %2434 = vmatprep.subr.bf16.mxu1 %v2642_v7 }
  0xd4   :  { %2413 = vmatpush3.bf16.msra.mxu0 %v2641_v9 }
  0xd5   :  { %2414 = vmatprep.subr.bf16.mxu0 %v2644_v11 }
  0xd6   :  { %2435 = vmatpush3.bf16.msra.mxu1 %v2643_v14 }
  0xd7   :  { %2436 = vmatprep.subr.bf16.mxu1 %v2646_v15 }
  0xd8   :  { %2415 = vmatpush3.bf16.msra.mxu0 %v2645_v16 }
  0xd9   :  { %2416 = vmatprep.subr.bf16.mxu0 %v2648_v17 }
  0xda   :  { %2437 = vmatpush3.bf16.msra.mxu1 %v2647_v18 }
  0xdb   :  { %2438 = vmatprep.subr.bf16.mxu1 %v2650_v19 }
  0xdc   :  { %2417 = vmatpush3.bf16.msra.mxu0 %v2649_v20 }
  0xdd   :  { %2418 = vmatprep.subr.bf16.mxu0 %v2652_v21 }
  0xde   :  { %2439 = vmatpush3.bf16.msra.mxu1 %v2651_v25 }
  0xdf   :  { %2440 = vmatprep.subr.bf16.mxu1 %v2654_v26 }
  0xe0   :  { %2419 = vmatpush3.bf16.msra.mxu0 %v2653_v27 }
  0xe1   :  { %2420 = vmatprep.subr.bf16.mxu0 %v2656_v28 }
  0xe2   :  { %2441 = vmatpush3.bf16.msra.mxu1 %v2655_v31 }
  0xe3   :  { %2442 = vmatprep.subr.bf16.mxu1 %v2658_v32 }
  0xe4   :  { %2421 = vmatpush3.bf16.msra.mxu0 %v2657_v33 }
  0xe5   :  { %2499 = vmatprep.subr.bf16.mxu0 %v2671_v38 }
  0xe6   :  { %2443 = vmatpush3.bf16.msra.mxu1 %v2659_v34 }
  0xe7   :  { %v2184_v41 = vpop.f32.mrf.mxu0  ;;  %1881 = vmatmul.mubr.bf16.vlgmr.msra.gmra.mxu0 %v3605_v13  ;;  %v2662_v13 = vld [vmem:[%s3547_s2 + $0x228] sm:$0xff]  }
  0xe8   :  { %2500 = vmatpush3.bf16.msra.mxu0 %v2660_v36  ;;  %2515 = vmatprep.mubr.msk.bf16.mxu0 %vm2672_vm0, %v2671_v38 }
  0xe9   :  { %v2206_v44 = vpop.f32.mrf.mxu1  ;;  %v2185_v46 = vpop.f32.mrf.mxu0  ;;  %1921 = vmatmul.mubr.bf16.vlgmr.msra.gmra.mxu1 %v3618_v37  ;;  %2501 = vmatprep.subr.bf16.mxu0 %v2671_v38  ;;  %v2663_v37 = vld [vmem:[%s3547_s2 + $0x220] sm:$0xff]  }
  0xea   :  { %v2186_v52 = vadd.f32 %v2185_v46, %v2184_v41 }
  0xeb   :  { %v2207_v47 = vpop.f32.mrf.mxu1  ;;  %v2187_v53 = vpop.f32.mrf.mxu0 }
  0xec   :  { %v2208_v50 = vadd.f32 %v2207_v47, %v2206_v44  ;;  %2502 = vmatpush3.bf16.msra.mxu0 %v2661_v29 }
  0xed   :  { %v2188_v58 = vpop.f32.mrf.mxu0  ;;  %2503 = vmatprep.subr.bf16.mxu0 %v2671_v38  ;;  %v2209_v59 = vpop.f32.mrf.mxu1 }
  0xee   :  { %v1011_v63 = vadd.f32 %v2208_v50, %v2186_v52 }
  0xef   :  { %v2210_v22 = vpop.f32.mrf.mxu1 }
  0xf0   :  { %2504 = vmatpush3.bf16.msra.mxu0 %v2662_v13 }
  0xf1   :  { %2505 = vmatprep.subr.bf16.mxu0 %v2671_v38 }
  0xf4   :  { %2506 = vmatpush3.bf16.msra.mxu0 %v2663_v37 }
  0xf5   :  { %2507 = vmatprep.subr.bf16.mxu0 %v2671_v38 }
  0xf8   :  { %2508 = vmatpush3.bf16.msra.mxu0 %v2664_v57 }
  0xf9   :  { %2509 = vmatprep.subr.bf16.mxu0 %v2671_v38 }
  0xfc   :  { %2510 = vmatpush3.bf16.msra.mxu0 %v2665_v60 }
  0xfd   :  { %2511 = vmatprep.subr.bf16.mxu0 %v2671_v38 }
 0x100   :  { %2512 = vmatpush3.bf16.msra.mxu0 %v2666_v43 }
 0x101   :  { %2513 = vmatprep.subr.bf16.mxu0 %v2671_v38 }
 0x104   :  { %2514 = vmatpush3.bf16.msra.mxu0 %v2667_v30 }
 0x107   :  { %v2228_v40 = vpop.f32.mrf.mxu0  ;;  %2516 = vmatmul.mubr.bf16.vlgmr.msra.gmra.mxu0 %v3619_v39 }
 0x109   :  { %v2229_v61 = vpop.f32.mrf.mxu0  ;;  %v2250_v55 = vpop.f32.mrf.mxu1 }
 0x10a   :  { %v2230_v49 = vadd.f32 %v2229_v61, %v2228_v40 }
 0x10b   :  { %v2231_v54 = vpop.f32.mrf.mxu0  ;;  %v2251_v48 = vpop.f32.mrf.mxu1 }
 0x10c   :  { %v1051_v51 = vadd.f32 %v2230_v49, %v1011_v63  ;;  %v2252_v23 = vadd.f32 %v2251_v48, %v2250_v55 }
 0x10d   :  { %v2232_v62 = vpop.f32.mrf.mxu0  ;;  %v2253_v42 = vpop.f32.mrf.mxu1 }
 0x10e   :  { %v1091_v35 = vadd.f32 %v2252_v23, %v1051_v51  ;;  %v2165_v23 = vld [vmem:[%s3548_s3] ss:$0 sm:$0xff] }
 0x10f   :  { %v2254_v56 = vpop.f32.mrf.mxu1 }
 0x127   :  { %v1130_v0 = vpop.f32.mrf.mxu0 }
 0x128   :  { %v1131_v2 = vadd.f32 %v1130_v0, %v1091_v35 }
 0x129   :  { %v2281_v4 = vpop.f32.mrf.mxu1  ;;  %v2477_v6 = vpop.f32.mrf.mxu0 }
 0x12b   :  { %v2282_v38 = vpop.f32.mrf.mxu1  ;;  %v1133_v8 = vpop.f32.mrf.mxu0 }
 0x12c   :  { %v2283_v10 = vadd.f32 %v2282_v38, %v2281_v4 }
 0x12d   :  { %v2478_v12 = vpop.f32.mrf.mxu0  ;;  %v2284_v39 = vpop.f32.mrf.mxu1 }
 0x12e   :  { %v1171_v45 = vadd.f32 %v2283_v10, %v1131_v2 }
 0x12f   :  { %v2285_v1 = vpop.f32.mrf.mxu1 }
 0x147   :  { %v2303_v24 = vpop.f32.mrf.mxu0 }
 0x149   :  { %v2304_v3 = vpop.f32.mrf.mxu0  ;;  %v2325_v5 = vpop.f32.mrf.mxu1 }
 0x14a   :  { %v2305_v7 = vadd.f32 %v2304_v3, %v2303_v24 }
 0x14b   :  { %v2306_v9 = vpop.f32.mrf.mxu0  ;;  %v2326_v11 = vpop.f32.mrf.mxu1 }
 0x14c   :  { %v1211_v14 = vadd.f32 %v2305_v7, %v1171_v45  ;;  %v2327_v15 = vadd.f32 %v2326_v11, %v2325_v5 }
 0x14d   :  { %v2307_v16 = vpop.f32.mrf.mxu0  ;;  %v2328_v17 = vpop.f32.mrf.mxu1 }
 0x14e   :  { %v1251_v18 = vadd.f32 %v2327_v15, %v1211_v14 }
 0x14f   :  { %v2329_v19 = vpop.f32.mrf.mxu1 }
 0x150   :  { %v2166_v19 = vld [vmem:[%s3549_s4] ss:$0 sm:$0xff] }
 0x167   :  { %v2347_v20 = vpop.f32.mrf.mxu0 }
 0x169   :  { %v2348_v21 = vpop.f32.mrf.mxu0  ;;  %v1330_v25 = vpop.f32.mrf.mxu1 }
 0x16a   :  { %v2349_v26 = vadd.f32 %v2348_v21, %v2347_v20  ;;  %v2167_v21 = vld [vmem:[%s3550_s5] ss:$0 sm:$0xff] }
 0x16b   :  { %v2350_v27 = vpop.f32.mrf.mxu0  ;;  %v2497_v28 = vpop.f32.mrf.mxu1 }
 0x16c   :  { %v1291_v31 = vadd.f32 %v2349_v26, %v1251_v18 }
 0x16d   :  { %v2351_v32 = vpop.f32.mrf.mxu0  ;;  %v1333_v33 = vpop.f32.mrf.mxu1 }
 0x16e   :  { %v1331_v34 = vadd.f32 %v1330_v25, %v1291_v31 }
 0x16f   :  { %v2498_v36 = vpop.f32.mrf.mxu1 }
 0x187   :  { %v2378_v41 = vpop.f32.mrf.mxu0 }
 0x189   :  { %v2400_v29 = vpop.f32.mrf.mxu1  ;;  %v2379_v44 = vpop.f32.mrf.mxu0 }
 0x18a   :  { %v2380_v43 = vadd.f32 %v2379_v44, %v2378_v41 }
 0x18b   :  { %v2401_v46 = vpop.f32.mrf.mxu1  ;;  %v2381_v52 = vpop.f32.mrf.mxu0 }
 0x18c   :  { %v2402_v30 = vadd.f32 %v2401_v46, %v2400_v29 }
 0x18d   :  { %v2382_v47 = vpop.f32.mrf.mxu0  ;;  %v2403_v53 = vpop.f32.mrf.mxu1 }
 0x18e   :  { %v1843_v61 = vadd.f32 %v2402_v30, %v2380_v43 }
 0x18f   :  { %v2404_v50 = vpop.f32.mrf.mxu1 }
 0x1a7   :  { %v2422_v13 = vpop.f32.mrf.mxu0 }
 0x1a9   :  { %v2423_v58 = vpop.f32.mrf.mxu0  ;;  %v2444_v59 = vpop.f32.mrf.mxu1 }
 0x1aa   :  { %v2424_v40 = vadd.f32 %v2423_v58, %v2422_v13 }
 0x1ab   :  { %v2425_v63 = vpop.f32.mrf.mxu0  ;;  %v2445_v22 = vpop.f32.mrf.mxu1 }
 0x1ac   :  { %v1883_v55 = vadd.f32 %v2424_v40, %v1843_v61  ;;  %v2446_v49 = vadd.f32 %v2445_v22, %v2444_v59 }
 0x1ad   :  { %v2426_v37 = vpop.f32.mrf.mxu0  ;;  %v2447_v57 = vpop.f32.mrf.mxu1 }
 0x1ae   :  { %v1923_v54 = vadd.f32 %v2446_v49, %v1883_v55 }
 0x1af   :  { %v2448_v60 = vpop.f32.mrf.mxu1 }
 0x1c7   :  { %v1962_v48 = vpop.f32.mrf.mxu0 }
 0x1c8   :  { %v1963_v51 = vadd.f32 %v1962_v48, %v1923_v54 }
 0x1c9   :  { %v2517_v62 = vpop.f32.mrf.mxu0 }
 0x1ca   :  { %v1968_v42 = vadd.f32 %v1963_v51, %v1331_v34 }
 0x1cb   :  { %v1965_v35 = vpop.f32.mrf.mxu0 }
 0x1cc   :  { %v1976_v56 = vadd.f32 %v2165_v23, %v1968_v42 }
 0x1cd   :  { %v2518_v0 = vpop.f32.mrf.mxu0 }
 0x1ce   :  { %v1977_v2 = vmax.f32 %v1976_v56, 0.0 }
 0x1d0   :  { %v1979_v4 = vsel %vm1978_vm1, %v1977_v2, 0.0 }
 0x1d1   :  { %v1980_v6 = vrot.slane %v1979_v4, 4 }
 0x1d3   :  { %v1981_v38 = vadd.f32 %v1980_v6, %v1979_v4 }
 0x1d5   :  { %v1982_v8 = vrot.slane %v1981_v38, 2 }
 0x1d7   :  { %v1983_v10 = vadd.f32 %v1982_v8, %v1981_v38 }
 0x1d9   :  { %v1984_v12 = vrot.slane %v1983_v10, 1 }
 0x1db   :  { %v1985_v39 = vadd.f32 %v1984_v12, %v1983_v10 }
 0x1dd   :  { %v1986_v45 = vmul.f32 0.5, %v1985_v39 }
 0x1df   :  { %v1987_v1 = vsub.f32 %v1977_v2, %v1986_v45 }
 0x1e1   :  { %v1988_v24 = vmul.f32 %v1987_v1, %v1987_v1 }
 0x1e3   :  { %v1989_v3 = vsel %vm1978_vm1, %v1988_v24, 0.0 }
 0x1e4   :  { %v1990_v5 = vrot.slane %v1989_v3, 4 }
 0x1e6   :  { %v1991_v7 = vadd.f32 %v1990_v5, %v1989_v3 }
 0x1e8   :  { %v1992_v9 = vrot.slane %v1991_v7, 2 }
 0x1ea   :  { %v1993_v11 = vadd.f32 %v1992_v9, %v1991_v7 }
 0x1ec   :  { %v1994_v14 = vrot.slane %v1993_v11, 1 }
 0x1ee   :  { %v1995_v15 = vadd.f32 %v1994_v14, %v1993_v11 }
 0x1f0   :  { %v1996_v16 = vmul.f32 0.5, %v1995_v15 }
 0x1f2   :  { %v1997_v17 = vadd.f32 1e-05, %v1996_v16 }
 0x1f4   :  { %2668 = vrsqrt.f32 %v1997_v17 }
 0x201   :  { %v2669_v18 = vpop.eup %2668 }
 0x202   :  { %v1999_v20 = vmul.f32 %v2669_v18, %v1987_v1 }
 0x204   :  { %v2007_v25 = vmul.f32 %v2166_v19, %v1999_v20 }
 0x206   :  { %v2015_v26 = vadd.f32 %v2167_v21, %v2007_v25 }
 0x208   :  { %2016 = vst [vmem:[%s3551_s6] sm:$0x3] %v2015_v26 }

// kernel: film_layer_forward.9
= control target key start
LH: loop header
LB: loop body
LE: loop exit
PB: predicated region body
PF: predicated region fallthrough
CT: control target
= control target key end

     0   :  { %v2746_v22 = vmov 1983009808   ;;  %v3656_v24 = vlaneseq  ;;  %vm2748_vm0 = vmmov 0   ;;  %vm1981_vm1 = vcmask 58368   ;;  %s3648_s1 = inlined_call_operand.vmem [shape: bf16[1152,8], index: 1, kind: input, shape index: {}]   ;;  %s3649_s0 = inlined_call_operand.vmem [shape: f32[2,1152], index: 0, kind: input, shape index: {}]   ;;  %s3650_s2 = inlined_call_operand.vmem [shape: bf16[1152,8], index: 2, kind: input, shape index: {}]   ;;  %s3651_s3 = inlined_call_operand.vmem [shape: f32[1,8], index: 3, kind: input, shape index: {}]   ;;  %s3652_s4 = inlined_call_operand.vmem [shape: f32[1,8], index: 4, kind: input, shape index: {}]   ;;  %s3653_s5 = inlined_call_operand.vmem [shape: f32[1,8], index: 5, kind: input, shape index: {}]   ;;  %s3654_s6 = inlined_call_operand.vmem [shape: f32[2,4,256], index: 6, kind: input, shape index: {}]   ;;  %s3655_s7 = inlined_call_operand.vmem [shape: f32[2,4,256], index: 7, kind: output, shape index: {}]  }
   0x1   :  { %v2794_v0 = vld [vmem:[%s3648_s1 + $0x78] sm:$0xff]   ;;  %v2817_v4 = vld [vmem:[%s3648_s1 + $0x70] sm:$0xff]   ;;  %v2841_v8 = vld [vmem:[%s3648_s1 + $0x68] sm:$0xff]   ;;  %v35_v23 = vunpack.c.l.s4 %v2746_v22  ;;  %vm2032_vm3 = vcmask 64512  }
   0x2   :  { %v2799_v1 = vld [vmem:[%s3648_s1 + $0xf8] sm:$0xff]   ;;  %2242 = vmatprep.subr.bf16.mxu0 %v2794_v0  ;;  %v2823_v5 = vld [vmem:[%s3648_s1 + $0xf0] sm:$0xff]   ;;  %v2847_v9 = vld [vmem:[%s3648_s1 + $0xe8] sm:$0xff]   ;;  %v2946_v30 = vshrl.u32 %v3656_v24, 7 }
   0x3   :  { %v2805_v2 = vld [vmem:[%s3648_s1 + $0x38] sm:$0xff]   ;;  %2264 = vmatprep.subr.bf16.mxu1 %v2799_v1  ;;  %v2829_v6 = vld [vmem:[%s3648_s1 + $0x30] sm:$0xff]   ;;  %v2853_v10 = vld [vmem:[%s3648_s1 + $0x28] sm:$0xff]   ;;  %v36_v29 = vunpack.c.0.s8 %v35_v23 }
   0x4   :  { %v2811_v3 = vld [vmem:[%s3648_s1 + $0xb8] sm:$0xff]   ;;  %2243 = vmatpush3.bf16.msra.mxu0 %v2805_v2  ;;  %v2835_v7 = vld [vmem:[%s3648_s1 + $0xb0] sm:$0xff]   ;;  %v2859_v11 = vld [vmem:[%s3648_s1 + $0xa8] sm:$0xff]   ;;  %3685 = vst [vmem:[#allocation2_spill] sm:$0xff] %v2946_v30 }
   0x5   :  { %2265 = vmatpush3.bf16.msra.mxu1 %v2811_v3  ;;  %2244 = vmatprep.subr.bf16.mxu0 %v2817_v4  ;;  %v2865_v12 = vld [vmem:[%s3648_s1 + $0x60] sm:$0xff]   ;;  %v2889_v16 = vld [vmem:[%s3648_s1 + $0x58] sm:$0xff]   ;;  %v2913_v20 = vld [vmem:[%s3648_s1 + $0x50] sm:$0xff]   ;;  %v2973_v35 = vsub.s32 %v36_v29, %v2946_v30 }
   0x6   :  { %2266 = vmatprep.subr.bf16.mxu1 %v2823_v5  ;;  %v2871_v13 = vld [vmem:[%s3648_s1 + $0xe0] sm:$0xff]   ;;  %v2895_v17 = vld [vmem:[%s3648_s1 + $0xd8] sm:$0xff]   ;;  %v2919_v21 = vld [vmem:[%s3648_s1 + $0xd0] sm:$0xff]  }
   0x7   :  { %v2877_v14 = vld [vmem:[%s3648_s1 + $0x20] sm:$0xff]   ;;  %v2901_v18 = vld [vmem:[%s3648_s1 + $0x18] sm:$0xff]   ;;  %v2925_v25 = vld [vmem:[%s3648_s1 + $0x10] sm:$0xff]  }
   0x8   :  { %2245 = vmatpush3.bf16.msra.mxu0 %v2829_v6  ;;  %v2883_v15 = vld [vmem:[%s3648_s1 + $0xa0] sm:$0xff]   ;;  %v2907_v19 = vld [vmem:[%s3648_s1 + $0x98] sm:$0xff]   ;;  %v2931_v26 = vld [vmem:[%s3648_s1 + $0x90] sm:$0xff]  }
   0x9   :  { %2267 = vmatpush3.bf16.msra.mxu1 %v2835_v7  ;;  %2246 = vmatprep.subr.bf16.mxu0 %v2841_v8  ;;  %v2937_v27 = vld [vmem:[%s3648_s1 + $0x48] sm:$0xff]   ;;  %v2964_v33 = vld [vmem:[%s3648_s1 + $0x40] sm:$0xff]   ;;  %v2996_v41 = vld [vmem:[%s3648_s1 + $0x178] sm:$0xff]  }
   0xa   :  { %2268 = vmatprep.subr.bf16.mxu1 %v2847_v9  ;;  %v2943_v28 = vld [vmem:[%s3648_s1 + $0xc8] sm:$0xff]   ;;  %v2970_v34 = vld [vmem:[%s3648_s1 + $0xc0] sm:$0xff]   ;;  %v3001_v42 = vld [vmem:[%s3648_s1 + $0x1f8] sm:$0xff]  }
   0xb   :  { %v2952_v31 = vld [vmem:[%s3648_s1 + $0x8] sm:$0xff]   ;;  %v2979_v36 = vld [vmem:[%s3648_s1] sm:$0xff]   ;;  %3687 = vst [vmem:[#allocation4_spill] sm:$0xff] %v3001_v42  ;;  %v3124_v24 = vld [vmem:[%s3648_s1 + $0x1d8] sm:$0xff]  }
   0xc   :  { %2247 = vmatpush3.bf16.msra.mxu0 %v2853_v10  ;;  %v2958_v32 = vld [vmem:[%s3648_s1 + $0x88] sm:$0xff]   ;;  %v2985_v37 = vld [vmem:[%s3648_s1 + $0x80] sm:$0xff]   ;;  %3698 = vst [vmem:[#allocation15_spill] sm:$0xff] %v3124_v24  ;;  %v3130_v30 = vld [vmem:[%s3648_s1 + $0x118] sm:$0xff]  }
   0xd   :  { %2269 = vmatpush3.bf16.msra.mxu1 %v2859_v11  ;;  %2248 = vmatprep.subr.bf16.mxu0 %v2865_v12  ;;  %3686 = vst [vmem:[#allocation3_spill] sm:$0xff] %v2985_v37  ;;  %v27_v38 = vld [vmem:[%s3649_s0] sm:$0xff] }
   0xe   :  { %2270 = vmatprep.subr.bf16.mxu1 %v2871_v13  ;;  %v33_v39 = vcombine.high %v27_v38, %v27_v38  ;;  %v40_v40 = vrot.slane %v27_v38, %v2973_v35 }
  0x10   :  { %2249 = vmatpush3.bf16.msra.mxu0 %v2877_v14  ;;  %v47_v43 = vrot.slane %v33_v39, %v2973_v35  ;;  %v48_v44 = vcombine.high %v40_v40, %v40_v40  ;;  %v3004_v45 = vpack.c.bf16 %v40_v40, %v40_v40  ;;  %v3025_v39 = vld [vmem:[%s3648_s1 + $0x138] sm:$0xff]  }
  0x11   :  { %2271 = vmatpush3.bf16.msra.mxu1 %v2883_v15  ;;  %2250 = vmatprep.subr.bf16.mxu0 %v2889_v16 }
  0x12   :  { %2272 = vmatprep.subr.bf16.mxu1 %v2895_v17  ;;  %v49_v46 = vcombine.high %v47_v43, %v47_v43  ;;  %v3008_v47 = vpack.c.bf16 %v48_v44, %v48_v44  ;;  %v3010_v48 = vpack.c.bf16 %v47_v43, %v47_v43  ;;  %v92_v49 = vunpack.c.l.bf16 %v3004_v45  ;;  %v3030_v43 = vld [vmem:[%s3648_s1 + $0x170] sm:$0xff]   ;;  %v3035_v44 = vld [vmem:[%s3648_s1 + $0x1b8] sm:$0xff]  }
  0x13   :  { %3689 = vst [vmem:[#allocation6_spill] sm:$0xff] %v3035_v44 }
  0x14   :  { %2251 = vmatpush3.bf16.msra.mxu0 %v2901_v18  ;;  %3688 = vst [vmem:[#allocation5_spill] sm:$0xff] %v3010_v48  ;;  %v3013_v50 = vpack.c.bf16 %v49_v46, %v49_v46  ;;  %v93_v51 = vunpack.c.l.bf16 %v3008_v47  ;;  %v94_v52 = vunpack.c.l.bf16 %v3010_v48  ;;  %v3040_v46 = vld [vmem:[%s3648_s1 + $0x1f0] sm:$0xff]  }
  0x15   :  { %2273 = vmatpush3.bf16.msra.mxu1 %v2907_v19  ;;  %2252 = vmatprep.subr.bf16.mxu0 %v2913_v20  ;;  %3690 = vst [vmem:[#allocation7_spill] sm:$0xff] %v3040_v46 }
  0x16   :  { %2274 = vmatprep.subr.bf16.mxu1 %v2919_v21  ;;  %v95_v53 = vunpack.c.l.bf16 %v3013_v50  ;;  %v110_v54 = vcombine.low %v92_v49, %v93_v51  ;;  %v3046_v49 = vld [vmem:[%s3648_s1 + $0x130] sm:$0xff]   ;;  %v3052_v51 = vld [vmem:[%s3648_s1 + $0x168] sm:$0xff]  }
  0x18   :  { %2253 = vmatpush3.bf16.msra.mxu0 %v2925_v25  ;;  %v111_v55 = vcombine.low %v94_v52, %v95_v53  ;;  %v118_v56 = vrot.slane %v110_v54, %v2973_v35  ;;  %v3058_v52 = vld [vmem:[%s3648_s1 + $0x1b0] sm:$0xff]   ;;  %v3064_v53 = vld [vmem:[%s3648_s1 + $0x1e8] sm:$0xff]  }
  0x19   :  { %2275 = vmatpush3.bf16.msra.mxu1 %v2931_v26  ;;  %2254 = vmatprep.subr.bf16.mxu0 %v2937_v27  ;;  %3691 = vst [vmem:[#allocation8_spill] sm:$0xff] %v3058_v52  ;;  %3692 = vst [vmem:[#allocation9_spill] sm:$0xff] %v3064_v53  ;;  %v3070_v54 = vld [vmem:[%s3648_s1 + $0x128] sm:$0xff]  }
  0x1a   :  { %2276 = vmatprep.subr.bf16.mxu1 %v2943_v28  ;;  %v125_v57 = vrot.slane %v111_v55, %v2973_v35  ;;  %v3076_v55 = vld [vmem:[%s3648_s1 + $0x160] sm:$0xff]  }
  0x1c   :  { %2255 = vmatpush3.bf16.msra.mxu0 %v2952_v31  ;;  %v126_v58 = vcombine.low %v118_v56, %v125_v57  ;;  %v28_v56 = vld [vmem:[%s3649_s0 + $0x8] sm:$0xff] }
  0x1d   :  { %2277 = vmatpush3.bf16.msra.mxu1 %v2958_v32  ;;  %2256 = vmatprep.subr.bf16.mxu0 %v2964_v33  ;;  %v3085_v57 = vld [vmem:[%s3648_s1 + $0x1a8] sm:$0xff]  }
  0x1e   :  { %2278 = vmatprep.subr.bf16.mxu1 %v2970_v34  ;;  %v154_v59 = vsub.f32 %v27_v38, %v126_v58  ;;  %3693 = vst [vmem:[#allocation10_spill] sm:$0xff] %v3085_v57  ;;  %v50_v58 = vcombine.high %v28_v56, %v28_v56 }
  0x20   :  { %2257 = vmatpush3.bf16.msra.mxu0 %v2979_v36  ;;  %v167_v60 = vrot.slane %v154_v59, %v2973_v35  ;;  %v160_v61 = vcombine.high %v154_v59, %v154_v59  ;;  %v57_v59 = vrot.slane %v28_v56, %v2973_v35 }
  0x21   :  { %2279 = vmatpush3.bf16.msra.mxu1 %v2985_v37  ;;  %2286 = vmatprep.subr.bf16.mxu0 %v2996_v41  ;;  %v3236_v37 = vld [vmem:[%s3648_s1 + $0x238] sm:$0xff]  }
  0x22   :  { %2308 = vmatprep.subr.bf16.mxu1 %v3001_v42  ;;  %v175_v62 = vcombine.high %v167_v60, %v167_v60  ;;  %v174_v63 = vrot.slane %v160_v61, %v2973_v35  ;;  %v210_v22 = vpack.c.bf16 %v167_v60, %v167_v60  ;;  %v3092_v60 = vld [vmem:[%s3648_s1 + $0x1e0] sm:$0xff]  }
  0x23   :  { %3694 = vst [vmem:[#allocation11_spill] sm:$0xff] %v3092_v60  ;;  %v3098_v61 = vld [vmem:[%s3648_s1 + $0x120] sm:$0xff]  }
  0x24   :  { %v211_v23 = vpack.c.bf16 %v175_v62, %v175_v62  ;;  %v176_v29 = vcombine.high %v174_v63, %v174_v63  ;;  %v212_v40 = vpack.c.bf16 %v174_v63, %v174_v63  ;;  %v64_v62 = vrot.slane %v50_v58, %v2973_v35 }
  0x25   :  { %v65_v63 = vcombine.high %v57_v59, %v57_v59 }
  0x26   :  { %971 = vmatprep.mubr.bf16.mxu0 %v211_v23  ;;  %v213_v38 = vpack.c.bf16 %v176_v29, %v176_v29  ;;  %v3107_v23 = vld [vmem:[%s3648_s1 + $0x158] sm:$0xff]   ;;  %v3113_v29 = vld [vmem:[%s3648_s1 + $0x1a0] sm:$0xff]   ;;  %v3117_v58 = vpack.c.bf16 %v64_v62, %v64_v62 }
  0x27   :  { %972 = vmatmul.mubr.bf16.vlgmr.msra.gmra.mxu0 %v210_v22  ;;  %v3101_v22 = vpack.c.bf16 %v57_v59, %v57_v59  ;;  %3696 = vst [vmem:[#allocation13_spill] sm:$0xff] %v3113_v29 }
  0x28   :  { %1011 = vmatprep.mubr.bf16.mxu1 %v213_v38  ;;  %2287 = vmatpush3.bf16.msra.mxu0 %v3025_v39  ;;  %v3115_v38 = vpack.c.bf16 %v65_v63, %v65_v63  ;;  %3697 = vst [vmem:[#allocation14_spill] sm:$0xff] %v3117_v58 }
  0x29   :  { %1012 = vmatmul.mubr.bf16.vlgmr.msra.gmra.mxu1 %v212_v40  ;;  %2288 = vmatprep.subr.bf16.mxu0 %v3030_v43  ;;  %3695 = vst [vmem:[#allocation12_spill] sm:$0xff] %v3101_v22  ;;  %v66_v40 = vcombine.high %v64_v62, %v64_v62  ;;  %v96_v59 = vunpack.c.l.bf16 %v3101_v22  ;;  %v3157_v22 = vld [vmem:[%s3648_s1 + $0x1d0] sm:$0xff]  }
  0x2a   :  { %2309 = vmatpush3.bf16.msra.mxu1 %v3035_v44  ;;  %v97_v62 = vunpack.c.l.bf16 %v3115_v38  ;;  %3701 = vst [vmem:[#allocation18_spill] sm:$0xff] %v3157_v22 }
  0x2b   :  { %2310 = vmatprep.subr.bf16.mxu1 %v3040_v46  ;;  %v3132_v63 = vpack.c.bf16 %v66_v40, %v66_v40  ;;  %v3149_v40 = vld [vmem:[%s3648_s1 + $0x198] sm:$0xff]  }
  0x2c   :  { %2289 = vmatpush3.bf16.msra.mxu0 %v3046_v49  ;;  %3700 = vst [vmem:[#allocation17_spill] sm:$0xff] %v3149_v40 }
  0x2d   :  { %2290 = vmatprep.subr.bf16.mxu0 %v3052_v51  ;;  %3699 = vst [vmem:[#allocation16_spill] sm:$0xff] %v3132_v63 }
  0x2e   :  { %2311 = vmatpush3.bf16.msra.mxu1 %v3058_v52  ;;  %v127_v52 = vcombine.low %v96_v59, %v97_v62  ;;  %v3172_v62 = vld [vmem:[%s3648_s1 + $0x148] sm:$0xff]  }
  0x2f   :  { %2312 = vmatprep.subr.bf16.mxu1 %v3064_v53  ;;  %v29_v53 = vld [vmem:[%s3649_s0 + $0x10] sm:$0x3] }
  0x30   :  { %2291 = vmatpush3.bf16.msra.mxu0 %v3070_v54  ;;  %v73_v46 = vrot.slane %v29_v53, %v2973_v35 }
  0x31   :  { %2292 = vmatprep.subr.bf16.mxu0 %v3076_v55 }
  0x32   :  { %2313 = vmatpush3.bf16.msra.mxu1 %v3085_v57  ;;  %v98_v57 = vunpack.c.l.bf16 %v3117_v58  ;;  %v99_v58 = vunpack.c.l.bf16 %v3132_v63  ;;  %v135_v63 = vrot.slane %v127_v52, %v2973_v35  ;;  %v3166_v59 = vpack.c.bf16 %v73_v46, %v73_v46  ;;  %v3186_v46 = vld [vmem:[%s3648_s1 + $0x1c8] sm:$0xff]  }
  0x33   :  { %2314 = vmatprep.subr.bf16.mxu1 %v3092_v60  ;;  %v3140_v60 = vld [vmem:[%s3648_s1 + $0x150] sm:$0xff]   ;;  %3704 = vst [vmem:[#allocation21_spill] sm:$0xff] %v3186_v46 }
  0x34   :  { %2293 = vmatpush3.bf16.msra.mxu0 %v3098_v61  ;;  %v128_v44 = vcombine.low %v98_v57, %v99_v58  ;;  %3702 = vst [vmem:[#allocation19_spill] sm:$0xff] %v3166_v59  ;;  %v100_v52 = vunpack.c.l.bf16 %v3166_v59  ;;  %v3192_v58 = vld [vmem:[%s3648_s1 + $0x108] sm:$0xff]  }
  0x35   :  { %2294 = vmatprep.subr.bf16.mxu0 %v3107_v23  ;;  %v3205_v59 = vld [vmem:[%s3648_s1 + $0x188] sm:$0xff]  }
  0x36   :  { %2315 = vmatpush3.bf16.msra.mxu1 %v3113_v29  ;;  %v3163_v29 = vld [vmem:[%s3648_s1 + $0x110] sm:$0xff]   ;;  %v142_v57 = vrot.slane %v128_v44, %v2973_v35  ;;  %v150_v48 = vrot.slane %v100_v52, %v2973_v35  ;;  %v3199_v44 = vld [vmem:[%s3648_s1 + $0x140] sm:$0xff]   ;;  %3706 = vst [vmem:[#allocation23_spill] sm:$0xff] %v3205_v59 }
  0x37   :  { %2316 = vmatprep.subr.bf16.mxu1 %v3124_v24  ;;  %v3178_v24 = vld [vmem:[%s3648_s1 + $0x190] sm:$0xff]   ;;  %3705 = vst [vmem:[#allocation22_spill] sm:$0xff] %v3199_v44 }
  0x38   :  { %2295 = vmatpush3.bf16.msra.mxu0 %v3130_v30  ;;  %3703 = vst [vmem:[#allocation20_spill] sm:$0xff] %v3178_v24  ;;  %v156_v42 = vsub.f32 %v29_v53, %v150_v48  ;;  %v3228_v48 = vld [vmem:[%s3648_s1 + $0x180] sm:$0xff]  }
  0x39   :  { %2296 = vmatprep.subr.bf16.mxu0 %v3140_v60 }
  0x3a   :  { %2317 = vmatpush3.bf16.msra.mxu1 %v3149_v40  ;;  %v143_v40 = vcombine.low %v135_v63, %v142_v57  ;;  %v3211_v63 = vld [vmem:[%s3648_s1 + $0x1c0] sm:$0xff]  }
  0x3b   :  { %2318 = vmatprep.subr.bf16.mxu1 %v3157_v22  ;;  %v3217_v57 = vld [vmem:[%s3648_s1 + $0x100] sm:$0xff]  }
  0x3c   :  { %2297 = vmatpush3.bf16.msra.mxu0 %v3163_v29  ;;  %v155_v22 = vsub.f32 %v28_v56, %v143_v40  ;;  %v3221_v56 = vrot.slane %v156_v42, %v2973_v35 }
  0x3d   :  { %2298 = vmatprep.subr.bf16.mxu0 %v3172_v62 }
  0x3e   :  { %2319 = vmatpush3.bf16.msra.mxu1 %v3178_v24  ;;  %v184_v52 = vrot.slane %v155_v22, %v2973_v35  ;;  %v177_v24 = vcombine.high %v155_v22, %v155_v22 }
  0x3f   :  { %2320 = vmatprep.subr.bf16.mxu1 %v3186_v46 }
  0x40   :  { %2299 = vmatpush3.bf16.msra.mxu0 %v3192_v58  ;;  %v192_v53 = vcombine.high %v184_v52, %v184_v52  ;;  %v191_v40 = vrot.slane %v177_v24, %v2973_v35  ;;  %v214_v46 = vpack.c.bf16 %v184_v52, %v184_v52  ;;  %v3245_v35 = vld [vmem:[%s3648_s1 + $0x230] sm:$0xff]  }
  0x41   :  { %2300 = vmatprep.subr.bf16.mxu0 %v3199_v44  ;;  %v2695_v52 = vld [vmem:[%s3650_s2 + $0x90] sm:$0xff]  }
  0x42   :  { %2321 = vmatpush3.bf16.msra.mxu1 %v3205_v59  ;;  %v215_v22 = vpack.c.bf16 %v192_v53, %v192_v53  ;;  %v193_v42 = vcombine.high %v191_v40, %v191_v40  ;;  %v2747_v59 = vmov 0.0   ;;  %v216_v44 = vpack.c.bf16 %v191_v40, %v191_v40  ;;  %v2700_v53 = vld [vmem:[%s3650_s2 + $0x40] sm:$0xff]   ;;  %v2699_v40 = vld [vmem:[%s3650_s2 + $0x88] sm:$0xff]  }
  0x43   :  { %2322 = vmatprep.subr.bf16.mxu1 %v3211_v63 }
  0x44   :  { %2301 = vmatpush3.bf16.msra.mxu0 %v3217_v57  ;;  %1051 = vmatprep.mubr.bf16.mxu0 %v215_v22  ;;  %v217_v24 = vpack.c.bf16 %v193_v42, %v193_v42  ;;  %v2701_v22 = vld [vmem:[%s3650_s2 + $0xc0] sm:$0xff]  }
  0x45   :  { %2533 = vmatprep.subr.bf16.mxu0 %v2747_v59  ;;  %v2702_v42 = vld [vmem:[%s3650_s2] sm:$0xff]  }
  0x46   :  { %2323 = vmatpush3.bf16.msra.mxu1 %v3228_v48  ;;  %1091 = vmatprep.mubr.bf16.mxu1 %v217_v24  ;;  %v2704_v24 = vld [vmem:[%s3650_s2 + $0x178] sm:$0xff]  }
  0x47   :  { %1052 = vmatmul.mubr.bf16.vlgmr.msra.gmra.mxu0 %v214_v46  ;;  %2339 = vmatprep.subr.bf16.mxu1 %v2794_v0  ;;  %v3257_v0 = vld [vmem:[%s3648_s1 + $0x228] sm:$0xff]   ;;  %v2692_v46 = vld [vmem:[%s3650_s2 + $0x50] sm:$0xff]  }
  0x48   :  { %2534 = vmatpush3.bf16.msra.mxu0 %v3236_v37  ;;  %2549 = vmatprep.mubr.msk.bf16.mxu0 %vm2748_vm0, %v2747_v59 }
  0x49   :  { %1092 = vmatmul.mubr.bf16.vlgmr.msra.gmra.mxu1 %v216_v44  ;;  %2535 = vmatprep.subr.bf16.mxu0 %v2747_v59  ;;  %v2693_v44 = vld [vmem:[%s3650_s2 + $0xd0] sm:$0xff]  }
  0x4a   :  { %2340 = vmatpush3.bf16.msra.mxu1 %v2805_v2  ;;  %1171 = vmatprep.mubr.bf16.mxu1 %v3008_v47  ;;  %v3266_v2 = vld [vmem:[%s3648_s1 + $0x220] sm:$0xff]  }
  0x4b   :  { %2341 = vmatprep.subr.bf16.mxu1 %v2817_v4  ;;  %v3275_v4 = vld [vmem:[%s3648_s1 + $0x218] sm:$0xff]  }
  0x4c   :  { %2536 = vmatpush3.bf16.msra.mxu0 %v3245_v35 }
  0x4d   :  { %2537 = vmatprep.subr.bf16.mxu0 %v2747_v59 }
  0x4e   :  { %2342 = vmatpush3.bf16.msra.mxu1 %v2829_v6  ;;  %v3284_v6 = vld [vmem:[%s3648_s1 + $0x210] sm:$0xff]  }
  0x4f   :  { %2343 = vmatprep.subr.bf16.mxu1 %v2841_v8  ;;  %v3293_v8 = vld [vmem:[%s3648_s1 + $0x208] sm:$0xff]  }
  0x50   :  { %2538 = vmatpush3.bf16.msra.mxu0 %v3257_v0 }
  0x51   :  { %2539 = vmatprep.subr.bf16.mxu0 %v2747_v59 }
  0x52   :  { %2344 = vmatpush3.bf16.msra.mxu1 %v2853_v10  ;;  %v3302_v10 = vld [vmem:[%s3648_s1 + $0x200] sm:$0xff]  }
  0x53   :  { %2345 = vmatprep.subr.bf16.mxu1 %v2865_v12  ;;  %v218_v12 = vpack.c.bf16 %v3221_v56, %v3221_v56  ;;  %v2697_v56 = vld [vmem:[%s3650_s2 + $0xc8] sm:$0xff]  }
  0x54   :  { %2540 = vmatpush3.bf16.msra.mxu0 %v3266_v2 }
  0x55   :  { %2541 = vmatprep.subr.bf16.mxu0 %v2747_v59 }
  0x56   :  { %2346 = vmatpush3.bf16.msra.mxu1 %v2877_v14  ;;  %v3714_v14 = vld [vmem:[#allocation7_spill] sm:$0xff] }
  0x57   :  { %2347 = vmatprep.subr.bf16.mxu1 %v2889_v16  ;;  %v3716_v16 = vld [vmem:[#allocation9_spill] sm:$0xff] }
  0x58   :  { %2542 = vmatpush3.bf16.msra.mxu0 %v3275_v4 }
  0x59   :  { %2543 = vmatprep.subr.bf16.mxu0 %v2747_v59 }
  0x5a   :  { %2348 = vmatpush3.bf16.msra.mxu1 %v2901_v18  ;;  %v3718_v18 = vld [vmem:[#allocation11_spill] sm:$0xff] }
  0x5b   :  { %2349 = vmatprep.subr.bf16.mxu1 %v2913_v20  ;;  %v3720_v20 = vld [vmem:[#allocation15_spill] sm:$0xff] }
  0x5c   :  { %2544 = vmatpush3.bf16.msra.mxu0 %v3284_v6 }
  0x5d   :  { %2545 = vmatprep.subr.bf16.mxu0 %v2747_v59 }
  0x5e   :  { %2350 = vmatpush3.bf16.msra.mxu1 %v2925_v25  ;;  %v3722_v25 = vld [vmem:[#allocation18_spill] sm:$0xff] }
  0x5f   :  { %2351 = vmatprep.subr.bf16.mxu1 %v2937_v27  ;;  %v3724_v27 = vld [vmem:[#allocation21_spill] sm:$0xff] }
  0x60   :  { %2546 = vmatpush3.bf16.msra.mxu0 %v3293_v8 }
  0x61   :  { %2547 = vmatprep.subr.bf16.mxu0 %v2747_v59 }
  0x62   :  { %2352 = vmatpush3.bf16.msra.mxu1 %v2952_v31  ;;  %v2673_v31 = vld [vmem:[%s3650_s2 + $0xf8] sm:$0xff]  }
  0x63   :  { %2353 = vmatprep.subr.bf16.mxu1 %v2964_v33  ;;  %v2676_v33 = vld [vmem:[%s3650_s2 + $0x70] sm:$0xff]  }
  0x64   :  { %2548 = vmatpush3.bf16.msra.mxu0 %v3302_v10 }
  0x65   :  { %2361 = vmatprep.subr.bf16.mxu0 %v2799_v1  ;;  %v3707_v1 = vld [vmem:[#allocation22_spill] sm:$0xff] }
  0x66   :  { %2354 = vmatpush3.bf16.msra.mxu1 %v2979_v36  ;;  %v3726_v36 = vld [vmem:[#allocation14_spill] sm:$0xff] }
  0x67   :  { %2550 = vmatmul.mubr.bf16.vlgmr.msra.gmra.mxu0 %v218_v12  ;;  %2383 = vmatprep.subr.bf16.mxu1 %v2996_v41  ;;  %v2678_v41 = vld [vmem:[%s3650_s2 + $0x30] sm:$0xff]   ;;  %v2712_v12 = vld [vmem:[%s3650_s2 + $0x168] sm:$0xff]  }
  0x68   :  { %2362 = vmatpush3.bf16.msra.mxu0 %v2811_v3  ;;  %1211 = vmatprep.mubr.bf16.mxu0 %v3013_v50  ;;  %v3708_v3 = vld [vmem:[#allocation3_spill] sm:$0xff] }
  0x69   :  { %1172 = vmatmul.mubr.bf16.vlgmr.msra.gmra.mxu1 %v3004_v45  ;;  %2363 = vmatprep.subr.bf16.mxu0 %v2823_v5  ;;  %v3709_v5 = vld [vmem:[#allocation4_spill] sm:$0xff] }
  0x6a   :  { %2384 = vmatpush3.bf16.msra.mxu1 %v3025_v39  ;;  %1251 = vmatprep.mubr.bf16.mxu1 %v3115_v38  ;;  %v3727_v39 = vld [vmem:[#allocation19_spill] sm:$0xff] }
  0x6b   :  { %2385 = vmatprep.subr.bf16.mxu1 %v3030_v43  ;;  %v2680_v43 = vld [vmem:[%s3650_s2 + $0x68] sm:$0xff]  }
  0x6c   :  { %2364 = vmatpush3.bf16.msra.mxu0 %v2835_v7  ;;  %v3710_v7 = vld [vmem:[#allocation5_spill] sm:$0xff] }
  0x6d   :  { %2365 = vmatprep.subr.bf16.mxu0 %v2847_v9  ;;  %v3711_v9 = vld [vmem:[#allocation6_spill] sm:$0xff] }
  0x6e   :  { %2386 = vmatpush3.bf16.msra.mxu1 %v3046_v49  ;;  %v2679_v49 = vld [vmem:[%s3650_s2 + $0xb0] sm:$0xff]  }
  0x6f   :  { %2387 = vmatprep.subr.bf16.mxu1 %v3052_v51  ;;  %v2681_v51 = vld [vmem:[%s3650_s2 + $0xe8] sm:$0xff]  }
  0x70   :  { %2366 = vmatpush3.bf16.msra.mxu0 %v2859_v11  ;;  %v3712_v11 = vld [vmem:[#allocation16_spill] sm:$0xff] }
  0x71   :  { %2367 = vmatprep.subr.bf16.mxu0 %v2871_v13  ;;  %v3713_v13 = vld [vmem:[#allocation12_spill] sm:$0xff] }
  0x72   :  { %2388 = vmatpush3.bf16.msra.mxu1 %v3070_v54  ;;  %v2684_v54 = vld [vmem:[%s3650_s2 + $0x60] sm:$0xff]  }
  0x73   :  { %2389 = vmatprep.subr.bf16.mxu1 %v3076_v55  ;;  %v2685_v55 = vld [vmem:[%s3650_s2 + $0xe0] sm:$0xff]  }
  0x74   :  { %2368 = vmatpush3.bf16.msra.mxu0 %v2883_v15  ;;  %v3715_v15 = vld [vmem:[#allocation8_spill] sm:$0xff] }
  0x75   :  { %2369 = vmatprep.subr.bf16.mxu0 %v2895_v17  ;;  %v3717_v17 = vld [vmem:[#allocation10_spill] sm:$0xff] }
  0x76   :  { %2390 = vmatpush3.bf16.msra.mxu1 %v3098_v61  ;;  %v2688_v61 = vld [vmem:[%s3650_s2 + $0x58] sm:$0xff]  }
  0x77   :  { %2391 = vmatprep.subr.bf16.mxu1 %v3107_v23  ;;  %v2687_v23 = vld [vmem:[%s3650_s2 + $0xa0] sm:$0xff]  }
  0x78   :  { %2370 = vmatpush3.bf16.msra.mxu0 %v2907_v19  ;;  %v3719_v19 = vld [vmem:[#allocation13_spill] sm:$0xff] }
  0x79   :  { %2371 = vmatprep.subr.bf16.mxu0 %v2919_v21  ;;  %v3721_v21 = vld [vmem:[#allocation17_spill] sm:$0xff] }
  0x7a   :  { %2392 = vmatpush3.bf16.msra.mxu1 %v3130_v30  ;;  %v2672_v30 = vld [vmem:[%s3650_s2 + $0x78] sm:$0xff]  }
  0x7b   :  { %2393 = vmatprep.subr.bf16.mxu1 %v3140_v60  ;;  %v2686_v60 = vld [vmem:[%s3650_s2 + $0x20] sm:$0xff]  }
  0x7c   :  { %2372 = vmatpush3.bf16.msra.mxu0 %v2931_v26  ;;  %v3723_v26 = vld [vmem:[#allocation20_spill] sm:$0xff] }
  0x7d   :  { %2373 = vmatprep.subr.bf16.mxu0 %v2943_v28  ;;  %v3725_v28 = vld [vmem:[#allocation23_spill] sm:$0xff] }
  0x7e   :  { %2394 = vmatpush3.bf16.msra.mxu1 %v3163_v29  ;;  %v2689_v29 = vld [vmem:[%s3650_s2 + $0xd8] sm:$0xff]  }
  0x7f   :  { %2395 = vmatprep.subr.bf16.mxu1 %v3172_v62  ;;  %v2690_v62 = vld [vmem:[%s3650_s2 + $0x18] sm:$0xff]  }
  0x80   :  { %2374 = vmatpush3.bf16.msra.mxu0 %v2958_v32  ;;  %v2674_v32 = vld [vmem:[%s3650_s2 + $0x38] sm:$0xff]  }
  0x81   :  { %2375 = vmatprep.subr.bf16.mxu0 %v2970_v34  ;;  %v2675_v34 = vld [vmem:[%s3650_s2 + $0xb8] sm:$0xff]  }
  0x82   :  { %2396 = vmatpush3.bf16.msra.mxu1 %v3192_v58  ;;  %v2691_v58 = vld [vmem:[%s3650_s2 + $0x98] sm:$0xff]  }
  0x83   :  { %2397 = vmatprep.subr.bf16.mxu1 %v3707_v1  ;;  %v2714_v1 = vld [vmem:[%s3650_s2 + $0x1e8] sm:$0xff]  }
  0x84   :  { %2376 = vmatpush3.bf16.msra.mxu0 %v3708_v3  ;;  %v2716_v3 = vld [vmem:[%s3650_s2 + $0x160] sm:$0xff]  }
  0x85   :  { %2405 = vmatprep.subr.bf16.mxu0 %v3709_v5  ;;  %v2715_v5 = vld [vmem:[%s3650_s2 + $0x1a8] sm:$0xff]  }
  0x86   :  { %2398 = vmatpush3.bf16.msra.mxu1 %v3217_v57  ;;  %v2696_v57 = vld [vmem:[%s3650_s2 + $0x48] sm:$0xff]  }
  0x87   :  { %1212 = vmatmul.mubr.bf16.vlgmr.msra.gmra.mxu0 %v3710_v7  ;;  %2553 = vmatprep.subr.bf16.mxu1 %v2747_v59 }
  0x88   :  { %2406 = vmatpush3.bf16.msra.mxu0 %v3711_v9  ;;  %1291 = vmatprep.mubr.bf16.mxu0 %v3712_v11  ;;  %v2717_v9 = vld [vmem:[%s3650_s2 + $0x120] sm:$0xff]  }
  0x89   :  { %1252 = vmatmul.mubr.bf16.vlgmr.msra.gmra.mxu1 %v3713_v13  ;;  %2407 = vmatprep.subr.bf16.mxu0 %v3714_v14  ;;  %v2719_v14 = vld [vmem:[%s3650_s2 + $0x1a0] sm:$0xff]  }
  0x8a   :  { %2554 = vmatpush3.bf16.msra.mxu1 %v3236_v37  ;;  %2569 = vmatprep.mubr.msk.bf16.mxu1 %vm2748_vm0, %v2747_v59  ;;  %v2677_v37 = vld [vmem:[%s3650_s2 + $0xf0] sm:$0xff]  }
  0x8b   :  { %2555 = vmatprep.subr.bf16.mxu1 %v2747_v59 }
  0x8c   :  { %2408 = vmatpush3.bf16.msra.mxu0 %v3715_v15  ;;  %v2722_v15 = vld [vmem:[%s3650_s2 + $0x1d8] sm:$0xff]  }
  0x8d   :  { %2409 = vmatprep.subr.bf16.mxu0 %v3716_v16  ;;  %v2721_v16 = vld [vmem:[%s3650_s2 + $0x118] sm:$0xff]  }
  0x8e   :  { %2556 = vmatpush3.bf16.msra.mxu1 %v3245_v35  ;;  %v2703_v35 = vld [vmem:[%s3650_s2 + $0x80] sm:$0xff]  }
  0x8f   :  { %2557 = vmatprep.subr.bf16.mxu1 %v2747_v59 }
  0x90   :  { %2410 = vmatpush3.bf16.msra.mxu0 %v3717_v17  ;;  %v2724_v17 = vld [vmem:[%s3650_s2 + $0x150] sm:$0xff]  }
  0x91   :  { %2411 = vmatprep.subr.bf16.mxu0 %v3718_v18  ;;  %v2723_v18 = vld [vmem:[%s3650_s2 + $0x198] sm:$0xff]  }
  0x92   :  { %2558 = vmatpush3.bf16.msra.mxu1 %v3257_v0  ;;  %v2706_v0 = vld [vmem:[%s3650_s2 + $0x1f8] sm:$0xff]  }
  0x93   :  { %2559 = vmatprep.subr.bf16.mxu1 %v2747_v59 }
  0x94   :  { %2412 = vmatpush3.bf16.msra.mxu0 %v3719_v19  ;;  %v2726_v19 = vld [vmem:[%s3650_s2 + $0x1d0] sm:$0xff]  }
  0x95   :  { %2413 = vmatprep.subr.bf16.mxu0 %v3720_v20  ;;  %v2725_v20 = vld [vmem:[%s3650_s2 + $0x110] sm:$0xff]  }
  0x96   :  { %2560 = vmatpush3.bf16.msra.mxu1 %v3266_v2  ;;  %v2705_v2 = vld [vmem:[%s3650_s2 + $0x138] sm:$0xff]  }
  0x97   :  { %2561 = vmatprep.subr.bf16.mxu1 %v2747_v59 }
  0x98   :  { %2414 = vmatpush3.bf16.msra.mxu0 %v3721_v21  ;;  %v2728_v21 = vld [vmem:[%s3650_s2 + $0x148] sm:$0xff]  }
  0x99   :  { %2415 = vmatprep.subr.bf16.mxu0 %v3722_v25  ;;  %v2727_v25 = vld [vmem:[%s3650_s2 + $0x190] sm:$0xff]  }
  0x9a   :  { %2562 = vmatpush3.bf16.msra.mxu1 %v3275_v4  ;;  %v2708_v4 = vld [vmem:[%s3650_s2 + $0x170] sm:$0xff]  }
  0x9b   :  { %2563 = vmatprep.subr.bf16.mxu1 %v2747_v59 }
  0x9c   :  { %2416 = vmatpush3.bf16.msra.mxu0 %v3723_v26  ;;  %v2730_v26 = vld [vmem:[%s3650_s2 + $0x1c8] sm:$0xff]  }
  0x9d   :  { %2417 = vmatprep.subr.bf16.mxu0 %v3724_v27  ;;  %v2729_v27 = vld [vmem:[%s3650_s2 + $0x108] sm:$0xff]  }
  0x9e   :  { %2564 = vmatpush3.bf16.msra.mxu1 %v3284_v6  ;;  %v2707_v6 = vld [vmem:[%s3650_s2 + $0x1b8] sm:$0xff]  }
  0x9f   :  { %2565 = vmatprep.subr.bf16.mxu1 %v2747_v59 }
  0xa0   :  { %2418 = vmatpush3.bf16.msra.mxu0 %v3725_v28  ;;  %v2732_v28 = vld [vmem:[%s3650_s2 + $0x140] sm:$0xff]  }
  0xa1   :  { %2419 = vmatprep.subr.bf16.mxu0 %v3211_v63  ;;  %v2694_v63 = vld [vmem:[%s3650_s2 + $0x10] sm:$0xff]  }
  0xa2   :  { %2566 = vmatpush3.bf16.msra.mxu1 %v3293_v8  ;;  %v2710_v8 = vld [vmem:[%s3650_s2 + $0x1f0] sm:$0xff]  }
  0xa3   :  { %2567 = vmatprep.subr.bf16.mxu1 %v2747_v59 }
  0xa4   :  { %2420 = vmatpush3.bf16.msra.mxu0 %v3228_v48  ;;  %v2698_v48 = vld [vmem:[%s3650_s2 + $0x8] sm:$0xff]  }
  0xa5   :  { %2436 = vmatprep.subr.bf16.mxu0 %v2672_v30  ;;  %v2731_v30 = vld [vmem:[%s3650_s2 + $0x188] sm:$0xff]  }
  0xa6   :  { %2568 = vmatpush3.bf16.msra.mxu1 %v3302_v10  ;;  %v2709_v10 = vld [vmem:[%s3650_s2 + $0x130] sm:$0xff]  }
  0xa7   :  { %1292 = vmatmul.mubr.bf16.vlgmr.msra.gmra.mxu0 %v3726_v36  ;;  %2458 = vmatprep.subr.bf16.mxu1 %v2673_v31  ;;  %v2734_v31 = vld [vmem:[%s3650_s2 + $0x1c0] sm:$0xff]  }
  0xa8   :  { %2437 = vmatpush3.bf16.msra.mxu0 %v2674_v32  ;;  %1803 = vmatprep.mubr.bf16.mxu0 %v3008_v47  ;;  %v2682_v47 = vld [vmem:[%s3650_s2 + $0x28] sm:$0xff]   ;;  %v2733_v32 = vld [vmem:[%s3650_s2 + $0x100] sm:$0xff]  }
  0xa9   :  { %2570 = vmatmul.mubr.bf16.vlgmr.msra.gmra.mxu1 %v3727_v39  ;;  %2438 = vmatprep.subr.bf16.mxu0 %v2676_v33  ;;  %v2735_v33 = vld [vmem:[%s3650_s2 + $0x180] sm:$0xff]  }
  0xaa   :  { %2459 = vmatpush3.bf16.msra.mxu1 %v2675_v34  ;;  %1843 = vmatprep.mubr.bf16.mxu1 %v3013_v50  ;;  %v2683_v50 = vld [vmem:[%s3650_s2 + $0xa8] sm:$0xff]   ;;  %v2736_v34 = vld [vmem:[%s3650_s2 + $0x238] sm:$0xff]  }
  0xab   :  { %2460 = vmatprep.subr.bf16.mxu1 %v2677_v37 }
  0xac   :  { %2439 = vmatpush3.bf16.msra.mxu0 %v2678_v41  ;;  %v2737_v41 = vld [vmem:[%s3650_s2 + $0x230] sm:$0xff]  }
  0xad   :  { %2440 = vmatprep.subr.bf16.mxu0 %v2680_v43 }
  0xae   :  { %2461 = vmatpush3.bf16.msra.mxu1 %v2679_v49 }
  0xaf   :  { %2462 = vmatprep.subr.bf16.mxu1 %v2681_v51 }
  0xb0   :  { %2441 = vmatpush3.bf16.msra.mxu0 %v2682_v47 }
  0xb1   :  { %2442 = vmatprep.subr.bf16.mxu0 %v2684_v54 }
  0xb2   :  { %2463 = vmatpush3.bf16.msra.mxu1 %v2683_v50 }
  0xb3   :  { %2464 = vmatprep.subr.bf16.mxu1 %v2685_v55 }
  0xb4   :  { %2443 = vmatpush3.bf16.msra.mxu0 %v2686_v60 }
  0xb5   :  { %2444 = vmatprep.subr.bf16.mxu0 %v2688_v61 }
  0xb6   :  { %2465 = vmatpush3.bf16.msra.mxu1 %v2687_v23 }
  0xb7   :  { %2466 = vmatprep.subr.bf16.mxu1 %v2689_v29  ;;  %v2740_v29 = vld [vmem:[%s3650_s2 + $0x218] sm:$0xff]  }
  0xb8   :  { %2445 = vmatpush3.bf16.msra.mxu0 %v2690_v62  ;;  %v2741_v62 = vld [vmem:[%s3650_s2 + $0x210] sm:$0xff]  }
  0xb9   :  { %2446 = vmatprep.subr.bf16.mxu0 %v2692_v46  ;;  %v2742_v46 = vld [vmem:[%s3650_s2 + $0x208] sm:$0xff]  }
  0xba   :  { %2467 = vmatpush3.bf16.msra.mxu1 %v2691_v58  ;;  %v2743_v58 = vld [vmem:[%s3650_s2 + $0x200] sm:$0xff]  }
  0xbb   :  { %2468 = vmatprep.subr.bf16.mxu1 %v2693_v44 }
  0xbc   :  { %2447 = vmatpush3.bf16.msra.mxu0 %v2694_v63 }
  0xbd   :  { %2448 = vmatprep.subr.bf16.mxu0 %v2696_v57 }
  0xbe   :  { %2469 = vmatpush3.bf16.msra.mxu1 %v2695_v52 }
  0xbf   :  { %2470 = vmatprep.subr.bf16.mxu1 %v2697_v56 }
  0xc0   :  { %2449 = vmatpush3.bf16.msra.mxu0 %v2698_v48 }
  0xc1   :  { %2450 = vmatprep.subr.bf16.mxu0 %v2700_v53 }
  0xc2   :  { %2471 = vmatpush3.bf16.msra.mxu1 %v2699_v40 }
  0xc3   :  { %2472 = vmatprep.subr.bf16.mxu1 %v2701_v22 }
  0xc4   :  { %2451 = vmatpush3.bf16.msra.mxu0 %v2702_v42 }
  0xc5   :  { %2480 = vmatprep.subr.bf16.mxu0 %v2704_v24 }
  0xc6   :  { %2473 = vmatpush3.bf16.msra.mxu1 %v2703_v35 }
  0xc7   :  { %1804 = vmatmul.mubr.bf16.vlgmr.msra.gmra.mxu0 %v3004_v45  ;;  %2502 = vmatprep.subr.bf16.mxu1 %v2706_v0  ;;  %v2711_v45 = vld [vmem:[%s3650_s2 + $0x1b0] sm:$0xff]  }
  0xc8   :  { %2481 = vmatpush3.bf16.msra.mxu0 %v2705_v2  ;;  %1883 = vmatprep.mubr.bf16.mxu0 %v3115_v38  ;;  %v2713_v38 = vld [vmem:[%s3650_s2 + $0x128] sm:$0xff]  }
  0xc9   :  { %1844 = vmatmul.mubr.bf16.vlgmr.msra.gmra.mxu1 %v3710_v7  ;;  %2482 = vmatprep.subr.bf16.mxu0 %v2708_v4  ;;  %v2718_v7 = vld [vmem:[%s3650_s2 + $0x1e0] sm:$0xff]  }
  0xca   :  { %2503 = vmatpush3.bf16.msra.mxu1 %v2707_v6  ;;  %1923 = vmatprep.mubr.bf16.mxu1 %v3712_v11  ;;  %v2720_v11 = vld [vmem:[%s3650_s2 + $0x158] sm:$0xff]  }
  0xcb   :  { %2504 = vmatprep.subr.bf16.mxu1 %v2710_v8 }
  0xcc   :  { %2483 = vmatpush3.bf16.msra.mxu0 %v2709_v10 }
  0xcd   :  { %2484 = vmatprep.subr.bf16.mxu0 %v2712_v12 }
  0xce   :  { %2505 = vmatpush3.bf16.msra.mxu1 %v2711_v45 }
  0xcf   :  { %2506 = vmatprep.subr.bf16.mxu1 %v2714_v1 }
  0xd0   :  { %2485 = vmatpush3.bf16.msra.mxu0 %v2713_v38 }
  0xd1   :  { %2486 = vmatprep.subr.bf16.mxu0 %v2716_v3 }
  0xd2   :  { %2507 = vmatpush3.bf16.msra.mxu1 %v2715_v5 }
  0xd3   :  { %2508 = vmatprep.subr.bf16.mxu1 %v2718_v7 }
  0xd4   :  { %2487 = vmatpush3.bf16.msra.mxu0 %v2717_v9 }
  0xd5   :  { %2488 = vmatprep.subr.bf16.mxu0 %v2720_v11 }
  0xd6   :  { %2509 = vmatpush3.bf16.msra.mxu1 %v2719_v14 }
  0xd7   :  { %2510 = vmatprep.subr.bf16.mxu1 %v2722_v15 }
  0xd8   :  { %2489 = vmatpush3.bf16.msra.mxu0 %v2721_v16 }
  0xd9   :  { %2490 = vmatprep.subr.bf16.mxu0 %v2724_v17 }
  0xda   :  { %2511 = vmatpush3.bf16.msra.mxu1 %v2723_v18 }
  0xdb   :  { %2512 = vmatprep.subr.bf16.mxu1 %v2726_v19 }
  0xdc   :  { %2491 = vmatpush3.bf16.msra.mxu0 %v2725_v20 }
  0xdd   :  { %2492 = vmatprep.subr.bf16.mxu0 %v2728_v21 }
  0xde   :  { %2513 = vmatpush3.bf16.msra.mxu1 %v2727_v25 }
  0xdf   :  { %2514 = vmatprep.subr.bf16.mxu1 %v2730_v26 }
  0xe0   :  { %2493 = vmatpush3.bf16.msra.mxu0 %v2729_v27 }
  0xe1   :  { %2494 = vmatprep.subr.bf16.mxu0 %v2732_v28 }
  0xe2   :  { %2515 = vmatpush3.bf16.msra.mxu1 %v2731_v30 }
  0xe3   :  { %2516 = vmatprep.subr.bf16.mxu1 %v2734_v31 }
  0xe4   :  { %2495 = vmatpush3.bf16.msra.mxu0 %v2733_v32 }
  0xe5   :  { %2573 = vmatprep.subr.bf16.mxu0 %v2747_v59 }
  0xe6   :  { %2517 = vmatpush3.bf16.msra.mxu1 %v2735_v33 }
  0xe7   :  { %v2258_v37 = vpop.f32.mrf.mxu0  ;;  %1884 = vmatmul.mubr.bf16.vlgmr.msra.gmra.mxu0 %v3713_v13  ;;  %v2738_v13 = vld [vmem:[%s3650_s2 + $0x228] sm:$0xff]  }
  0xe8   :  { %2574 = vmatpush3.bf16.msra.mxu0 %v2736_v34  ;;  %2589 = vmatprep.mubr.msk.bf16.mxu0 %vm2748_vm0, %v2747_v59 }
  0xe9   :  { %v2280_v43 = vpop.f32.mrf.mxu1  ;;  %v2259_v49 = vpop.f32.mrf.mxu0  ;;  %1924 = vmatmul.mubr.bf16.vlgmr.msra.gmra.mxu1 %v3726_v36  ;;  %2575 = vmatprep.subr.bf16.mxu0 %v2747_v59  ;;  %v2739_v36 = vld [vmem:[%s3650_s2 + $0x220] sm:$0xff]  }
  0xea   :  { %v2260_v51 = vadd.f32 %v2259_v49, %v2258_v37 }
  0xeb   :  { %v2281_v47 = vpop.f32.mrf.mxu1  ;;  %v2261_v54 = vpop.f32.mrf.mxu0 }
  0xec   :  { %v2282_v50 = vadd.f32 %v2281_v47, %v2280_v43  ;;  %2576 = vmatpush3.bf16.msra.mxu0 %v2737_v41 }
  0xed   :  { %v2262_v55 = vpop.f32.mrf.mxu0  ;;  %2577 = vmatprep.subr.bf16.mxu0 %v2747_v59  ;;  %v2283_v60 = vpop.f32.mrf.mxu1 }
  0xee   :  { %v1014_v61 = vadd.f32 %v2282_v50, %v2260_v51 }
  0xef   :  { %v2284_v23 = vpop.f32.mrf.mxu1 }
  0xf0   :  { %2578 = vmatpush3.bf16.msra.mxu0 %v2738_v13 }
  0xf1   :  { %2579 = vmatprep.subr.bf16.mxu0 %v2747_v59 }
  0xf4   :  { %2580 = vmatpush3.bf16.msra.mxu0 %v2739_v36 }
  0xf5   :  { %2581 = vmatprep.subr.bf16.mxu0 %v2747_v59 }
  0xf8   :  { %2582 = vmatpush3.bf16.msra.mxu0 %v2740_v29 }
  0xf9   :  { %2583 = vmatprep.subr.bf16.mxu0 %v2747_v59 }
  0xfc   :  { %2584 = vmatpush3.bf16.msra.mxu0 %v2741_v62 }
  0xfd   :  { %2585 = vmatprep.subr.bf16.mxu0 %v2747_v59 }
 0x100   :  { %2586 = vmatpush3.bf16.msra.mxu0 %v2742_v46 }
 0x101   :  { %2587 = vmatprep.subr.bf16.mxu0 %v2747_v59 }
 0x104   :  { %2588 = vmatpush3.bf16.msra.mxu0 %v2743_v58 }
 0x107   :  { %v2302_v44 = vpop.f32.mrf.mxu0  ;;  %2590 = vmatmul.mubr.bf16.vlgmr.msra.gmra.mxu0 %v3727_v39 }
 0x109   :  { %v2303_v63 = vpop.f32.mrf.mxu0  ;;  %v2324_v57 = vpop.f32.mrf.mxu1 }
 0x10a   :  { %v2304_v52 = vadd.f32 %v2303_v63, %v2302_v44 }
 0x10b   :  { %v2305_v56 = vpop.f32.mrf.mxu0  ;;  %v2325_v48 = vpop.f32.mrf.mxu1 }
 0x10c   :  { %v1054_v53 = vadd.f32 %v2304_v52, %v1014_v61  ;;  %v2326_v40 = vadd.f32 %v2325_v48, %v2324_v57 }
 0x10d   :  { %v2306_v22 = vpop.f32.mrf.mxu0  ;;  %v2327_v42 = vpop.f32.mrf.mxu1 }
 0x10e   :  { %v1094_v24 = vadd.f32 %v2326_v40, %v1054_v53  ;;  %v2236_v22 = vld [vmem:[%s3651_s3] ss:$0 sm:$0xff] }
 0x10f   :  { %v2328_v35 = vpop.f32.mrf.mxu1 }
 0x127   :  { %v1133_v0 = vpop.f32.mrf.mxu0 }
 0x128   :  { %v1134_v2 = vadd.f32 %v1133_v0, %v1094_v24 }
 0x129   :  { %v2355_v4 = vpop.f32.mrf.mxu1  ;;  %v2551_v6 = vpop.f32.mrf.mxu0 }
 0x12b   :  { %v2356_v8 = vpop.f32.mrf.mxu1  ;;  %v1136_v10 = vpop.f32.mrf.mxu0 }
 0x12c   :  { %v2357_v12 = vadd.f32 %v2356_v8, %v2355_v4 }
 0x12d   :  { %v2552_v45 = vpop.f32.mrf.mxu0  ;;  %v2358_v39 = vpop.f32.mrf.mxu1 }
 0x12e   :  { %v1174_v1 = vadd.f32 %v2357_v12, %v1134_v2 }
 0x12f   :  { %v2359_v38 = vpop.f32.mrf.mxu1 }
 0x147   :  { %v2377_v3 = vpop.f32.mrf.mxu0 }
 0x149   :  { %v2378_v5 = vpop.f32.mrf.mxu0  ;;  %v2399_v7 = vpop.f32.mrf.mxu1 }
 0x14a   :  { %v2379_v9 = vadd.f32 %v2378_v5, %v2377_v3 }
 0x14b   :  { %v2380_v11 = vpop.f32.mrf.mxu0  ;;  %v2400_v14 = vpop.f32.mrf.mxu1 }
 0x14c   :  { %v1214_v15 = vadd.f32 %v2379_v9, %v1174_v1  ;;  %v2401_v16 = vadd.f32 %v2400_v14, %v2399_v7 }
 0x14d   :  { %v2381_v17 = vpop.f32.mrf.mxu0  ;;  %v2402_v18 = vpop.f32.mrf.mxu1 }
 0x14e   :  { %v1254_v19 = vadd.f32 %v2401_v16, %v1214_v15 }
 0x14f   :  { %v2403_v20 = vpop.f32.mrf.mxu1 }
 0x150   :  { %v3728_v20 = vlaneseq }
 0x167   :  { %v2421_v21 = vpop.f32.mrf.mxu0 }
 0x169   :  { %v2422_v25 = vpop.f32.mrf.mxu0  ;;  %v1333_v26 = vpop.f32.mrf.mxu1 }
 0x16a   :  { %v2423_v27 = vadd.f32 %v2422_v25, %v2421_v21  ;;  %v2022_v21 = vand.u32 127, %v3728_v20 }
 0x16b   :  { %v2424_v28 = vpop.f32.mrf.mxu0  ;;  %v2571_v30 = vpop.f32.mrf.mxu1 }
 0x16c   :  { %v1294_v31 = vadd.f32 %v2423_v27, %v1254_v19  ;;  %v2238_v28 = vld [vmem:[%s3653_s5] ss:$0 sm:$0xff] }
 0x16d   :  { %v2425_v32 = vpop.f32.mrf.mxu0  ;;  %v1336_v33 = vpop.f32.mrf.mxu1 }
 0x16e   :  { %v1334_v34 = vadd.f32 %v1333_v26, %v1294_v31  ;;  %v2237_v26 = vld [vmem:[%s3652_s4] ss:$0 sm:$0xff] }
 0x16f   :  { %v2572_v37 = vpop.f32.mrf.mxu1  ;;  %v3729_v31 = vld [vmem:[#allocation2_spill] sm:$0xff] }
 0x170   :  { %vm2023_vm2 = vcmp.eq.s32.totalorder %v3729_v31, %v2022_v21  ;;  %v2029_v32 = vsub.s32 0, %v3729_v31  ;;  %v2059_v33 = vsub.s32 1, %v3729_v31 }
 0x171   :  { %v2239_v37 = vsel %vm2023_vm2, 1.0, %v2747_v59  ;;  %v2036_v59 = vld [vmem:[%s3654_s6] sm:$0xff] }
 0x187   :  { %v2452_v41 = vpop.f32.mrf.mxu0 }
 0x189   :  { %v2474_v43 = vpop.f32.mrf.mxu1  ;;  %v2453_v49 = vpop.f32.mrf.mxu0 }
 0x18a   :  { %v2454_v58 = vadd.f32 %v2453_v49, %v2452_v41 }
 0x18b   :  { %v2475_v51 = vpop.f32.mrf.mxu1  ;;  %v2455_v47 = vpop.f32.mrf.mxu0 }
 0x18c   :  { %v2476_v44 = vadd.f32 %v2475_v51, %v2474_v43 }
 0x18d   :  { %v2456_v54 = vpop.f32.mrf.mxu0  ;;  %v2477_v50 = vpop.f32.mrf.mxu1 }
 0x18e   :  { %v1846_v57 = vadd.f32 %v2476_v44, %v2454_v58  ;;  %v2749_v50 = vmov 1985246804  }
 0x18f   :  { %v2478_v13 = vpop.f32.mrf.mxu1 }
 0x190   :  { %v2039_v13 = vunpack.c.l.s4 %v2749_v50 }
 0x1a7   :  { %v2496_v55 = vpop.f32.mrf.mxu0 }
 0x1a9   :  { %v2497_v60 = vpop.f32.mrf.mxu0  ;;  %v2518_v61 = vpop.f32.mrf.mxu1 }
 0x1aa   :  { %v2498_v63 = vadd.f32 %v2497_v60, %v2496_v55  ;;  %v2750_v55 = vmov 839922192  }
 0x1ab   :  { %v2499_v23 = vpop.f32.mrf.mxu0  ;;  %v2519_v36 = vpop.f32.mrf.mxu1  ;;  %v2048_v60 = vunpack.c.l.s4 %v2750_v55 }
 0x1ac   :  { %v1886_v52 = vadd.f32 %v2498_v63, %v1846_v57  ;;  %v2520_v56 = vadd.f32 %v2519_v36, %v2518_v61  ;;  %v2040_v61 = vunpack.c.0.s8 %v2039_v13  ;;  %v2240_v63 = vld [vmem:[%s3654_s6 + $0x8] sm:$0xff] }
 0x1ad   :  { %v2500_v29 = vpop.f32.mrf.mxu0  ;;  %v2521_v62 = vpop.f32.mrf.mxu1  ;;  %v2049_v23 = vunpack.c.0.s8 %v2048_v60 }
 0x1ae   :  { %v1926_v48 = vadd.f32 %v2520_v56, %v1886_v52  ;;  %v2043_v36 = vsub.s32 %v2040_v61, %v3729_v31 }
 0x1af   :  { %v2522_v46 = vpop.f32.mrf.mxu1  ;;  %v2052_v29 = vsub.s32 %v2049_v23, %v3729_v31 }
 0x1c7   :  { %v1965_v53 = vpop.f32.mrf.mxu0 }
 0x1c8   :  { %v1966_v40 = vadd.f32 %v1965_v53, %v1926_v48 }
 0x1c9   :  { %v2591_v42 = vpop.f32.mrf.mxu0 }
 0x1ca   :  { %v1971_v24 = vadd.f32 %v1966_v40, %v1334_v34 }
 0x1cb   :  { %v1968_v35 = vpop.f32.mrf.mxu0 }
 0x1cc   :  { %v1979_v0 = vadd.f32 %v2236_v22, %v1971_v24 }
 0x1cd   :  { %v2592_v2 = vpop.f32.mrf.mxu0 }
 0x1ce   :  { %v1980_v4 = vmax.f32 %v1979_v0, 0.0 }
 0x1d0   :  { %v1982_v6 = vsel %vm1981_vm1, %v1980_v4, 0.0 }
 0x1d1   :  { %v1983_v8 = vrot.slane %v1982_v6, 4 }
 0x1d3   :  { %v1984_v10 = vadd.f32 %v1983_v8, %v1982_v6 }
 0x1d5   :  { %v1985_v12 = vrot.slane %v1984_v10, 2 }
 0x1d7   :  { %v1986_v45 = vadd.f32 %v1985_v12, %v1984_v10 }
 0x1d9   :  { %v1987_v39 = vrot.slane %v1986_v45, 1 }
 0x1db   :  { %v1988_v1 = vadd.f32 %v1987_v39, %v1986_v45 }
 0x1dd   :  { %v1989_v38 = vmul.f32 0.5, %v1988_v1 }
 0x1df   :  { %v1990_v3 = vsub.f32 %v1980_v4, %v1989_v38 }
 0x1e1   :  { %v1991_v5 = vmul.f32 %v1990_v3, %v1990_v3 }
 0x1e3   :  { %v1992_v7 = vsel %vm1981_vm1, %v1991_v5, 0.0 }
 0x1e4   :  { %v1993_v9 = vrot.slane %v1992_v7, 4 }
 0x1e6   :  { %v1994_v11 = vadd.f32 %v1993_v9, %v1992_v7 }
 0x1e8   :  { %v1995_v14 = vrot.slane %v1994_v11, 2 }
 0x1ea   :  { %v1996_v15 = vadd.f32 %v1995_v14, %v1994_v11 }
 0x1ec   :  { %v1997_v16 = vrot.slane %v1996_v15, 1 }
 0x1ee   :  { %v1998_v17 = vadd.f32 %v1997_v16, %v1996_v15 }
 0x1f0   :  { %v1999_v18 = vmul.f32 0.5, %v1998_v17 }
 0x1f2   :  { %v2000_v19 = vadd.f32 1e-05, %v1999_v18 }
 0x1f4   :  { %2744 = vrsqrt.f32 %v2000_v19 }
 0x201   :  { %v2745_v25 = vpop.eup %2744 }
 0x202   :  { %v2002_v27 = vmul.f32 %v2745_v25, %v1990_v3 }
 0x204   :  { %v2010_v30 = vmul.f32 %v2237_v26, %v2002_v27 }
 0x206   :  { %v2018_v34 = vadd.f32 %v2238_v28, %v2010_v30 }
 0x208   :  { %v2030_v41 = vrot.slane %v2018_v34, %v2029_v32  ;;  %v2060_v43 = vrot.slane %v2018_v34, %v2059_v33 }
 0x20a   :  { %v2031_v49 = vmul.f32 %v2239_v37, %v2030_v41  ;;  %v2061_v47 = vmul.f32 %v2239_v37, %v2060_v43 }
 0x20c   :  { %v2033_v51 = vsel %vm2032_vm3, %v2031_v49, 0.0  ;;  %v2062_v54 = vsel %vm2032_vm3, %v2061_v47, 0.0 }
 0x20d   :  { %2034 = vadd.xlane.f32.xlu0 %v2033_v51 }
 0x211   :  { %2063 = vadd.xlane.f32.xlu0 %v2062_v54 }
 0x296   :  { %v2035_v62 = vpop.xlane.xlu0 %2034 }
 0x297   :  { %v2044_v46 = vrot.slane %v2035_v62, %v2043_v36  ;;  %v2053_v44 = vrot.slane %v2035_v62, %v2052_v29 }
 0x299   :  { %v2046_v58 = vmul.f32 %v2044_v46, %v2036_v59 }
 0x29a   :  { %v2064_v57 = vpop.xlane.xlu0 %2063 }
 0x29b   :  { %v2055_v52 = vadd.f32 %v2053_v44, %v2046_v58  ;;  %v2074_v56 = vrot.slane %v2064_v57, %v2043_v36  ;;  %v2083_v53 = vrot.slane %v2064_v57, %v2052_v29 }
 0x29d   :  { %2056 = vst [vmem:[%s3655_s7] sm:$0xff] %v2055_v52  ;;  %v2076_v48 = vmul.f32 %v2240_v63, %v2074_v56 }
 0x29f   :  { %v2085_v40 = vadd.f32 %v2083_v53, %v2076_v48 }
 0x2a1   :  { %2241 = vst [vmem:[%s3655_s7 + $0x8] sm:$0xff] %v2085_v40 }

</bundles_post_ra>
